<compile_context>
chip_gen: v5e
topology: v5e:2x2
jax: 0.10.0
libtpu: 0.0.40
codegen_flags: <defaults>
</compile_context>

<pallas_src>
import jax
import jax.numpy as jnp
from jax.experimental import pallas as pl
from jax.experimental.pallas import tpu as pltpu


def critic_kernel(x_ref, w1_ref, b1_ref, w2_ref, b2_ref,
                  w3_ref, b3_ref, w4_ref, b4_ref, o_ref):
    # Layer 1: h = relu(W1 @ x^T + b1) -> (hidden, tile).  Trans-B contraction
    # over obs_dim keeps x in its natural (tile, obs_dim) HBM layout while
    # putting batch on the LANE axis of the activation.  Kept in f32 (tiny K).
    dn = (((1,), (1,)), ((), ()))
    h = jax.lax.dot_general(w1_ref[...], x_ref[...], dn,
                            preferred_element_type=jnp.float32)
    h = jnp.maximum(h + b1_ref[...], 0.0)

    # Layers 2 & 3: bf16 MXU matmuls with f32 accumulation.  Weights arrive
    # pre-cast to bf16; activations are cast right after the f32 bias+ReLU.
    h = jnp.dot(w2_ref[...], h.astype(jnp.bfloat16),
                preferred_element_type=jnp.float32)
    h = jnp.maximum(h + b2_ref[...], 0.0)
    h = jnp.dot(w3_ref[...], h.astype(jnp.bfloat16),
                preferred_element_type=jnp.float32)
    h = jnp.maximum(h + b3_ref[...], 0.0)

    # Output layer (N=1): VPU multiply + XLU sublane reduce (f32) -> (1, tile),
    # stored as an unmasked lane-dense block.  b4 is an SMEM scalar.
    v = jnp.sum(h * w4_ref[...], axis=0, keepdims=True) + b4_ref[0]
    o_ref[...] = v.astype(o_ref.dtype)


def _pick_batch_tile(batch, max_tile=2048):
    """Generation-aware, lane-aligned batch tile."""
    max_tile = max(128, 128 * (int(max_tile) // 128))
    b128 = 128 * pl.cdiv(int(batch), 128)

    kind = ""
    try:
        kind = jax.devices()[0].device_kind.lower()
    except Exception:  # pragma: no cover - defensive
        pass
    two_tensorcores = "v7" in kind   # v7x: 2 TensorCores per chip

    if two_tensorcores:
        # Aim for >= 2 grid steps so the ("parallel",) axis shards across both
        # cores; per-core tiles are multiples of 256 lanes for the 2x256 MXU.
        # TODO(synk): verify both TCs are active in xprof; if not, switch to
        # pltpu.CORE_PARALLEL / explicit core_map.
        tile = 256 * pl.cdiv(int(batch), 2 * 256)
        tile = max(256, min(max_tile, tile))
    else:
        # v5e / v6e: single TensorCore -> one grid step when the batch fits,
        # otherwise the largest tile under the cap (amortizes ~0.35us/step).
        tile = min(b128, max_tile)
    return int(tile)


def critic_forward(x, params, *, batch_tile=2048):
    """x: (B, obs_dim) f32. params: PyTorch-layout (out, in) weights / (out,) biases."""
    B, obs_dim = x.shape
    hidden = params["w1"].shape[0]

    tile = _pick_batch_tile(B, batch_tile)
    Bp = tile * pl.cdiv(B, tile)
    if Bp != B:
        x = jnp.pad(x, ((0, Bp - B), (0, 0)))   # padded rows sliced off below

    w1 = params["w1"]                              # (hidden, obs_dim) f32
    w2 = params["w2"].astype(jnp.bfloat16)         # (hidden, hidden) bf16
    w3 = params["w3"].astype(jnp.bfloat16)         # (hidden, hidden) bf16
    b1 = params["b1"].reshape(hidden, 1)
    b2 = params["b2"].reshape(hidden, 1)
    b3 = params["b3"].reshape(hidden, 1)
    w4c = params["w4"].reshape(hidden, 1)          # (1, hidden) -> column
    b4 = params["b4"].reshape(1,)                  # SMEM scalar

    # Weights / biases are grid-invariant (same block every step, VMEM-resident).
    full2d = lambda arr: pl.BlockSpec(arr.shape, lambda i: (0, 0))

    out = pl.pallas_call(
        critic_kernel,
        out_shape=jax.ShapeDtypeStruct((1, Bp), jnp.float32),
        grid_spec=pltpu.PrefetchScalarGridSpec(
            num_scalar_prefetch=0,
            grid=(Bp // tile,),
            in_specs=[
                pl.BlockSpec((tile, obs_dim), lambda i: (i, 0)),      # x tile
                full2d(w1), full2d(b1),
                full2d(w2), full2d(b2),
                full2d(w3), full2d(b3),
                full2d(w4c),
                pl.BlockSpec(memory_space=pltpu.MemorySpace.SMEM),    # b4 scalar
            ],
            out_specs=pl.BlockSpec((1, tile), lambda i: (0, i)),      # lane-dense
        ),
        compiler_params=pltpu.CompilerParams(
            dimension_semantics=("parallel",),
            vmem_limit_bytes=32 * 1024 * 1024),
    )(x, w1, b1, w2, b2, w3, b3, w4c, b4)

    return out[0, :B].reshape(B, 1)


def init_critic_params(key, obs_dim, hidden_dim):
    """nn.Linear-style init U(-1/sqrt(fan_in), 1/sqrt(fan_in)).

    Weights stored PyTorch-style as (out_features, in_features); biases (out,).
    """
    dims = [(hidden_dim, obs_dim), (hidden_dim, hidden_dim),
            (hidden_dim, hidden_dim), (1, hidden_dim)]
    params = {}
    for idx, (fan_out, fan_in) in enumerate(dims, start=1):
        key, kw, kb = jax.random.split(key, 3)
        bound = 1.0 / (fan_in ** 0.5)
        params[f"w{idx}"] = jax.random.uniform(
            kw, (fan_out, fan_in), jnp.float32, -bound, bound)
        params[f"b{idx}"] = jax.random.uniform(
            kb, (fan_out,), jnp.float32, -bound, bound)
    return params


def critic_reference(x, params):
    """Pure-JAX f32 reference of the same forward pass (PyTorch semantics)."""
    h = jax.nn.relu(x @ params["w1"].T + params["b1"])
    h = jax.nn.relu(h @ params["w2"].T + params["b2"])
    h = jax.nn.relu(h @ params["w3"].T + params["b3"])
    return h @ params["w4"].T + params["b4"]


if __name__ == "__main__":
    # hidden_dim matches the module default; batch deliberately not a multiple
    # of 128 to exercise the padding path.
    obs_dim, hidden_dim, batch = 8, 256, 200

    key = jax.random.PRNGKey(0)
    key, kx = jax.random.split(key)
    x = jax.random.normal(kx, (batch, obs_dim), jnp.float32)
    params = init_critic_params(key, obs_dim, hidden_dim)

    out = critic_forward(x, params)
    out = jax.block_until_ready(out)

    ref = critic_reference(x, params)
    assert out.shape == (batch, 1)
    # Layers 2/3 use bf16 MXU operands with f32 accumulation -> tolerance is
    # loosened vs the pure-f32 reference (observed error is ~1e-3).
    assert jnp.allclose(out, ref, atol=2e-2, rtol=2e-2), "mismatch vs reference"

    print("KERNEL_OK")
</pallas_src>

<mosaic_0001>
module attributes {stable_mosaic.version = 11 : i64} {
  func.func @critic_kernel(%arg0: i32, %arg1: memref<256x8xf32, #tpu.memory_space<vmem>>, %arg2: memref<256x8xf32, #tpu.memory_space<vmem>>, %arg3: memref<256x1xf32, #tpu.memory_space<vmem>>, %arg4: memref<256x256xbf16, #tpu.memory_space<vmem>>, %arg5: memref<256x1xf32, #tpu.memory_space<vmem>>, %arg6: memref<256x256xbf16, #tpu.memory_space<vmem>>, %arg7: memref<256x1xf32, #tpu.memory_space<vmem>>, %arg8: memref<256x1xf32, #tpu.memory_space<vmem>>, %arg9: memref<1xf32, #tpu.memory_space<smem>>, %arg10: memref<1x256xf32, #tpu.memory_space<vmem>>) attributes {dimension_semantics = [#tpu.dimension_semantics<parallel>], iteration_bounds = array<i64: 1>, scalar_prefetch = 0 : i64, scratch_operands = 0 : i64, tpu.core_type = #tpu.core_type<tc>, window_params = [{transform_indices = @transform_0, window_bounds = array<i64: 256, 8>}, {pipeline_mode = #tpu.pipeline_mode<synchronous>, transform_indices = @transform_1, window_bounds = array<i64: 256, 8>}, {pipeline_mode = #tpu.pipeline_mode<synchronous>, transform_indices = @transform_2, window_bounds = array<i64: 256, 1>}, {pipeline_mode = #tpu.pipeline_mode<synchronous>, transform_indices = @transform_3, window_bounds = array<i64: 256, 256>}, {pipeline_mode = #tpu.pipeline_mode<synchronous>, transform_indices = @transform_4, window_bounds = array<i64: 256, 1>}, {pipeline_mode = #tpu.pipeline_mode<synchronous>, transform_indices = @transform_5, window_bounds = array<i64: 256, 256>}, {pipeline_mode = #tpu.pipeline_mode<synchronous>, transform_indices = @transform_6, window_bounds = array<i64: 256, 1>}, {pipeline_mode = #tpu.pipeline_mode<synchronous>, transform_indices = @transform_7, window_bounds = array<i64: 256, 1>}, {transform_indices = @transform_8, window_bounds = array<i64: 1>}, {transform_indices = @transform_9, window_bounds = array<i64: 1, 256>}]} {
    %c0 = arith.constant 0 : index
    %c0_0 = arith.constant 0 : index
    %0 = vector.load %arg2[%c0, %c0_0] : memref<256x8xf32, #tpu.memory_space<vmem>>, vector<256x8xf32>
    %c0_1 = arith.constant 0 : index
    %c0_2 = arith.constant 0 : index
    %1 = vector.load %arg1[%c0_1, %c0_2] : memref<256x8xf32, #tpu.memory_space<vmem>>, vector<256x8xf32>
    %cst = arith.constant dense<0.000000e+00> : vector<256x256xf32>
    %2 = tpu.matmul %0, %1, %cst {dimension_numbers = #tpu.dot_dimension_numbers<[1], [1], [0], [0], [0, 0, 1, 0], [], []>} : vector<256x8xf32>, vector<256x8xf32>, vector<256x256xf32> -> vector<256x256xf32>
    %c0_3 = arith.constant 0 : index
    %c0_4 = arith.constant 0 : index
    %3 = vector.load %arg3[%c0_3, %c0_4] : memref<256x1xf32, #tpu.memory_space<vmem>>, vector<256x1xf32>
    %4 = vector.broadcast %3 : vector<256x1xf32> to vector<256x256xf32>
    %5 = arith.addf %2, %4 : vector<256x256xf32>
    %cst_5 = arith.constant 0.000000e+00 : f32
    %6 = vector.broadcast %cst_5 : f32 to vector<256x256xf32>
    %7 = arith.maximumf %5, %6 : vector<256x256xf32>
    %c0_6 = arith.constant 0 : index
    %c0_7 = arith.constant 0 : index
    %8 = vector.load %arg4[%c0_6, %c0_7] : memref<256x256xbf16, #tpu.memory_space<vmem>>, vector<256x256xbf16>
    %9 = arith.truncf %7 : vector<256x256xf32> to vector<256x256xbf16>
    %cst_8 = arith.constant dense<0.000000e+00> : vector<256x256xf32>
    %10 = tpu.matmul %8, %9, %cst_8 {dimension_numbers = #tpu.dot_dimension_numbers<[1], [0], [0], [1], [0, 0, 1, 1], [], []>} : vector<256x256xbf16>, vector<256x256xbf16>, vector<256x256xf32> -> vector<256x256xf32>
    %c0_9 = arith.constant 0 : index
    %c0_10 = arith.constant 0 : index
    %11 = vector.load %arg5[%c0_9, %c0_10] : memref<256x1xf32, #tpu.memory_space<vmem>>, vector<256x1xf32>
    %12 = vector.broadcast %11 : vector<256x1xf32> to vector<256x256xf32>
    %13 = arith.addf %10, %12 : vector<256x256xf32>
    %cst_11 = arith.constant 0.000000e+00 : f32
    %14 = vector.broadcast %cst_11 : f32 to vector<256x256xf32>
    %15 = arith.maximumf %13, %14 : vector<256x256xf32>
    %c0_12 = arith.constant 0 : index
    %c0_13 = arith.constant 0 : index
    %16 = vector.load %arg6[%c0_12, %c0_13] : memref<256x256xbf16, #tpu.memory_space<vmem>>, vector<256x256xbf16>
    %17 = arith.truncf %15 : vector<256x256xf32> to vector<256x256xbf16>
    %cst_14 = arith.constant dense<0.000000e+00> : vector<256x256xf32>
    %18 = tpu.matmul %16, %17, %cst_14 {dimension_numbers = #tpu.dot_dimension_numbers<[1], [0], [0], [1], [0, 0, 1, 1], [], []>} : vector<256x256xbf16>, vector<256x256xbf16>, vector<256x256xf32> -> vector<256x256xf32>
    %c0_15 = arith.constant 0 : index
    %c0_16 = arith.constant 0 : index
    %19 = vector.load %arg7[%c0_15, %c0_16] : memref<256x1xf32, #tpu.memory_space<vmem>>, vector<256x1xf32>
    %20 = vector.broadcast %19 : vector<256x1xf32> to vector<256x256xf32>
    %21 = arith.addf %18, %20 : vector<256x256xf32>
    %cst_17 = arith.constant 0.000000e+00 : f32
    %22 = vector.broadcast %cst_17 : f32 to vector<256x256xf32>
    %23 = arith.maximumf %21, %22 : vector<256x256xf32>
    %c0_18 = arith.constant 0 : index
    %c0_19 = arith.constant 0 : index
    %24 = vector.load %arg8[%c0_18, %c0_19] : memref<256x1xf32, #tpu.memory_space<vmem>>, vector<256x1xf32>
    %25 = vector.broadcast %24 : vector<256x1xf32> to vector<256x256xf32>
    %26 = arith.mulf %23, %25 : vector<256x256xf32>
    %cst_20 = arith.constant dense<0.000000e+00> : vector<256xf32>
    %27 = vector.multi_reduction <add>, %26, %cst_20 [0] : vector<256x256xf32> to vector<256xf32>
    %28 = vector.shape_cast %27 : vector<256xf32> to vector<1x256xf32>
    %c0_21 = arith.constant 0 : index
    %29 = memref.load %arg9[%c0_21] : memref<1xf32, #tpu.memory_space<smem>>
    %30 = vector.broadcast %29 : f32 to vector<1x256xf32>
    %31 = arith.addf %28, %30 : vector<1x256xf32>
    %c0_22 = arith.constant 0 : index
    %c0_23 = arith.constant 0 : index
    %32 = vector.load %arg10[%c0_22, %c0_23] : memref<1x256xf32, #tpu.memory_space<vmem>>, vector<1x256xf32>
    tpu.vector_store %arg10[%c0_22, %c0_23], %31 {strides = array<i32>} : memref<1x256xf32, #tpu.memory_space<vmem>>, vector<1x256xf32>,
    return
  }
  func.func @transform_0(%arg0: i32) -> (i32, i32) {
    %c0_i32 = arith.constant 0 : i32
    %c0_i32_0 = arith.constant 0 : i32
    return %arg0, %c0_i32 : i32, i32
  }
  func.func @transform_1(%arg0: i32) -> (i32, i32) {
    %c0_i32 = arith.constant 0 : i32
    %c0_i32_0 = arith.constant 0 : i32
    %c0_i32_1 = arith.constant 0 : i32
    return %c0_i32, %c0_i32_0 : i32, i32
  }
  func.func @transform_2(%arg0: i32) -> (i32, i32) {
    %c0_i32 = arith.constant 0 : i32
    %c0_i32_0 = arith.constant 0 : i32
    %c0_i32_1 = arith.constant 0 : i32
    return %c0_i32, %c0_i32_0 : i32, i32
  }
  func.func @transform_3(%arg0: i32) -> (i32, i32) {
    %c0_i32 = arith.constant 0 : i32
    %c0_i32_0 = arith.constant 0 : i32
    %c0_i32_1 = arith.constant 0 : i32
    return %c0_i32, %c0_i32_0 : i32, i32
  }
  func.func @transform_4(%arg0: i32) -> (i32, i32) {
    %c0_i32 = arith.constant 0 : i32
    %c0_i32_0 = arith.constant 0 : i32
    %c0_i32_1 = arith.constant 0 : i32
    return %c0_i32, %c0_i32_0 : i32, i32
  }
  func.func @transform_5(%arg0: i32) -> (i32, i32) {
    %c0_i32 = arith.constant 0 : i32
    %c0_i32_0 = arith.constant 0 : i32
    %c0_i32_1 = arith.constant 0 : i32
    return %c0_i32, %c0_i32_0 : i32, i32
  }
  func.func @transform_6(%arg0: i32) -> (i32, i32) {
    %c0_i32 = arith.constant 0 : i32
    %c0_i32_0 = arith.constant 0 : i32
    %c0_i32_1 = arith.constant 0 : i32
    return %c0_i32, %c0_i32_0 : i32, i32
  }
  func.func @transform_7(%arg0: i32) -> (i32, i32) {
    %c0_i32 = arith.constant 0 : i32
    %c0_i32_0 = arith.constant 0 : i32
    %c0_i32_1 = arith.constant 0 : i32
    return %c0_i32, %c0_i32_0 : i32, i32
  }
  func.func @transform_8(%arg0: i32) -> i32 {
    %c0_i32 = arith.constant 0 : i32
    %c0_i32_0 = arith.constant 0 : i32
    return %c0_i32 : i32
  }
  func.func @transform_9(%arg0: i32) -> (i32, i32) {
    %c0_i32 = arith.constant 0 : i32
    %c0_i32_0 = arith.constant 0 : i32
    return %c0_i32, %arg0 : i32, i32
  }
}

</mosaic_0001>

<bundles_post_ra>
// kernel: tpu_custom_call.1
= control target key start
LH: loop header
LB: loop body
LE: loop exit
PB: predicated region body
PF: predicated region fallthrough
CT: control target
= control target key end

     0   :  { %vm290_vm0 = vcmask 64512   ;;  %v3269_v3 = vmov 0   ;;  %s5589_s0 = inlined_call_operand.vmem [shape: f32[256,8], index: 0, kind: input, shape index: {}]   ;;  %s5590_s1 = inlined_call_operand.vmem [shape: f32[256,8], index: 1, kind: input, shape index: {}]   ;;  %s5591_s2 = inlined_call_operand.vmem [shape: f32[256,1], index: 2, kind: input, shape index: {}]   ;;  %s5592_s3 = inlined_call_operand.vmem [shape: bf16[256,256], index: 3, kind: input, shape index: {}]   ;;  %s5593_s4 = inlined_call_operand.vmem [shape: f32[256,1], index: 4, kind: input, shape index: {}]   ;;  %s5594_s5 = inlined_call_operand.vmem [shape: bf16[256,256], index: 5, kind: input, shape index: {}]   ;;  %s5595_s6 = inlined_call_operand.vmem [shape: f32[256,1], index: 6, kind: input, shape index: {}]   ;;  %s5596_s7 = inlined_call_operand.vmem [shape: f32[256,1], index: 7, kind: input, shape index: {}]   ;;  %s5597_s8 = inlined_call_operand.<no memory space> [shape: f32[1], index: 8, kind: input, shape index: {}]   ;;  %s5598_s9 = inlined_call_operand.hbm [shape: f32[1,256], index: 9, kind: output, shape index: {}]  }
   0x1   :  { %v81_v0 = vld [vmem:[%s5589_s0 + $0x78] sm:$0xff]  ;;  %v128_v2 = vld [vmem:[%s5591_s2 + $0xf0] sm:$0xff]  ;;  %3242 = vset.pattern.permute.xlu2 %v3269_v3  ;;  %3241 = vset.pattern.permute.xlu1 %v3269_v3  ;;  %v110_v5 = vld [vmem:[%s5591_s2 + $0x60] sm:$0xff] }
   0x2   :  { %v97_v1 = vld [vmem:[%s5589_s0 + $0xf8] sm:$0xff]  ;;  %v112_v4 = vld [vmem:[%s5591_s2 + $0x70] sm:$0xff]  ;;  %3240 = vset.pattern.permute.xlu0 %v3269_v3  ;;  %2806 = vmatpush.xpose.msk.msra.mxu0 %vm290_vm0, %v81_v0  ;;  %v79_v8 = vld [vmem:[%s5589_s0 + $0x68] sm:$0xff] }
   0x3   :  { %2854 = vmatpush.xpose.msk.msra.mxu1 %vm290_vm0, %v97_v1  ;;  %282 = vperm.xlu1 %3241, %v128_v2   ;;  %v80_v6 = vld [vmem:[%s5589_s0 + $0x70] sm:$0xff]  ;;  %v95_v9 = vld [vmem:[%s5589_s0 + $0xe8] sm:$0xff]  ;;  %v129_v10 = vld [vmem:[%s5591_s2 + $0xf8] sm:$0xff] }
   0x4   :  { %202 = vperm.xlu0 %3240, %v112_v4   ;;  %192 = vperm.xlu2 %3242, %v110_v5   ;;  %v96_v7 = vld [vmem:[%s5589_s0 + $0xf0] sm:$0xff]  ;;  %v113_v11 = vld [vmem:[%s5591_s2 + $0x78] sm:$0xff]  ;;  %v111_v12 = vld [vmem:[%s5591_s2 + $0x68] sm:$0xff] }
   0x5   :  { %v78_v13 = vld [vmem:[%s5589_s0 + $0x60] sm:$0xff] }
   0x6   :  { %2807 = vmatpush.xpose.msk.msra.mxu0 %vm290_vm0, %v80_v6  ;;  %v94_v14 = vld [vmem:[%s5589_s0 + $0xe0] sm:$0xff] }
   0x7   :  { %2855 = vmatpush.xpose.msk.msra.mxu1 %vm290_vm0, %v96_v7 }
   0xa   :  { %2808 = vmatpush.xpose.msk.msra.mxu0 %vm290_vm0, %v79_v8 }
   0xb   :  { %2856 = vmatpush.xpose.msk.msra.mxu1 %vm290_vm0, %v95_v9  ;;  %287 = vperm.xlu1 %3241, %v129_v10  }
   0xc   :  { %207 = vperm.xlu0 %3240, %v113_v11   ;;  %197 = vperm.xlu2 %3242, %v111_v12  }
   0xd   :  { %15 = vsyncpa [#allocation4], 0  ;;  %v77_v15 = vld [vmem:[%s5589_s0 + $0x58] sm:$0xff]  ;;  %v127_v17 = vld [vmem:[%s5591_s2 + $0xe8] sm:$0xff]  ;;  %s2797_s12 = sshll.u32 %s5598_s9, 4  ;;  %vm2782_vm1 = vcmask 1040384   ;;  %s2798_s12 = int_to_ptr.hbm [resolvable:$true] %s2797_s12 }
   0xe   :  { %2809 = vmatpush.xpose.msk.msra.mxu0 %vm290_vm0, %v78_v13  ;;  %v93_v16 = vld [vmem:[%s5589_s0 + $0xd8] sm:$0xff]  ;;  %v126_v18 = vld [vmem:[%s5591_s2 + $0xe0] sm:$0xff]  ;;  %v108_v19 = vld [vmem:[%s5591_s2 + $0x50] sm:$0xff] }
   0xf   :  { %2857 = vmatpush.xpose.msk.msra.mxu1 %vm290_vm0, %v94_v14  ;;  %v76_v20 = vld [vmem:[%s5589_s0 + $0x50] sm:$0xff]  ;;  %v75_v22 = vld [vmem:[%s5589_s0 + $0x48] sm:$0xff]  ;;  %v109_v25 = vld [vmem:[%s5591_s2 + $0x58] sm:$0xff] }
  0x10   :  { %v92_v21 = vld [vmem:[%s5589_s0 + $0xd0] sm:$0xff]  ;;  %v91_v23 = vld [vmem:[%s5589_s0 + $0xc8] sm:$0xff]  ;;  %v125_v26 = vld [vmem:[%s5591_s2 + $0xd8] sm:$0xff] }
  0x11   :  { %v124_v24 = vld [vmem:[%s5591_s2 + $0xd0] sm:$0xff]  ;;  %v74_v27 = vld [vmem:[%s5589_s0 + $0x40] sm:$0xff]  ;;  %v73_v29 = vld [vmem:[%s5589_s0 + $0x38] sm:$0xff] }
  0x12   :  { %2810 = vmatpush.xpose.msk.msra.mxu0 %vm290_vm0, %v77_v15  ;;  %v90_v28 = vld [vmem:[%s5589_s0 + $0xc0] sm:$0xff]  ;;  %v89_v30 = vld [vmem:[%s5589_s0 + $0xb8] sm:$0xff]  ;;  %v107_v31 = vld [vmem:[%s5591_s2 + $0x48] sm:$0xff] }
  0x13   :  { %2858 = vmatpush.xpose.msk.msra.mxu1 %vm290_vm0, %v93_v16  ;;  %277 = vperm.xlu1 %3241, %v127_v17   ;;  %v122_v32 = vld [vmem:[%s5591_s2 + $0xc0] sm:$0xff]  ;;  %v72_v34 = vld [vmem:[%s5589_s0 + $0x30] sm:$0xff]  ;;  %v71_v36 = vld [vmem:[%s5589_s0 + $0x28] sm:$0xff] }
  0x14   :  { %272 = vperm.xlu0 %3240, %v126_v18   ;;  %182 = vperm.xlu2 %3242, %v108_v19   ;;  %v106_v33 = vld [vmem:[%s5591_s2 + $0x40] sm:$0xff]  ;;  %v88_v35 = vld [vmem:[%s5589_s0 + $0xb0] sm:$0xff]  ;;  %v87_v37 = vld [vmem:[%s5589_s0 + $0xa8] sm:$0xff] }
  0x15   :  { %v104_v38 = vld [vmem:[%s5591_s2 + $0x30] sm:$0xff]  ;;  %v123_v39 = vld [vmem:[%s5591_s2 + $0xc8] sm:$0xff]  ;;  %v105_v40 = vld [vmem:[%s5591_s2 + $0x38] sm:$0xff] }
  0x16   :  { %2811 = vmatpush.xpose.msk.msra.mxu0 %vm290_vm0, %v76_v20  ;;  %v70_v41 = vld [vmem:[%s5589_s0 + $0x20] sm:$0xff]  ;;  %v69_v43 = vld [vmem:[%s5589_s0 + $0x18] sm:$0xff]  ;;  %v120_v46 = vld [vmem:[%s5591_s2 + $0xb0] sm:$0xff] }
  0x17   :  { %2859 = vmatpush.xpose.msk.msra.mxu1 %vm290_vm0, %v92_v21  ;;  %v86_v42 = vld [vmem:[%s5589_s0 + $0xa0] sm:$0xff]  ;;  %v85_v44 = vld [vmem:[%s5589_s0 + $0x98] sm:$0xff]  ;;  %v68_v48 = vld [vmem:[%s5589_s0 + $0x10] sm:$0xff] }
  0x18   :  { %v121_v45 = vld [vmem:[%s5591_s2 + $0xb8] sm:$0xff]  ;;  %v102_v47 = vld [vmem:[%s5591_s2 + $0x20] sm:$0xff]  ;;  %v84_v49 = vld [vmem:[%s5589_s0 + $0x90] sm:$0xff] }
  0x19   :  { %v67_v50 = vld [vmem:[%s5589_s0 + $0x8] sm:$0xff]  ;;  %v118_v52 = vld [vmem:[%s5591_s2 + $0xa0] sm:$0xff]  ;;  %v101_v58 = vld [vmem:[%s5591_s2 + $0x18] sm:$0xff] }
  0x1a   :  { %2812 = vmatpush.xpose.msk.msra.mxu0 %vm290_vm0, %v75_v22  ;;  %v83_v51 = vld [vmem:[%s5589_s0 + $0x88] sm:$0xff]  ;;  %v66_v55 = vld [vmem:[%s5589_s0] sm:$0xff]  ;;  %v116_v59 = vld [vmem:[%s5591_s2 + $0x90] sm:$0xff] }
  0x1b   :  { %2860 = vmatpush.xpose.msk.msra.mxu1 %vm290_vm0, %v91_v23  ;;  %262 = vperm.xlu1 %3241, %v124_v24   ;;  %v103_v53 = vld [vmem:[%s5591_s2 + $0x28] sm:$0xff]  ;;  %v82_v56 = vld [vmem:[%s5589_s0 + $0x80] sm:$0xff]  ;;  %v100_v60 = vld [vmem:[%s5591_s2 + $0x10] sm:$0xff] }
  0x1c   :  { %187 = vperm.xlu0 %3240, %v109_v25   ;;  %267 = vperm.xlu2 %3242, %v125_v26   ;;  %v119_v54 = vld [vmem:[%s5591_s2 + $0xa8] sm:$0xff]  ;;  %v34_v57 = vld [vmem:[%s5590_s1] sm:$0xff]  ;;  %v117_v63 = vld [vmem:[%s5591_s2 + $0x98] sm:$0xff] }
  0x1d   :  { %v35_v61 = vld [vmem:[%s5590_s1 + $0x8] sm:$0xff]  ;;  %v98_v62 = vld [vmem:[%s5591_s2] sm:$0xff]  ;;  %v36_v1 = vld [vmem:[%s5590_s1 + $0x10] sm:$0xff] }
  0x1e   :  { %2813 = vmatpush.xpose.msk.msra.mxu0 %vm290_vm0, %v74_v27  ;;  %v99_v0 = vld [vmem:[%s5591_s2 + $0x8] sm:$0xff]  ;;  %v114_v3 = vld [vmem:[%s5591_s2 + $0x80] sm:$0xff]  ;;  %v37_v5 = vld [vmem:[%s5590_s1 + $0x18] sm:$0xff] }
  0x1f   :  { %2861 = vmatpush.xpose.msk.msra.mxu1 %vm290_vm0, %v90_v28  ;;  %v115_v2 = vld [vmem:[%s5591_s2 + $0x88] sm:$0xff]  ;;  %v837_v4 = vld [vmem:[%s5593_s4] sm:$0xff]  ;;  %v839_v6 = vld [vmem:[%s5593_s4 + $0x10] sm:$0xff] }
  0x20   :  { %v838_v7 = vld [vmem:[%s5593_s4 + $0x8] sm:$0xff]  ;;  %v840_v8 = vld [vmem:[%s5593_s4 + $0x18] sm:$0xff]  ;;  %v38_v9 = vld [vmem:[%s5590_s1 + $0x20] sm:$0xff] }
  0x21   :  { %v842_v10 = vld [vmem:[%s5593_s4 + $0x28] sm:$0xff]  ;;  %v841_v11 = vld [vmem:[%s5593_s4 + $0x20] sm:$0xff]  ;;  %v843_v12 = vld [vmem:[%s5593_s4 + $0x30] sm:$0xff] }
  0x22   :  { %2814 = vmatpush.xpose.msk.msra.mxu0 %vm290_vm0, %v73_v29  ;;  %v39_v13 = vld [vmem:[%s5590_s1 + $0x28] sm:$0xff]  ;;  %v845_v14 = vld [vmem:[%s5593_s4 + $0x40] sm:$0xff]  ;;  %v844_v15 = vld [vmem:[%s5593_s4 + $0x38] sm:$0xff] }
  0x23   :  { %2862 = vmatpush.xpose.msk.msra.mxu1 %vm290_vm0, %v89_v30  ;;  %177 = vperm.xlu1 %3241, %v107_v31   ;;  %v846_v16 = vld [vmem:[%s5593_s4 + $0x48] sm:$0xff]  ;;  %v40_v17 = vld [vmem:[%s5590_s1 + $0x30] sm:$0xff]  ;;  %v848_v18 = vld [vmem:[%s5593_s4 + $0x58] sm:$0xff] }
  0x24   :  { %252 = vperm.xlu2 %3242, %v122_v32   ;;  %172 = vperm.xlu0 %3240, %v106_v33   ;;  %v847_v19 = vld [vmem:[%s5593_s4 + $0x50] sm:$0xff]  ;;  %v849_v20 = vld [vmem:[%s5593_s4 + $0x60] sm:$0xff]  ;;  %v41_v21 = vld [vmem:[%s5590_s1 + $0x38] sm:$0xff] }
  0x25   :  { %v851_v22 = vld [vmem:[%s5593_s4 + $0x70] sm:$0xff]  ;;  %v850_v23 = vld [vmem:[%s5593_s4 + $0x68] sm:$0xff]  ;;  %v852_v24 = vld [vmem:[%s5593_s4 + $0x78] sm:$0xff] }
  0x26   :  { %2815 = vmatpush.xpose.msk.msra.mxu0 %vm290_vm0, %v72_v34  ;;  %v42_v25 = vld [vmem:[%s5590_s1 + $0x40] sm:$0xff]  ;;  %v868_v26 = vld [vmem:[%s5593_s4 + $0xf8] sm:$0xff]  ;;  %v867_v27 = vld [vmem:[%s5593_s4 + $0xf0] sm:$0xff] }
  0x27   :  { %2863 = vmatpush.xpose.msk.msra.mxu1 %vm290_vm0, %v88_v35  ;;  %v865_v28 = vld [vmem:[%s5593_s4 + $0xe0] sm:$0xff]  ;;  %v43_v29 = vld [vmem:[%s5590_s1 + $0x48] sm:$0xff]  ;;  %v863_v30 = vld [vmem:[%s5593_s4 + $0xd0] sm:$0xff] }
  0x28   :  { %v866_v31 = vld [vmem:[%s5593_s4 + $0xe8] sm:$0xff]  ;;  %v864_v32 = vld [vmem:[%s5593_s4 + $0xd8] sm:$0xff]  ;;  %v44_v33 = vld [vmem:[%s5590_s1 + $0x50] sm:$0xff] }
  0x29   :  { %v862_v34 = vld [vmem:[%s5593_s4 + $0xc8] sm:$0xff]  ;;  %v861_v35 = vld [vmem:[%s5593_s4 + $0xc0] sm:$0xff] }
  0x2a   :  { %2816 = vmatpush.xpose.msk.msra.mxu0 %vm290_vm0, %v71_v36  ;;  %v859_v36 = vld [vmem:[%s5593_s4 + $0xb0] sm:$0xff] }
  0x2b   :  { %2864 = vmatpush.xpose.msk.msra.mxu1 %vm290_vm0, %v87_v37  ;;  %162 = vperm.xlu1 %3241, %v104_v38   ;;  %v45_v37 = vld [vmem:[%s5590_s1 + $0x58] sm:$0xff]  ;;  %v857_v38 = vld [vmem:[%s5593_s4 + $0xa0] sm:$0xff] }
  0x2c   :  { %257 = vperm.xlu0 %3240, %v123_v39   ;;  %167 = vperm.xlu2 %3242, %v105_v40   ;;  %v860_v39 = vld [vmem:[%s5593_s4 + $0xb8] sm:$0xff]  ;;  %v858_v40 = vld [vmem:[%s5593_s4 + $0xa8] sm:$0xff] }
  0x2e   :  { %2817 = vmatpush.xpose.msk.msra.mxu0 %vm290_vm0, %v70_v41  ;;  %v46_v41 = vld [vmem:[%s5590_s1 + $0x60] sm:$0xff] }
  0x2f   :  { %2865 = vmatpush.xpose.msk.msra.mxu1 %vm290_vm0, %v86_v42  ;;  %v856_v42 = vld [vmem:[%s5593_s4 + $0x98] sm:$0xff] }
  0x32   :  { %2818 = vmatpush.xpose.msk.msra.mxu0 %vm290_vm0, %v69_v43  ;;  %v855_v43 = vld [vmem:[%s5593_s4 + $0x90] sm:$0xff] }
  0x33   :  { %2866 = vmatpush.xpose.msk.msra.mxu1 %vm290_vm0, %v85_v44  ;;  %247 = vperm.xlu1 %3241, %v121_v45   ;;  %v853_v44 = vld [vmem:[%s5593_s4 + $0x80] sm:$0xff]  ;;  %v47_v45 = vld [vmem:[%s5590_s1 + $0x68] sm:$0xff] }
  0x34   :  { %242 = vperm.xlu0 %3240, %v120_v46   ;;  %152 = vperm.xlu2 %3242, %v102_v47   ;;  %v1673_v46 = vld [vmem:[%s5595_s6] sm:$0xff]  ;;  %v854_v47 = vld [vmem:[%s5593_s4 + $0x88] sm:$0xff] }
  0x36   :  { %2819 = vmatpush.xpose.msk.msra.mxu0 %vm290_vm0, %v68_v48  ;;  %v1674_v48 = vld [vmem:[%s5595_s6 + $0x8] sm:$0xff] }
  0x37   :  { %2867 = vmatpush.xpose.msk.msra.mxu1 %vm290_vm0, %v84_v49  ;;  %v48_v49 = vld [vmem:[%s5590_s1 + $0x70] sm:$0xff] }
  0x3a   :  { %2820 = vmatpush.xpose.msk.msra.mxu0 %vm290_vm0, %v67_v50  ;;  %v1676_v50 = vld [vmem:[%s5595_s6 + $0x18] sm:$0xff] }
  0x3b   :  { %2868 = vmatpush.xpose.msk.msra.mxu1 %vm290_vm0, %v83_v51  ;;  %232 = vperm.xlu1 %3241, %v118_v52   ;;  %v1675_v51 = vld [vmem:[%s5595_s6 + $0x10] sm:$0xff]  ;;  %v1677_v52 = vld [vmem:[%s5595_s6 + $0x20] sm:$0xff] }
  0x3c   :  { %157 = vperm.xlu0 %3240, %v103_v53   ;;  %237 = vperm.xlu2 %3242, %v119_v54   ;;  %v49_v53 = vld [vmem:[%s5590_s1 + $0x78] sm:$0xff]  ;;  %v1679_v54 = vld [vmem:[%s5595_s6 + $0x30] sm:$0xff] }
  0x3e   :  { %2821 = vmatpush.xpose.msk.msra.mxu0 %vm290_vm0, %v66_v55  ;;  %v1678_v55 = vld [vmem:[%s5595_s6 + $0x28] sm:$0xff] }
  0x3f   :  { %2869 = vmatpush.xpose.msk.msra.mxu1 %vm290_vm0, %v82_v56  ;;  %v1680_v56 = vld [vmem:[%s5595_s6 + $0x38] sm:$0xff] }
  0x41   :  { %2822 = vmatmul.msk.f32.vlgmr.msra.gmra.mxu0 %vm290_vm0, %v34_v57 }
  0x42   :  { %2870 = vmatmul.msk.f32.vlgmr.msra.gmra.mxu1 %vm290_vm0, %v34_v57  ;;  %v50_v57 = vld [vmem:[%s5590_s1 + $0x80] sm:$0xff] }
  0x43   :  { %147 = vperm.xlu1 %3241, %v101_v58  }
  0x44   :  { %222 = vperm.xlu2 %3242, %v116_v59   ;;  %142 = vperm.xlu0 %3240, %v100_v60   ;;  %v1682_v60 = vld [vmem:[%s5595_s6 + $0x48] sm:$0xff] }
  0x49   :  { %2823 = vmatmul.msk.f32.gmra.mxu0 %vm290_vm0, %v35_v61 }
  0x4a   :  { %2871 = vmatmul.msk.f32.gmra.mxu1 %vm290_vm0, %v35_v61  ;;  %v1681_v61 = vld [vmem:[%s5595_s6 + $0x40] sm:$0xff] }
  0x4b   :  { %132 = vperm.xlu1 %3241, %v98_v62   ;;  %v1683_v62 = vld [vmem:[%s5595_s6 + $0x50] sm:$0xff] }
  0x4c   :  { %227 = vperm.xlu0 %3240, %v117_v63   ;;  %137 = vperm.xlu2 %3242, %v99_v0   ;;  %v51_v63 = vld [vmem:[%s5590_s1 + $0x88] sm:$0xff] }
  0x51   :  { %2824 = vmatmul.msk.f32.gmra.mxu0 %vm290_vm0, %v36_v1 }
  0x52   :  { %2872 = vmatmul.msk.f32.gmra.mxu1 %vm290_vm0, %v36_v1 }
  0x53   :  { %217 = vperm.xlu1 %3241, %v115_v2   ;;  %v1685_v2 = vld [vmem:[%s5595_s6 + $0x60] sm:$0xff] }
  0x54   :  { %212 = vperm.xlu0 %3240, %v114_v3   ;;  %871 = vperm.xlu2 %3242, %v837_v4   ;;  %v1684_v3 = vld [vmem:[%s5595_s6 + $0x58] sm:$0xff]  ;;  %v1686_v4 = vld [vmem:[%s5595_s6 + $0x68] sm:$0xff] }
  0x59   :  { %2825 = vmatmul.msk.f32.gmra.mxu0 %vm290_vm0, %v37_v5 }
  0x5a   :  { %2873 = vmatmul.msk.f32.gmra.mxu1 %vm290_vm0, %v37_v5  ;;  %v52_v5 = vld [vmem:[%s5590_s1 + $0x90] sm:$0xff] }
  0x5b   :  { %881 = vperm.xlu1 %3241, %v839_v6  }
  0x5c   :  { %876 = vperm.xlu0 %3240, %v838_v7   ;;  %886 = vperm.xlu2 %3242, %v840_v8   ;;  %v1688_v8 = vld [vmem:[%s5595_s6 + $0x78] sm:$0xff] }
  0x61   :  { %2826 = vmatmul.msk.f32.gmra.mxu0 %vm290_vm0, %v38_v9 }
  0x62   :  { %2874 = vmatmul.msk.f32.gmra.mxu1 %vm290_vm0, %v38_v9  ;;  %v1687_v9 = vld [vmem:[%s5595_s6 + $0x70] sm:$0xff] }
  0x63   :  { %896 = vperm.xlu1 %3241, %v842_v10   ;;  %v1689_v10 = vld [vmem:[%s5595_s6 + $0x80] sm:$0xff] }
  0x64   :  { %891 = vperm.xlu0 %3240, %v841_v11   ;;  %901 = vperm.xlu2 %3242, %v843_v12   ;;  %v53_v11 = vld [vmem:[%s5590_s1 + $0x98] sm:$0xff] }
  0x69   :  { %2827 = vmatmul.msk.f32.gmra.mxu0 %vm290_vm0, %v39_v13 }
  0x6a   :  { %2875 = vmatmul.msk.f32.gmra.mxu1 %vm290_vm0, %v39_v13 }
  0x6b   :  { %911 = vperm.xlu1 %3241, %v845_v14   ;;  %v1691_v14 = vld [vmem:[%s5595_s6 + $0x90] sm:$0xff] }
  0x6c   :  { %906 = vperm.xlu0 %3240, %v844_v15   ;;  %916 = vperm.xlu2 %3242, %v846_v16   ;;  %v1690_v15 = vld [vmem:[%s5595_s6 + $0x88] sm:$0xff]  ;;  %v1692_v16 = vld [vmem:[%s5595_s6 + $0x98] sm:$0xff] }
  0x71   :  { %2828 = vmatmul.msk.f32.gmra.mxu0 %vm290_vm0, %v40_v17 }
  0x72   :  { %2876 = vmatmul.msk.f32.gmra.mxu1 %vm290_vm0, %v40_v17  ;;  %v54_v17 = vld [vmem:[%s5590_s1 + $0xa0] sm:$0xff] }
  0x73   :  { %926 = vperm.xlu1 %3241, %v848_v18  }
  0x74   :  { %921 = vperm.xlu0 %3240, %v847_v19   ;;  %931 = vperm.xlu2 %3242, %v849_v20   ;;  %v1694_v20 = vld [vmem:[%s5595_s6 + $0xa8] sm:$0xff] }
  0x79   :  { %2829 = vmatmul.msk.f32.gmra.mxu0 %vm290_vm0, %v41_v21 }
  0x7a   :  { %2877 = vmatmul.msk.f32.gmra.mxu1 %vm290_vm0, %v41_v21  ;;  %v1693_v21 = vld [vmem:[%s5595_s6 + $0xa0] sm:$0xff] }
  0x7b   :  { %941 = vperm.xlu1 %3241, %v851_v22   ;;  %v1695_v22 = vld [vmem:[%s5595_s6 + $0xb0] sm:$0xff] }
  0x7c   :  { %936 = vperm.xlu0 %3240, %v850_v23   ;;  %946 = vperm.xlu2 %3242, %v852_v24   ;;  %v55_v23 = vld [vmem:[%s5590_s1 + $0xa8] sm:$0xff] }
  0x81   :  { %2830 = vmatmul.msk.f32.gmra.mxu0 %vm290_vm0, %v42_v25 }
  0x82   :  { %2878 = vmatmul.msk.f32.gmra.mxu1 %vm290_vm0, %v42_v25 }
  0x83   :  { %1026 = vperm.xlu1 %3241, %v868_v26   ;;  %v1697_v26 = vld [vmem:[%s5595_s6 + $0xc0] sm:$0xff] }
  0x84   :  { %1021 = vperm.xlu0 %3240, %v867_v27   ;;  %1011 = vperm.xlu2 %3242, %v865_v28   ;;  %v1696_v27 = vld [vmem:[%s5595_s6 + $0xb8] sm:$0xff]  ;;  %v1698_v28 = vld [vmem:[%s5595_s6 + $0xc8] sm:$0xff] }
  0x89   :  { %2831 = vmatmul.msk.f32.gmra.mxu0 %vm290_vm0, %v43_v29 }
  0x8a   :  { %2879 = vmatmul.msk.f32.gmra.mxu1 %vm290_vm0, %v43_v29  ;;  %v56_v29 = vld [vmem:[%s5590_s1 + $0xb0] sm:$0xff] }
  0x8b   :  { %1001 = vperm.xlu1 %3241, %v863_v30  }
  0x8c   :  { %1016 = vperm.xlu0 %3240, %v866_v31   ;;  %1006 = vperm.xlu2 %3242, %v864_v32   ;;  %v1700_v32 = vld [vmem:[%s5595_s6 + $0xd8] sm:$0xff] }
  0x91   :  { %2832 = vmatmul.msk.f32.gmra.mxu0 %vm290_vm0, %v44_v33 }
  0x92   :  { %2880 = vmatmul.msk.f32.gmra.mxu1 %vm290_vm0, %v44_v33  ;;  %v1699_v33 = vld [vmem:[%s5595_s6 + $0xd0] sm:$0xff] }
  0x93   :  { %996 = vperm.xlu1 %3241, %v862_v34   ;;  %v1701_v34 = vld [vmem:[%s5595_s6 + $0xe0] sm:$0xff] }
  0x94   :  { %991 = vperm.xlu0 %3240, %v861_v35   ;;  %981 = vperm.xlu2 %3242, %v859_v36   ;;  %v3871_v35 = vpop.permute.xlu2 %192  ;;  %v3873_v36 = vpop.permute.xlu1 %282 }
  0x99   :  { %2833 = vmatmul.msk.f32.gmra.mxu0 %vm290_vm0, %v45_v37 }
  0x9a   :  { %2881 = vmatmul.msk.f32.gmra.mxu1 %vm290_vm0, %v45_v37  ;;  %v57_v37 = vld [vmem:[%s5590_s1 + $0xb8] sm:$0xff] }
  0x9b   :  { %971 = vperm.xlu1 %3241, %v857_v38  }
  0x9c   :  { %986 = vperm.xlu0 %3240, %v860_v39   ;;  %976 = vperm.xlu2 %3242, %v858_v40   ;;  %v1703_v40 = vld [vmem:[%s5595_s6 + $0xf0] sm:$0xff] }
  0xa1   :  { %2834 = vmatmul.msk.f32.gmra.mxu0 %vm290_vm0, %v46_v41 }
  0xa2   :  { %2882 = vmatmul.msk.f32.gmra.mxu1 %vm290_vm0, %v46_v41  ;;  %v1702_v41 = vld [vmem:[%s5595_s6 + $0xe8] sm:$0xff] }
  0xa3   :  { %966 = vperm.xlu1 %3241, %v856_v42   ;;  %v1704_v42 = vld [vmem:[%s5595_s6 + $0xf8] sm:$0xff] }
  0xa4   :  { %961 = vperm.xlu0 %3240, %v855_v43   ;;  %951 = vperm.xlu2 %3242, %v853_v44   ;;  %v3893_v43 = vpop.permute.xlu0 %202  ;;  %v3895_v44 = vpop.permute.xlu2 %197 }
  0xa9   :  { %2835 = vmatmul.msk.f32.gmra.mxu0 %vm290_vm0, %v47_v45 }
  0xaa   :  { %2883 = vmatmul.msk.f32.gmra.mxu1 %vm290_vm0, %v47_v45  ;;  %v3897_v45 = vpop.permute.xlu1 %287 }
  0xab   :  { %1707 = vperm.xlu1 %3241, %v1673_v46   ;;  %v58_v46 = vld [vmem:[%s5590_s1 + $0xc0] sm:$0xff] }
  0xac   :  { %956 = vperm.xlu0 %3240, %v854_v47   ;;  %1712 = vperm.xlu2 %3242, %v1674_v48  }
  0xb1   :  { %2836 = vmatmul.msk.f32.gmra.mxu0 %vm290_vm0, %v48_v49 }
  0xb2   :  { %2884 = vmatmul.msk.f32.gmra.mxu1 %vm290_vm0, %v48_v49  ;;  %v2446_v49 = vld [vmem:[%s5596_s7 + $0x8] sm:$0xff] }
  0xb3   :  { %1722 = vperm.xlu1 %3241, %v1676_v50   ;;  %v2445_v50 = vld [vmem:[%s5596_s7] sm:$0xff] }
  0xb4   :  { %1717 = vperm.xlu0 %3240, %v1675_v51   ;;  %1727 = vperm.xlu2 %3242, %v1677_v52   ;;  %v2447_v51 = vld [vmem:[%s5596_s7 + $0x10] sm:$0xff]  ;;  %v3917_v52 = vpop.permute.xlu0 %207 }
  0xb9   :  { %2837 = vmatmul.msk.f32.gmra.mxu0 %vm290_vm0, %v49_v53 }
  0xba   :  { %2885 = vmatmul.msk.f32.gmra.mxu1 %vm290_vm0, %v49_v53  ;;  %v59_v53 = vld [vmem:[%s5590_s1 + $0xc8] sm:$0xff] }
  0xbb   :  { %1737 = vperm.xlu1 %3241, %v1679_v54  }
  0xbc   :  { %1732 = vperm.xlu0 %3240, %v1678_v55   ;;  %1742 = vperm.xlu2 %3242, %v1680_v56   ;;  %v3926_v56 = vpop.permute.xlu2 %182 }
  0xbe   :  { %v3748_v58 = vpop.f32.mrf.mxu0 }
  0xbf   :  { %v3750_v59 = vpop.f32.mrf.mxu1 }
  0xc1   :  { %2838 = vmatmul.msk.f32.gmra.mxu0 %vm290_vm0, %v50_v57 }
  0xc2   :  { %2886 = vmatmul.msk.f32.gmra.mxu1 %vm290_vm0, %v50_v57  ;;  %v3928_v57 = vpop.permute.xlu1 %277 }
  0xc3   :  { %1752 = vperm.xlu1 %3241, %v1682_v60   ;;  %v2449_v60 = vld [vmem:[%s5596_s7 + $0x20] sm:$0xff] }
  0xc4   :  { %1747 = vperm.xlu0 %3240, %v1681_v61   ;;  %1757 = vperm.xlu2 %3242, %v1683_v62   ;;  %v2448_v61 = vld [vmem:[%s5596_s7 + $0x18] sm:$0xff]  ;;  %v2450_v62 = vld [vmem:[%s5596_s7 + $0x28] sm:$0xff] }
  0xc6   :  { %v3766_v0 = vpop.f32.mrf.mxu0 }
  0xc7   :  { %v3768_v1 = vpop.f32.mrf.mxu1 }
  0xc9   :  { %2839 = vmatmul.msk.f32.gmra.mxu0 %vm290_vm0, %v51_v63 }
  0xca   :  { %2887 = vmatmul.msk.f32.gmra.mxu1 %vm290_vm0, %v51_v63  ;;  %v60_v63 = vld [vmem:[%s5590_s1 + $0xd0] sm:$0xff] }
  0xcb   :  { %1767 = vperm.xlu1 %3241, %v1685_v2  }
  0xcc   :  { %1762 = vperm.xlu0 %3240, %v1684_v3   ;;  %1772 = vperm.xlu2 %3242, %v1686_v4   ;;  %v3948_v4 = vpop.permute.xlu0 %272 }
  0xce   :  { %v3784_v6 = vpop.f32.mrf.mxu0 }
  0xcf   :  { %v3786_v7 = vpop.f32.mrf.mxu1 }
  0xd1   :  { %2840 = vmatmul.msk.f32.gmra.mxu0 %vm290_vm0, %v52_v5 }
  0xd2   :  { %2888 = vmatmul.msk.f32.gmra.mxu1 %vm290_vm0, %v52_v5  ;;  %v2452_v5 = vld [vmem:[%s5596_s7 + $0x38] sm:$0xff] }
  0xd3   :  { %1782 = vperm.xlu1 %3241, %v1688_v8   ;;  %v2451_v8 = vld [vmem:[%s5596_s7 + $0x30] sm:$0xff] }
  0xd4   :  { %1777 = vperm.xlu0 %3240, %v1687_v9   ;;  %1787 = vperm.xlu2 %3242, %v1689_v10   ;;  %v2453_v9 = vld [vmem:[%s5596_s7 + $0x40] sm:$0xff]  ;;  %v3960_v10 = vpop.permute.xlu2 %267 }
  0xd6   :  { %v3802_v12 = vpop.f32.mrf.mxu0 }
  0xd7   :  { %v3804_v13 = vpop.f32.mrf.mxu1 }
  0xd9   :  { %2841 = vmatmul.msk.f32.gmra.mxu0 %vm290_vm0, %v53_v11 }
  0xda   :  { %2889 = vmatmul.msk.f32.gmra.mxu1 %vm290_vm0, %v53_v11  ;;  %v3962_v11 = vpop.permute.xlu1 %262 }
  0xdb   :  { %1797 = vperm.xlu1 %3241, %v1691_v14   ;;  %v61_v14 = vld [vmem:[%s5590_s1 + $0xd8] sm:$0xff] }
  0xdc   :  { %1792 = vperm.xlu0 %3240, %v1690_v15   ;;  %1802 = vperm.xlu2 %3242, %v1692_v16  }
  0xde   :  { %v3820_v18 = vpop.f32.mrf.mxu0 }
  0xdf   :  { %v3822_v19 = vpop.f32.mrf.mxu1 }
  0xe1   :  { %2842 = vmatmul.msk.f32.gmra.mxu0 %vm290_vm0, %v54_v17 }
  0xe2   :  { %2890 = vmatmul.msk.f32.gmra.mxu1 %vm290_vm0, %v54_v17  ;;  %v2455_v17 = vld [vmem:[%s5596_s7 + $0x50] sm:$0xff] }
  0xe3   :  { %1812 = vperm.xlu1 %3241, %v1694_v20   ;;  %v2454_v20 = vld [vmem:[%s5596_s7 + $0x48] sm:$0xff] }
  0xe4   :  { %1807 = vperm.xlu0 %3240, %v1693_v21   ;;  %1817 = vperm.xlu2 %3242, %v1695_v22   ;;  %v2456_v21 = vld [vmem:[%s5596_s7 + $0x58] sm:$0xff]  ;;  %v3982_v22 = vpop.permute.xlu0 %187 }
  0xe6   :  { %v3838_v24 = vpop.f32.mrf.mxu0 }
  0xe7   :  { %v3840_v25 = vpop.f32.mrf.mxu1 }
  0xe9   :  { %2843 = vmatmul.msk.f32.gmra.mxu0 %vm290_vm0, %v55_v23 }
  0xea   :  { %2891 = vmatmul.msk.f32.gmra.mxu1 %vm290_vm0, %v55_v23  ;;  %v3985_v23 = vpop.permute.xlu2 %252 }
  0xeb   :  { %1827 = vperm.xlu1 %3241, %v1697_v26   ;;  %v3987_v26 = vpop.permute.xlu1 %177 }
  0xec   :  { %1822 = vperm.xlu0 %3240, %v1696_v27   ;;  %1832 = vperm.xlu2 %3242, %v1698_v28   ;;  %v62_v27 = vld [vmem:[%s5590_s1 + $0xe0] sm:$0xff] }
  0xee   :  { %v3856_v30 = vpop.f32.mrf.mxu0 }
  0xef   :  { %v3858_v31 = vpop.f32.mrf.mxu1 }
  0xf1   :  { %2844 = vmatmul.msk.f32.gmra.mxu0 %vm290_vm0, %v56_v29 }
  0xf2   :  { %2892 = vmatmul.msk.f32.gmra.mxu1 %vm290_vm0, %v56_v29 }
  0xf3   :  { %1842 = vperm.xlu1 %3241, %v1700_v32   ;;  %v2458_v32 = vld [vmem:[%s5596_s7 + $0x68] sm:$0xff] }
  0xf4   :  { %1837 = vperm.xlu0 %3240, %v1699_v33   ;;  %1847 = vperm.xlu2 %3242, %v1701_v34   ;;  %v2457_v33 = vld [vmem:[%s5596_s7 + $0x60] sm:$0xff]  ;;  %v2459_v34 = vld [vmem:[%s5596_s7 + $0x70] sm:$0xff] }
  0xf6   :  { %v3878_v38 = vpop.f32.mrf.mxu0 }
  0xf7   :  { %v3880_v39 = vpop.f32.mrf.mxu1 }
  0xf9   :  { %2845 = vmatmul.msk.f32.gmra.mxu0 %vm290_vm0, %v57_v37 }
  0xfa   :  { %2893 = vmatmul.msk.f32.gmra.mxu1 %vm290_vm0, %v57_v37  ;;  %v4005_v37 = vpop.permute.xlu0 %172 }
  0xfb   :  { %1857 = vperm.xlu1 %3241, %v1703_v40   ;;  %v4007_v40 = vpop.permute.xlu2 %167 }
  0xfc   :  { %1852 = vperm.xlu0 %3240, %v1702_v41   ;;  %1862 = vperm.xlu2 %3242, %v1704_v42   ;;  %v4009_v41 = vpop.permute.xlu1 %162  ;;  %v63_v42 = vld [vmem:[%s5590_s1 + $0xe8] sm:$0xff] }
  0xfe   :  { %v3902_v47 = vpop.f32.mrf.mxu0 }
  0xff   :  { %v3904_v48 = vpop.f32.mrf.mxu1 }
 0x101   :  { %2846 = vmatmul.msk.f32.gmra.mxu0 %vm290_vm0, %v58_v46 }
 0x102   :  { %2894 = vmatmul.msk.f32.gmra.mxu1 %vm290_vm0, %v58_v46 }
 0x103   :  { %2484 = vperm.xlu1 %3241, %v2446_v49  }
 0x104   :  { %2479 = vperm.xlu0 %3240, %v2445_v50   ;;  %2489 = vperm.xlu2 %3242, %v2447_v51   ;;  %v2461_v50 = vld [vmem:[%s5596_s7 + $0x80] sm:$0xff]  ;;  %v2460_v51 = vld [vmem:[%s5596_s7 + $0x78] sm:$0xff] }
 0x106   :  { %v3922_v54 = vpop.f32.mrf.mxu0 }
 0x107   :  { %v3924_v55 = vpop.f32.mrf.mxu1 }
 0x109   :  { %2847 = vmatmul.msk.f32.gmra.mxu0 %vm290_vm0, %v59_v53 }
 0x10a   :  { %2895 = vmatmul.msk.f32.gmra.mxu1 %vm290_vm0, %v59_v53  ;;  %v2462_v53 = vld [vmem:[%s5596_s7 + $0x88] sm:$0xff] }
 0x10b   :  { %2499 = vperm.xlu1 %3241, %v2449_v60   ;;  %v4027_v60 = vpop.permute.xlu0 %257 }
 0x10c   :  { %2494 = vperm.xlu0 %3240, %v2448_v61   ;;  %2504 = vperm.xlu2 %3242, %v2450_v62   ;;  %v64_v61 = vld [vmem:[%s5590_s1 + $0xf0] sm:$0xff] }
 0x10e   :  { %v3944_v2 = vpop.f32.mrf.mxu0 }
 0x10f   :  { %v3946_v3 = vpop.f32.mrf.mxu1 }
 0x111   :  { %2848 = vmatmul.msk.f32.gmra.mxu0 %vm290_vm0, %v60_v63 }
 0x112   :  { %2896 = vmatmul.msk.f32.gmra.mxu1 %vm290_vm0, %v60_v63 }
 0x113   :  { %2514 = vperm.xlu1 %3241, %v2452_v5   ;;  %v4034_v5 = vpop.permute.xlu2 %152 }
 0x114   :  { %2509 = vperm.xlu0 %3240, %v2451_v8   ;;  %2519 = vperm.xlu2 %3242, %v2453_v9   ;;  %v4036_v8 = vpop.permute.xlu1 %247  ;;  %v2464_v9 = vld [vmem:[%s5596_s7 + $0x98] sm:$0xff] }
 0x115   :  { %5685 = vst [vmem:[#allocation6_spill] sm:$0xff] %v4036_v8  ;;  %v531_v8 = vadd.f32 %v3944_v2, %v3926_v56  ;;  %v2469_v2 = vld [vmem:[%s5596_s7 + $0xc0] sm:$0xff] }
 0x116   :  { %v3968_v15 = vpop.f32.mrf.mxu0 }
 0x117   :  { %v3970_v16 = vpop.f32.mrf.mxu1 }
 0x119   :  { %2849 = vmatmul.msk.f32.gmra.mxu0 %vm290_vm0, %v61_v14 }
 0x11a   :  { %2897 = vmatmul.msk.f32.gmra.mxu1 %vm290_vm0, %v61_v14  ;;  %v2463_v14 = vld [vmem:[%s5596_s7 + $0x90] sm:$0xff] }
 0x11b   :  { %2529 = vperm.xlu1 %3241, %v2455_v17   ;;  %v2465_v17 = vld [vmem:[%s5596_s7 + $0xa0] sm:$0xff] }
 0x11c   :  { %2524 = vperm.xlu0 %3240, %v2454_v20   ;;  %2534 = vperm.xlu2 %3242, %v2456_v21   ;;  %v65_v21 = vld [vmem:[%s5590_s1 + $0xf8] sm:$0xff]  ;;  %s3270_s1 = smov [#allocation3]  }
 0x11d   :  { %s2795_s30 = sshll.u32 %s3270_s1, 4  ;;  %s2796_s30 = int_to_ptr.vmem [resolvable:$true] %s2795_s30 }
 0x11e   :  { %v536_v28 = vpop.f32.mrf.mxu0 }
 0x11f   :  { %v3992_v29 = vpop.f32.mrf.mxu1 }
 0x121   :  { %2850 = vmatmul.msk.f32.gmra.mxu0 %vm290_vm0, %v62_v27 }
 0x122   :  { %2898 = vmatmul.msk.f32.gmra.mxu1 %vm290_vm0, %v62_v27 }
 0x123   :  { %2544 = vperm.xlu1 %3241, %v2458_v32  }
 0x124   :  { %2539 = vperm.xlu0 %3240, %v2457_v33   ;;  %2549 = vperm.xlu2 %3242, %v2459_v34  }
 0x126   :  { %v539_v46 = vpop.f32.mrf.mxu0 }
 0x127   :  { %v4014_v49 = vpop.f32.mrf.mxu1  ;;  %v540_v33 = vadd.f32 %v539_v46, %v3895_v44  ;;  %v4071_v46 = vpop.permute.xlu1 %232 }
 0x128   :  { %5688 = vst [vmem:[#allocation9_spill] sm:$0xff] %v4071_v46 }
 0x129   :  { %2851 = vmatmul.msk.f32.gmra.mxu0 %vm290_vm0, %v63_v42 }
 0x12a   :  { %2899 = vmatmul.msk.f32.gmra.mxu1 %vm290_vm0, %v63_v42  ;;  %v2467_v42 = vld [vmem:[%s5596_s7 + $0xb0] sm:$0xff] }
 0x12b   :  { %2559 = vperm.xlu1 %3241, %v2461_v50   ;;  %v4060_v50 = vpop.permute.xlu0 %242 }
 0x12c   :  { %2554 = vperm.xlu0 %3240, %v2460_v51   ;;  %2564 = vperm.xlu2 %3242, %v2462_v53   ;;  %5686 = vst [vmem:[#allocation7_spill] sm:$0xff] %v4060_v50  ;;  %v2466_v51 = vld [vmem:[%s5596_s7 + $0xa8] sm:$0xff]  ;;  %v2468_v53 = vld [vmem:[%s5596_s7 + $0xb8] sm:$0xff] }
 0x12e   :  { %v542_v62 = vpop.f32.mrf.mxu0 }
 0x12f   :  { %v4032_v63 = vpop.f32.mrf.mxu1  ;;  %v543_v20 = vadd.f32 %v542_v62, %v3893_v43  ;;  %v537_v62 = vadd.f32 %v536_v28, %v3871_v35 }
 0x131   :  { %2852 = vmatmul.msk.f32.gmra.mxu0 %vm290_vm0, %v64_v61 }
 0x132   :  { %2900 = vmatmul.msk.f32.gmra.mxu1 %vm290_vm0, %v64_v61  ;;  %v4069_v61 = vpop.permute.xlu2 %237 }
 0x133   :  { %2574 = vperm.xlu1 %3241, %v2464_v9   ;;  %5687 = vst [vmem:[#allocation8_spill] sm:$0xff] %v4069_v61  ;;  %v737_v9 = vmax.f32 %v543_v20, 0.0  ;;  %v733_v61 = vmax.f32 %v537_v62, 0.0  ;;  %v528_v20 = vadd.f32 %v3922_v54, %v3987_v26  ;;  %v4096_v54 = vpop.permute.xlu0 %157 }
 0x134   :  { %2569 = vperm.xlu0 %3240, %v2463_v14   ;;  %2579 = vperm.xlu2 %3242, %v2465_v17   ;;  %v534_v17 = vadd.f32 %v3968_v15, %v3982_v22  ;;  %v2470_v15 = vld [vmem:[%s5596_s7 + $0xc8] sm:$0xff] }
 0x135   :  { %v727_v62 = vmax.f32 %v528_v20, 0.0  ;;  %v2474_v20 = vld [vmem:[%s5596_s7 + $0xe8] sm:$0xff] }
 0x136   :  { %v545_v27 = vpop.f32.mrf.mxu0 }
 0x137   :  { %v4053_v32 = vpop.f32.mrf.mxu1  ;;  %v546_v34 = vadd.f32 %v545_v27, %v3917_v52  ;;  %v735_v27 = vmax.f32 %v540_v33, 0.0  ;;  %v2471_v33 = vld [vmem:[%s5596_s7 + $0xd0] sm:$0xff] }
 0x139   :  { %2853 = vmatmul.msk.f32.gmra.mxu0 %vm290_vm0, %v65_v21  ;;  %v739_v14 = vmax.f32 %v546_v34, 0.0  ;;  %v817_v34 = vpack.c.bf16 %v735_v27, %v733_v61  ;;  %v522_v61 = vadd.f32 %v3878_v38, %v4007_v40  ;;  %v516_v27 = vadd.f32 %v3838_v24, %v4096_v54  ;;  %v2473_v38 = vld [vmem:[%s5596_s7 + $0xe0] sm:$0xff] }
 0x13a   :  { %2901 = vmatmul.msk.f32.gmra.mxu1 %vm290_vm0, %v65_v21  ;;  %v731_v21 = vmax.f32 %v534_v17, 0.0 }
 0x13b   :  { %2589 = vperm.xlu1 %3241, %v2467_v42   ;;  %v819_v50 = vpack.c.bf16 %v739_v14, %v737_v9  ;;  %v525_v42 = vadd.f32 %v3902_v47, %v4005_v37  ;;  %v519_v47 = vadd.f32 %v3856_v30, %v4009_v41  ;;  %v2472_v30 = vld [vmem:[%s5596_s7 + $0xd8] sm:$0xff] }
 0x13c   :  { %2584 = vperm.xlu0 %3240, %v2466_v51   ;;  %2594 = vperm.xlu2 %3242, %v2468_v53   ;;  %v4098_v51 = vpop.permute.xlu2 %222  ;;  %v4100_v53 = vpop.permute.xlu1 %147 }
 0x13d   :  { %1189 = vmatpush.bf16.msrb.mxu0 %v819_v50  ;;  %3222 = vmatpush.bf16.msra.mxu2 %v819_v50  ;;  %v729_v50 = vmax.f32 %v531_v8, 0.0  ;;  %v725_v8 = vmax.f32 %v525_v42, 0.0  ;;  %v510_v24 = vadd.f32 %v3802_v12, %v4100_v53  ;;  %v659_v12 = vadd.f32 %v4053_v32, %v3917_v52 }
 0x13e   :  { %v4079_v46 = vpop.f32.mrf.mxu0 }
 0x13f   :  { %v4081_v28 = vpop.f32.mrf.mxu1  ;;  %v815_v9 = vpack.c.bf16 %v731_v21, %v729_v50  ;;  %v513_v21 = vadd.f32 %v3820_v18, %v4034_v5  ;;  %v4125_v50 = vpop.permute.xlu0 %142 }
 0x140   :  { %v507_v18 = vadd.f32 %v3784_v6, %v4125_v50  ;;  %v2476_v6 = vld [vmem:[%s5596_s7 + $0xf8] sm:$0xff] }
 0x141   :  { %1190 = vmatpush.bf16.msrb.mxu0 %v817_v34  ;;  %3223 = vmatpush.bf16.msra.mxu2 %v817_v34  ;;  %v723_v34 = vmax.f32 %v522_v61, 0.0 }
 0x142   :  { %v713_v52 = vmax.f32 %v507_v18, 0.0 }
 0x143   :  { %2604 = vperm.xlu1 %3241, %v2470_v15   ;;  %v813_v15 = vpack.c.bf16 %v727_v62, %v725_v8 }
 0x144   :  { %2599 = vperm.xlu0 %3240, %v2469_v2   ;;  %2609 = vperm.xlu2 %3242, %v2471_v33   ;;  %v721_v2 = vmax.f32 %v519_v47, 0.0  ;;  %v719_v33 = vmax.f32 %v516_v27, 0.0  ;;  %v4127_v61 = vpop.permute.xlu2 %137  ;;  %v4129_v62 = vpop.permute.xlu1 %132  ;;  %v656_v47 = vadd.f32 %v4032_v63, %v3893_v43  ;;  %v2475_v43 = vld [vmem:[%s5596_s7 + $0xf0] sm:$0xff]  ;;  %v650_v63 = vadd.f32 %v3992_v29, %v3871_v35  ;;  %v3159_v35 = vld [vmem:[%s5592_s3 + $0x4] sm:$0xf0] }
 0x145   :  { %1191 = vmatpush.bf16.msrb.mxu0 %v815_v9  ;;  %3224 = vmatpush.bf16.msra.mxu2 %v815_v9  ;;  %v717_v9 = vmax.f32 %v513_v21, 0.0  ;;  %v3173_v29 = vld [vmem:[%s5592_s3 + $0x74] sm:$0xf0] }
 0x146   :  { %v4106_v14 = vpop.f32.mrf.mxu0  ;;  %v811_v42 = vpack.c.bf16 %v723_v34, %v721_v2  ;;  %v504_v34 = vadd.f32 %v3766_v0, %v4127_v61  ;;  %v653_v0 = vadd.f32 %v4014_v49, %v3895_v44  ;;  %v738_v32 = vmax.f32 %v656_v47, 0.0  ;;  %v2960_v44 = vld [vmem:[%s5592_s3 + $0x70] sm:$0xf] }
 0x147   :  { %v4108_v17 = vpop.f32.mrf.mxu1  ;;  %v647_v49 = vadd.f32 %v3970_v16, %v3982_v22  ;;  %v641_v16 = vadd.f32 %v3924_v55, %v3987_v26 }
 0x148   :  { %v711_v21 = vmax.f32 %v504_v34, 0.0  ;;  %v736_v18 = vmax.f32 %v653_v0, 0.0  ;;  %v4177_v34 = vor.u32 %v3173_v29, %v2960_v44  ;;  %v629_v0 = vadd.f32 %v3840_v25, %v4096_v54 }
 0x149   :  { %1192 = vmatpush.bf16.msrb.mxu0 %v813_v15  ;;  %3225 = vmatpush.bf16.msra.mxu2 %v813_v15  ;;  %v715_v15 = vmax.f32 %v510_v24, 0.0  ;;  %v2904_v24 = vld [vmem:[%s5592_s3] sm:$0xf]  ;;  %v614_v29 = vadd.f32 %v3750_v59, %v4129_v62 }
 0x14a   :  { %v2920_v59 = vld [vmem:[%s5592_s3 + $0x20] sm:$0xf] }
 0x14b   :  { %2619 = vperm.xlu1 %3241, %v2473_v38   ;;  %v809_v38 = vpack.c.bf16 %v719_v33, %v717_v9  ;;  %v807_v2 = vpack.c.bf16 %v715_v15, %v713_v52  ;;  %v644_v33 = vadd.f32 %v3946_v3, %v3926_v56  ;;  %v638_v15 = vadd.f32 %v3904_v48, %v4005_v37 }
 0x14c   :  { %2614 = vperm.xlu0 %3240, %v2472_v30   ;;  %2624 = vperm.xlu2 %3242, %v2474_v20   ;;  %v501_v30 = vadd.f32 %v3748_v58, %v4129_v62  ;;  %v740_v20 = vmax.f32 %v659_v12, 0.0  ;;  %v4175_v12 = vor.u32 %v3159_v35, %v2904_v24  ;;  %v728_v37 = vmax.f32 %v641_v16, 0.0  ;;  %v3177_v62 = vld [vmem:[%s5592_s3 + $0x94] sm:$0xf0] }
 0x14d   :  { %1193 = vmatpush.bf16.msrb.mxu0 %v811_v42  ;;  %3226 = vmatpush.bf16.msra.mxu2 %v811_v42  ;;  %v734_v42 = vmax.f32 %v650_v63, 0.0  ;;  %v730_v22 = vmax.f32 %v644_v33, 0.0  ;;  %v726_v48 = vmax.f32 %v638_v15, 0.0  ;;  %v626_v63 = vadd.f32 %v3822_v19, %v4034_v5  ;;  %v3175_v19 = vld [vmem:[%s5592_s3 + $0x84] sm:$0xf0] }
 0x14e   :  { %v4137_v8 = vpop.f32.mrf.mxu0  ;;  %v709_v58 = vmax.f32 %v501_v30, 0.0  ;;  %v820_v9 = vpack.c.bf16 %v740_v20, %v738_v32  ;;  %v632_v30 = vadd.f32 %v3858_v31, %v4009_v41  ;;  %v2968_v41 = vld [vmem:[%s5592_s3 + $0x80] sm:$0xf]  ;;  %v720_v5 = vmax.f32 %v629_v0, 0.0 }
 0x14f   :  { %v4139_v27 = vpop.f32.mrf.mxu1  ;;  %v814_v31 = vpack.c.bf16 %v728_v37, %v726_v48  ;;  %v718_v25 = vmax.f32 %v626_v63, 0.0  ;;  %v4217_v33 = vor.u32 %v3175_v19, %v2968_v41  ;;  %v2984_v48 = vld [vmem:[%s5592_s3 + $0xa0] sm:$0xf]  ;;  %v3179_v37 = vld [vmem:[%s5592_s3 + $0xa4] sm:$0xf0] }
 0x150   :  { %v805_v47 = vpack.c.bf16 %v711_v21, %v709_v58  ;;  %v722_v32 = vmax.f32 %v632_v30, 0.0  ;;  %v623_v58 = vadd.f32 %v3804_v13, %v4100_v53  ;;  %v710_v13 = vmax.f32 %v614_v29, 0.0  ;;  %v2928_v30 = vld [vmem:[%s5592_s3 + $0x30] sm:$0xf]  ;;  %v3181_v19 = vld [vmem:[%s5592_s3 + $0xb4] sm:$0xf0] }
 0x151   :  { %1194 = vmatpush.bf16.msrb.mxu0 %v809_v38  ;;  %3227 = vmatpush.bf16.msra.mxu2 %v809_v38  ;;  %v732_v38 = vmax.f32 %v647_v49, 0.0  ;;  %v810_v44 = vpack.c.bf16 %v720_v5, %v718_v25  ;;  %v617_v49 = vadd.f32 %v3768_v1, %v4127_v61  ;;  %v3163_v1 = vld [vmem:[%s5592_s3 + $0x24] sm:$0xf0]  ;;  %v2976_v61 = vld [vmem:[%s5592_s3 + $0x90] sm:$0xf] }
 0x152   :  { %v4245_v16 = vor.u32 %v3163_v1, %v2920_v59  ;;  %v2992_v41 = vld [vmem:[%s5592_s3 + $0xb0] sm:$0xf]  ;;  %v2952_v1 = vld [vmem:[%s5592_s3 + $0x60] sm:$0xf] }
 0x153   :  { %2634 = vperm.xlu1 %3241, %v2476_v6   ;;  %v818_v6 = vpack.c.bf16 %v736_v18, %v734_v42  ;;  %v816_v55 = vpack.c.bf16 %v732_v38, %v730_v22  ;;  %v716_v18 = vmax.f32 %v623_v58, 0.0  ;;  %v712_v53 = vmax.f32 %v617_v49, 0.0  ;;  %v3169_v49 = vld [vmem:[%s5592_s3 + $0x54] sm:$0xf0] }
 0x154   :  { %2629 = vperm.xlu0 %3240, %v2475_v43   ;;  %v635_v43 = vadd.f32 %v3880_v39, %v4007_v40  ;;  %v2912_v39 = vld [vmem:[%s5592_s3 + $0x10] sm:$0xf]  ;;  %v3161_v40 = vld [vmem:[%s5592_s3 + $0x14] sm:$0xf0]  ;;  %v4247_v22 = vor.u32 %v3177_v62, %v2976_v61  ;;  %v3171_v62 = vld [vmem:[%s5592_s3 + $0x64] sm:$0xf0] }
 0x155   :  { %1195 = vmatpush.bf16.msrb.mxu0 %v807_v2  ;;  %3228 = vmatpush.bf16.msra.mxu2 %v807_v2  ;;  %v620_v2 = vadd.f32 %v3786_v7, %v4125_v50  ;;  %v4215_v24 = vor.u32 %v3161_v40, %v2912_v39  ;;  %v2936_v39 = vld [vmem:[%s5592_s3 + $0x40] sm:$0xf]  ;;  %v3167_v40 = vld [vmem:[%s5592_s3 + $0x44] sm:$0xf0] }
 0x156   :  { %v4171_v56 = vpop.f32.mrf.mxu0  ;;  %v724_v20 = vmax.f32 %v635_v43, 0.0  ;;  %v3165_v43 = vld [vmem:[%s5592_s3 + $0x34] sm:$0xf0]  ;;  %v4287_v5 = vor.u32 %v3167_v40, %v2936_v39  ;;  %v4332_v40 = vor.u32 %v3171_v62, %v2952_v1 }
 0x157   :  { %v4173_v3 = vpop.f32.mrf.mxu1  ;;  %v714_v42 = vmax.f32 %v620_v2, 0.0  ;;  %v4267_v0 = vor.u32 %v3165_v43, %v2928_v30  ;;  %v3008_v30 = vld [vmem:[%s5592_s3 + $0xd0] sm:$0xf]  ;;  %v3185_v43 = vld [vmem:[%s5592_s3 + $0xd4] sm:$0xf0] }
 0x158   :  { %v812_v21 = vpack.c.bf16 %v724_v20, %v722_v32  ;;  %v4269_v32 = vor.u32 %v3179_v37, %v2984_v48 }
 0x159   :  { %1196 = vmatpush.bf16.msrb.mxu0 %v805_v47  ;;  %3229 = vmatpush.bf16.msra.mxu2 %v805_v47  ;;  %v808_v50 = vpack.c.bf16 %v716_v18, %v714_v42  ;;  %v806_v47 = vpack.c.bf16 %v712_v53, %v710_v13  ;;  %v3000_v42 = vld [vmem:[%s5592_s3 + $0xc0] sm:$0xf]  ;;  %v3183_v18 = vld [vmem:[%s5592_s3 + $0xc4] sm:$0xf0] }
 0x15c   :  { %1197 = vmatmul.bf16.vlgmr.msrb.gmra.mxu0 %v4175_v12  ;;  %1232 = vmatmul.bf16.vlgmr.msra.gmra.mxu2 %v4177_v34 }
 0x15d   :  { %1367 = vmatpush.bf16.msrb.mxu2 %v820_v9 }
 0x15e   :  { %v4189_v52 = vpop.f32.mrf.mxu0 }
 0x15f   :  { %v4191_v26 = vpop.f32.mrf.mxu1 }
 0x161   :  { %1368 = vmatpush.bf16.msrb.mxu2 %v818_v6 }
 0x165   :  { %1369 = vmatpush.bf16.msrb.mxu2 %v816_v55 }
 0x166   :  { %v4209_v54 = vpop.f32.mrf.mxu0 }
 0x167   :  { %v4219_v35 = vpop.f32.mrf.mxu1 }
 0x169   :  { %1370 = vmatpush.bf16.msrb.mxu2 %v814_v31 }
 0x16c   :  { %1202 = vmatmul.bf16.gmra.mxu0 %v4215_v24  ;;  %1237 = vmatmul.bf16.gmra.mxu2 %v4217_v33 }
 0x16d   :  { %1371 = vmatpush.bf16.msrb.mxu2 %v812_v21  ;;  %v4289_v21 = vor.u32 %v3181_v19, %v2992_v41  ;;  %v4334_v41 = vor.u32 %v3185_v43, %v3008_v30 }
 0x16e   :  { %v4227_v7 = vpop.f32.mrf.mxu0 }
 0x16f   :  { %v4229_v9 = vpop.f32.mrf.mxu1 }
 0x171   :  { %1372 = vmatpush.bf16.msrb.mxu2 %v810_v44  ;;  %v2944_v44 = vld [vmem:[%s5592_s3 + $0x50] sm:$0xf] }
 0x172   :  { %v4309_v53 = vor.u32 %v3169_v49, %v2944_v44 }
 0x175   :  { %1373 = vmatpush.bf16.msrb.mxu2 %v808_v50  ;;  %v4311_v50 = vor.u32 %v3183_v18, %v3000_v42 }
 0x176   :  { %v4243_v15 = vpop.f32.mrf.mxu0 }
 0x177   :  { %v4251_v38 = vpop.f32.mrf.mxu1  ;;  %5689 = vst [vmem:[#allocation10_spill] sm:$0xff] %v4311_v50 }
 0x179   :  { %1374 = vmatpush.bf16.msrb.mxu2 %v806_v47 }
 0x17c   :  { %1207 = vmatmul.bf16.gmra.mxu0 %v4245_v16  ;;  %1242 = vmatmul.bf16.gmra.mxu2 %v4247_v22 }
 0x17e   :  { %v572_v6 = vpop.f32.mrf.mxu0 }
 0x17f   :  { %v4265_v63 = vpop.f32.mrf.mxu1 }
 0x186   :  { %v575_v55 = vpop.f32.mrf.mxu0 }
 0x187   :  { %v4273_v31 = vpop.f32.mrf.mxu1  ;;  %v576_v1 = vadd.f32 %v575_v55, %v4027_v60  ;;  %v3187_v55 = vld [vmem:[%s5592_s3 + $0xe4] sm:$0xf0] }
 0x18c   :  { %1212 = vmatmul.bf16.gmra.mxu0 %v4267_v0  ;;  %1247 = vmatmul.bf16.gmra.mxu2 %v4269_v32 }
 0x18e   :  { %v578_v20 = vpop.f32.mrf.mxu0 }
 0x18f   :  { %v4291_v2 = vpop.f32.mrf.mxu1 }
 0x196   :  { %v581_v25 = vpop.f32.mrf.mxu0 }
 0x197   :  { %v4298_v29 = vpop.f32.mrf.mxu1  ;;  %v582_v18 = vadd.f32 %v581_v25, %v3960_v10  ;;  %v5690_v25 = vld [vmem:[#allocation6_spill] sm:$0xff] }
 0x198   :  { %v570_v43 = vadd.f32 %v4243_v15, %v5690_v25  ;;  %v5692_v15 = vld [vmem:[#allocation8_spill] sm:$0xff] }
 0x199   :  { %v763_v62 = vmax.f32 %v582_v18, 0.0  ;;  %v564_v18 = vadd.f32 %v4209_v54, %v5692_v15  ;;  %v555_v54 = vadd.f32 %v4137_v8, %v4098_v51 }
 0x19c   :  { %1217 = vmatmul.bf16.gmra.mxu0 %v4287_v5  ;;  %1252 = vmatmul.bf16.gmra.mxu2 %v4289_v21 }
 0x19e   :  { %v584_v58 = vpop.f32.mrf.mxu0 }
 0x19f   :  { %v4315_v59 = vpop.f32.mrf.mxu1  ;;  %v585_v19 = vadd.f32 %v584_v58, %v3948_v4 }
 0x1a6   :  { %v587_v13 = vpop.f32.mrf.mxu0 }
 0x1a7   :  { %v588_v37 = vadd.f32 %v587_v13, %v3928_v57  ;;  %v700_v44 = vpop.f32.mrf.mxu1  ;;  %v579_v13 = vadd.f32 %v578_v20, %v3962_v11  ;;  %v5691_v20 = vld [vmem:[#allocation7_spill] sm:$0xff] }
 0x1a9   :  { %v761_v30 = vmax.f32 %v579_v13, 0.0 }
 0x1ac   :  { %1222 = vmatmul.bf16.gmra.mxu0 %v4309_v53  ;;  %1257 = vmatmul.bf16.gmra.mxu2 %v4311_v50 }
 0x1ae   :  { %v590_v47 = vpop.f32.mrf.mxu0 }
 0x1af   :  { %v591_v61 = vadd.f32 %v590_v47, %v3873_v36  ;;  %v767_v47 = vmax.f32 %v588_v37, 0.0  ;;  %v759_v37 = vmax.f32 %v576_v1, 0.0  ;;  %v5693_v1 = vld [vmem:[#allocation9_spill] sm:$0xff] }
 0x1b1   :  { %v769_v49 = vmax.f32 %v591_v61, 0.0  ;;  %v573_v61 = vadd.f32 %v572_v6, %v3985_v23  ;;  %v3016_v6 = vld [vmem:[%s5592_s3 + $0xe0] sm:$0xf] }
 0x1b6   :  { %v593_v48 = vpop.f32.mrf.mxu0 }
 0x1b7   :  { %v594_v39 = vadd.f32 %v593_v48, %v3897_v45  ;;  %v765_v48 = vmax.f32 %v585_v19, 0.0  ;;  %v757_v19 = vmax.f32 %v573_v61, 0.0  ;;  %v751_v61 = vmax.f32 %v564_v18, 0.0 }
 0x1b8   :  { %v745_v18 = vmax.f32 %v555_v54, 0.0 }
 0x1b9   :  { %v771_v42 = vmax.f32 %v594_v39, 0.0  ;;  %v833_v58 = vpack.c.bf16 %v767_v47, %v765_v48  ;;  %v703_v39 = vpop.f32.mrf.mxu1  ;;  %v755_v47 = vmax.f32 %v570_v43, 0.0  ;;  %v829_v13 = vpack.c.bf16 %v759_v37, %v757_v19 }
 0x1ba   :  { %v4357_v48 = vor.u32 %v3187_v55, %v3016_v6  ;;  %v704_v8 = vadd.f32 %v703_v39, %v3873_v36  ;;  %v3158_v36 = vld [vmem:[%s5592_s3 + $0x4] sm:$0xf]  ;;  %v3172_v39 = vld [vmem:[%s5592_s3 + $0x74] sm:$0xf] }
 0x1bb   :  { %v835_v50 = vpack.c.bf16 %v771_v42, %v769_v49  ;;  %v831_v49 = vpack.c.bf16 %v763_v62, %v761_v30  ;;  %v4345_v42 = vpop.permute.xlu0 %227 }
 0x1bc   :  { %1227 = vmatmul.bf16.gmra.mxu0 %v4332_v40  ;;  %1262 = vmatmul.bf16.gmra.mxu2 %v4334_v41 }
 0x1bd   :  { %1278 = vmatpush.bf16.msrb.mxu1 %v835_v50  ;;  %3230 = vmatpush.bf16.msra.mxu3 %v835_v50  ;;  %v567_v50 = vadd.f32 %v4227_v7, %v5691_v20  ;;  %v561_v7 = vadd.f32 %v4189_v52, %v5693_v1 }
 0x1bf   :  { %v753_v62 = vmax.f32 %v567_v50, 0.0  ;;  %v749_v43 = vmax.f32 %v561_v7, 0.0 }
 0x1c1   :  { %1279 = vmatpush.bf16.msrb.mxu1 %v833_v58  ;;  %3231 = vmatpush.bf16.msra.mxu3 %v833_v58  ;;  %v558_v58 = vadd.f32 %v4171_v56, %v4345_v42  ;;  %v827_v30 = vpack.c.bf16 %v755_v47, %v753_v62  ;;  %v706_v37 = vpop.f32.mrf.mxu1  ;;  %v825_v56 = vpack.c.bf16 %v751_v61, %v749_v43 }
 0x1c2   :  { %v707_v55 = vadd.f32 %v706_v37, %v3897_v45  ;;  %v701_v62 = vadd.f32 %v700_v44, %v3928_v57  ;;  %v3189_v45 = vld [vmem:[%s5592_s3 + $0xf4] sm:$0xf0]  ;;  %v698_v57 = vadd.f32 %v4315_v59, %v3948_v4  ;;  %v770_v44 = vmax.f32 %v704_v8, 0.0 }
 0x1c3   :  { %v4368_v52 = vpop.permute.xlu0 %212  ;;  %v747_v19 = vmax.f32 %v558_v58, 0.0  ;;  %v2962_v58 = vld [vmem:[%s5592_s3 + $0x78] sm:$0xf0]  ;;  %v695_v61 = vadd.f32 %v4298_v29, %v3960_v10  ;;  %v692_v59 = vadd.f32 %v4291_v2, %v3962_v11  ;;  %v689_v10 = vadd.f32 %v4273_v31, %v4027_v60 }
 0x1c4   :  { %v549_v6 = vadd.f32 %v4079_v46, %v4368_v52  ;;  %v2906_v46 = vld [vmem:[%s5592_s3 + $0x8] sm:$0xf0]  ;;  %v768_v43 = vmax.f32 %v701_v62, 0.0  ;;  %v4403_v4 = vor.u32 %v3172_v39, %v2962_v58  ;;  %v680_v11 = vadd.f32 %v4229_v9, %v5691_v20  ;;  %v3160_v9 = vld [vmem:[%s5592_s3 + $0x14] sm:$0xf] }
 0x1c5   :  { %1280 = vmatpush.bf16.msrb.mxu1 %v831_v49  ;;  %3232 = vmatpush.bf16.msra.mxu3 %v831_v49  ;;  %v4366_v49 = vpop.permute.xlu1 %217  ;;  %v764_v29 = vmax.f32 %v695_v61, 0.0  ;;  %v683_v2 = vadd.f32 %v4251_v38, %v5690_v25  ;;  %v674_v31 = vadd.f32 %v4191_v26, %v5693_v1  ;;  %v2914_v38 = vld [vmem:[%s5592_s3 + $0x18] sm:$0xf0]  ;;  %v3174_v25 = vld [vmem:[%s5592_s3 + $0x84] sm:$0xf]  ;;  %v671_v20 = vadd.f32 %v4173_v3, %v4345_v42 }
 0x1c6   :  { %v552_v50 = vadd.f32 %v4106_v14, %v4366_v49  ;;  %v741_v7 = vmax.f32 %v549_v6, 0.0  ;;  %v3024_v14 = vld [vmem:[%s5592_s3 + $0xf0] sm:$0xf]  ;;  %5695 = vst [vmem:[#allocation7_spill] sm:$0xff] %v4403_v4  ;;  %v686_v6 = vadd.f32 %v4265_v63, %v3985_v23  ;;  %v760_v63 = vmax.f32 %v689_v10, 0.0 }
 0x1c7   :  { %v2970_v26 = vld [vmem:[%s5592_s3 + $0x88] sm:$0xf0]  ;;  %v2978_v58 = vld [vmem:[%s5592_s3 + $0x98] sm:$0xf0] }
 0x1c8   :  { %v743_v47 = vmax.f32 %v552_v50, 0.0  ;;  %v4399_v50 = vor.u32 %v3189_v45, %v3024_v14  ;;  %v758_v23 = vmax.f32 %v686_v6, 0.0  ;;  %v4440_v14 = vor.u32 %v3160_v9, %v2914_v38  ;;  %v3168_v9 = vld [vmem:[%s5592_s3 + $0x54] sm:$0xf]  ;;  %v2946_v38 = vld [vmem:[%s5592_s3 + $0x58] sm:$0xf0] }
 0x1c9   :  { %1281 = vmatpush.bf16.msrb.mxu1 %v829_v13  ;;  %3233 = vmatpush.bf16.msra.mxu3 %v829_v13  ;;  %v823_v13 = vpack.c.bf16 %v747_v19, %v745_v18  ;;  %v4401_v19 = vor.u32 %v3158_v36, %v2906_v46  ;;  %v762_v18 = vmax.f32 %v692_v59, 0.0  ;;  %v4442_v45 = vor.u32 %v3174_v25, %v2970_v26  ;;  %v2930_v59 = vld [vmem:[%s5592_s3 + $0x38] sm:$0xf0]  ;;  %v3002_v26 = vld [vmem:[%s5592_s3 + $0xc8] sm:$0xf0] }
 0x1ca   :  { %v821_v54 = vpack.c.bf16 %v743_v47, %v741_v7  ;;  %5694 = vst [vmem:[#allocation6_spill] sm:$0xff] %v4399_v50  ;;  %v677_v47 = vadd.f32 %v4219_v35, %v5692_v15  ;;  %v756_v7 = vmax.f32 %v683_v2, 0.0  ;;  %v830_v62 = vpack.c.bf16 %v760_v63, %v758_v23  ;;  %v3166_v23 = vld [vmem:[%s5592_s3 + $0x44] sm:$0xf]  ;;  %v2938_v63 = vld [vmem:[%s5592_s3 + $0x48] sm:$0xf0] }
 0x1cb   :  { %v832_v8 = vpack.c.bf16 %v764_v29, %v762_v18  ;;  %v668_v35 = vadd.f32 %v4139_v27, %v4098_v51  ;;  %v750_v15 = vmax.f32 %v674_v31, 0.0  ;;  %5696 = vst [vmem:[#allocation8_spill] sm:$0xff] %v4442_v45  ;;  %v662_v36 = vadd.f32 %v4081_v28, %v4368_v52  ;;  %v4492_v29 = vpop.permute.xlu2 %871  ;;  %v4499_v18 = vpop.permute.xlu0 %876 }
 0x1cc   :  { %1267 = vmatmul.bf16.gmra.mxu2 %v4357_v48  ;;  %v752_v1 = vmax.f32 %v677_v47, 0.0  ;;  %v665_v46 = vadd.f32 %v4108_v17, %v4366_v49  ;;  %v3162_v17 = vld [vmem:[%s5592_s3 + $0x24] sm:$0xf]  ;;  %v2922_v49 = vld [vmem:[%s5592_s3 + $0x28] sm:$0xf0]  ;;  %5699 = vst [vmem:[#allocation12_spill] sm:$0xff] %v4492_v29  ;;  %v4517_v31 = vor.u32 %v3166_v23, %v2938_v63 }
 0x1cd   :  { %1282 = vmatpush.bf16.msrb.mxu1 %v827_v30  ;;  %3234 = vmatpush.bf16.msra.mxu3 %v827_v30  ;;  %v772_v30 = vmax.f32 %v707_v55, 0.0  ;;  %v742_v3 = vmax.f32 %v662_v36, 0.0  ;;  %v4467_v61 = vor.u32 %v3162_v17, %v2922_v49  ;;  %v3186_v63 = vld [vmem:[%s5592_s3 + $0xe4] sm:$0xf] }
 0x1ce   :  { %v826_v27 = vpack.c.bf16 %v752_v1, %v750_v15  ;;  %v744_v42 = vmax.f32 %v665_v46, 0.0  ;;  %v4548_v15 = vor.u32 %v3168_v9, %v2946_v38 }
 0x1cf   :  { %v836_v37 = vpack.c.bf16 %v772_v30, %v770_v44  ;;  %v748_v44 = vmax.f32 %v671_v20, 0.0 }
 0x1d0   :  { %v822_v28 = vpack.c.bf16 %v744_v42, %v742_v3  ;;  %v3010_v42 = vld [vmem:[%s5592_s3 + $0xd8] sm:$0xf0] }
 0x1d1   :  { %1283 = vmatpush.bf16.msrb.mxu1 %v825_v56  ;;  %3235 = vmatpush.bf16.msra.mxu3 %v825_v56  ;;  %v766_v56 = vmax.f32 %v698_v57, 0.0  ;;  %v746_v57 = vmax.f32 %v668_v35, 0.0 }
 0x1d3   :  { %v834_v55 = vpack.c.bf16 %v768_v43, %v766_v56  ;;  %v824_v39 = vpack.c.bf16 %v748_v44, %v746_v57  ;;  %v3178_v56 = vld [vmem:[%s5592_s3 + $0xa4] sm:$0xf] }
 0x1d4   :  { %v3170_v44 = vld [vmem:[%s5592_s3 + $0x64] sm:$0xf] }
 0x1d5   :  { %1284 = vmatpush.bf16.msrb.mxu1 %v823_v13  ;;  %3236 = vmatpush.bf16.msra.mxu3 %v823_v13  ;;  %v754_v13 = vmax.f32 %v680_v11, 0.0  ;;  %v4501_v11 = vpop.permute.xlu2 %886 }
 0x1d7   :  { %v828_v30 = vpack.c.bf16 %v756_v7, %v754_v13  ;;  %v4521_v13 = vpop.permute.xlu0 %891 }
 0x1d8   :  { %5701 = vst [vmem:[#allocation14_spill] sm:$0xff] %v4521_v13 }
 0x1d9   :  { %1285 = vmatpush.bf16.msrb.mxu1 %v821_v54  ;;  %3237 = vmatpush.bf16.msra.mxu3 %v821_v54  ;;  %v1198_v49 = vpop.f32.mrf.mxu0 }
 0x1dc   :  { %1272 = vmatmul.bf16.gmra.mxu2 %v4399_v50  ;;  %1286 = vmatmul.bf16.vlgmr.msrb.gmra.mxu1 %v4401_v19 }
 0x1dd   :  { %1456 = vmatpush.bf16.msrb.mxu3 %v836_v37  ;;  %v3164_v37 = vld [vmem:[%s5592_s3 + $0x34] sm:$0xf]  ;;  %v4526_v7 = vpop.permute.xlu2 %901 }
 0x1de   :  { %1321 = vmatmul.bf16.vlgmr.msra.gmra.mxu3 %v4403_v4  ;;  %v4488_v6 = vor.u32 %v3164_v37, %v2930_v59  ;;  %5702 = vst [vmem:[#allocation15_spill] sm:$0xff] %v4526_v7 }
 0x1df   :  { %v4418_v60 = vpop.f32.mrf.mxu2  ;;  %v4536_v25 = vpop.permute.xlu0 %906 }
 0x1e1   :  { %1457 = vmatpush.bf16.msrb.mxu3 %v834_v55 }
 0x1e5   :  { %1458 = vmatpush.bf16.msrb.mxu3 %v832_v8  ;;  %v2994_v8 = vld [vmem:[%s5592_s3 + $0xb8] sm:$0xf0]  ;;  %v4544_v35 = vpop.permute.xlu2 %916 }
 0x1e7   :  { %v4448_v51 = vpop.f32.mrf.mxu2  ;;  %v4557_v36 = vpop.permute.xlu0 %921 }
 0x1e9   :  { %1459 = vmatpush.bf16.msrb.mxu3 %v830_v62 }
 0x1ec   :  { %1291 = vmatmul.bf16.gmra.mxu1 %v4440_v14  ;;  %1375 = vmatmul.bf16.vlgmr.msrb.gmra.mxu2 %v4175_v12  ;;  %v3176_v12 = vld [vmem:[%s5592_s3 + $0x94] sm:$0xf] }
 0x1ed   :  { %1460 = vmatpush.bf16.msrb.mxu3 %v828_v30  ;;  %v4469_v54 = vor.u32 %v3176_v12, %v2978_v58  ;;  %v4552_v30 = vpop.permute.xlu1 %881  ;;  %v4559_v46 = vpop.permute.xlu2 %931 }
 0x1ee   :  { %1326 = vmatmul.bf16.gmra.mxu3 %v4442_v45 }
 0x1ef   :  { %v4459_v52 = vpop.f32.mrf.mxu2  ;;  %5697 = vst [vmem:[#allocation9_spill] sm:$0xff] %v4469_v54  ;;  %v4581_v17 = vpop.permute.xlu0 %936 }
 0x1f1   :  { %1461 = vmatpush.bf16.msrb.mxu3 %v826_v27  ;;  %v2954_v27 = vld [vmem:[%s5592_s3 + $0x68] sm:$0xf0] }
 0x1f5   :  { %1462 = vmatpush.bf16.msrb.mxu3 %v824_v39  ;;  %v4569_v3 = vpop.permute.xlu1 %896  ;;  %v4577_v39 = vor.u32 %v3170_v44, %v2954_v27  ;;  %v4583_v12 = vpop.permute.xlu2 %946  ;;  %v3188_v27 = vld [vmem:[%s5592_s3 + $0xf4] sm:$0xf] }
 0x1f6   :  { %5705 = vst [vmem:[#allocation18_spill] sm:$0xff] %v4583_v12 }
 0x1f7   :  { %v4474_v43 = vpop.f32.mrf.mxu2  ;;  %v4592_v59 = vpop.permute.xlu0 %1021 }
 0x1f8   :  { %5706 = vst [vmem:[#allocation19_spill] sm:$0xff] %v4592_v59 }
 0x1f9   :  { %1463 = vmatpush.bf16.msrb.mxu3 %v822_v28 }
 0x1fc   :  { %1296 = vmatmul.bf16.gmra.mxu1 %v4467_v61  ;;  %1380 = vmatmul.bf16.gmra.mxu2 %v4215_v24  ;;  %v2986_v24 = vld [vmem:[%s5592_s3 + $0xa8] sm:$0xf0] }
 0x1fd   :  { %v4490_v10 = vor.u32 %v3178_v56, %v2986_v24  ;;  %v4590_v37 = vpop.permute.xlu1 %911  ;;  %v4594_v56 = vpop.f32.mrf.mxu0 }
 0x1fe   :  { %1331 = vmatmul.bf16.gmra.mxu3 %v4469_v54  ;;  %v4596_v24 = vpop.permute.xlu2 %1011 }
 0x1ff   :  { %5698 = vst [vmem:[#allocation11_spill] sm:$0xff] %v4490_v10  ;;  %v4494_v55 = vpop.f32.mrf.mxu2  ;;  %v4612_v9 = vpop.permute.xlu0 %1016 }
 0x200   :  { %5707 = vst [vmem:[#allocation20_spill] sm:$0xff] %v4596_v24 }
 0x201   :  { %5709 = vst [vmem:[#allocation22_spill] sm:$0xff] %v4612_v9 }
 0x205   :  { %v1203_v38 = vpop.f32.mrf.mxu0 }
 0x207   :  { %v4503_v2 = vpop.f32.mrf.mxu2 }
 0x20c   :  { %1301 = vmatmul.bf16.gmra.mxu1 %v4488_v6  ;;  %1385 = vmatmul.bf16.gmra.mxu2 %v4245_v16  ;;  %v3180_v16 = vld [vmem:[%s5592_s3 + $0xb4] sm:$0xf] }
 0x20d   :  { %v4519_v47 = vor.u32 %v3180_v16, %v2994_v8  ;;  %v4608_v8 = vpop.permute.xlu1 %926 }
 0x20e   :  { %1336 = vmatmul.bf16.gmra.mxu3 %v4490_v10 }
 0x20f   :  { %5700 = vst [vmem:[#allocation13_spill] sm:$0xff] %v4519_v47  ;;  %v4528_v62 = vpop.f32.mrf.mxu2 }
 0x215   :  { %v4618_v44 = vpop.permute.xlu1 %941 }
 0x216   :  { %5710 = vst [vmem:[#allocation23_spill] sm:$0xff] %v4618_v44 }
 0x217   :  { %v4546_v20 = vpop.f32.mrf.mxu2 }
 0x21c   :  { %1306 = vmatmul.bf16.gmra.mxu1 %v4517_v31  ;;  %1390 = vmatmul.bf16.gmra.mxu2 %v4267_v0  ;;  %v3182_v0 = vld [vmem:[%s5592_s3 + $0xc4] sm:$0xf] }
 0x21d   :  { %v4550_v1 = vor.u32 %v3182_v0, %v3002_v26  ;;  %v4614_v0 = vpop.permute.xlu2 %1006  ;;  %v4641_v10 = vpop.permute.xlu1 %1026 }
 0x21e   :  { %1341 = vmatmul.bf16.gmra.mxu3 %v4519_v47  ;;  %5715 = vst [vmem:[#allocation28_spill] sm:$0xff] %v4641_v10  ;;  %v1204_v10 = vadd.f32 %v1203_v38, %v4552_v30 }
 0x21f   :  { %5703 = vst [vmem:[#allocation16_spill] sm:$0xff] %v4550_v1  ;;  %v4561_v57 = vpop.f32.mrf.mxu2 }
 0x227   :  { %v4585_v58 = vpop.f32.mrf.mxu2 }
 0x22c   :  { %1311 = vmatmul.bf16.gmra.mxu1 %v4548_v15  ;;  %1395 = vmatmul.bf16.gmra.mxu2 %v4287_v5  ;;  %v3184_v5 = vld [vmem:[%s5592_s3 + $0xd4] sm:$0xf] }
 0x22d   :  { %v4579_v28 = vor.u32 %v3184_v5, %v3010_v42  ;;  %v3026_v5 = vld [vmem:[%s5592_s3 + $0xf8] sm:$0xf0]  ;;  %v1199_v42 = vadd.f32 %v1198_v49, %v4492_v29 }
 0x22e   :  { %1346 = vmatmul.bf16.gmra.mxu3 %v4550_v1 }
 0x22f   :  { %5704 = vst [vmem:[#allocation17_spill] sm:$0xff] %v4579_v28  ;;  %v4598_v23 = vpop.f32.mrf.mxu2 }
 0x237   :  { %v4616_v26 = vpop.f32.mrf.mxu2 }
 0x23c   :  { %1316 = vmatmul.bf16.gmra.mxu1 %v4577_v39  ;;  %1400 = vmatmul.bf16.gmra.mxu2 %v4309_v53  ;;  %v3018_v53 = vld [vmem:[%s5592_s3 + $0xe8] sm:$0xf0] }
 0x23d   :  { %v4606_v16 = vor.u32 %v3186_v63, %v3018_v53  ;;  %v4629_v63 = vpop.f32.mrf.mxu0 }
 0x23e   :  { %1351 = vmatmul.bf16.gmra.mxu3 %v4579_v28  ;;  %v4633_v28 = vpop.permute.xlu2 %981 }
 0x23f   :  { %5708 = vst [vmem:[#allocation21_spill] sm:$0xff] %v4606_v16  ;;  %v4635_v1 = vpop.f32.mrf.mxu2 }
 0x240   :  { %5713 = vst [vmem:[#allocation26_spill] sm:$0xff] %v4633_v28 }
 0x245   :  { %v1208_v29 = vpop.f32.mrf.mxu0 }
 0x24c   :  { %1405 = vmatmul.bf16.gmra.mxu2 %v4332_v40  ;;  %v4626_v40 = vpop.permute.xlu0 %991 }
 0x24d   :  { %5711 = vst [vmem:[#allocation24_spill] sm:$0xff] %v4626_v40 }
 0x24e   :  { %1356 = vmatmul.bf16.gmra.mxu3 %v4606_v16  ;;  %v4631_v16 = vor.u32 %v3188_v27, %v3026_v5  ;;  %v4647_v27 = vpop.permute.xlu2 %976  ;;  %v4649_v5 = vpop.f32.mrf.mxu2 }
 0x24f   :  { %5718 = vst [vmem:[#allocation31_spill] sm:$0xff] %v4647_v27 }
 0x250   :  { %5712 = vst [vmem:[#allocation25_spill] sm:$0xff] %v4631_v16 }
 0x254   :  { %v4645_v49 = vpop.permute.xlu0 %986 }
 0x255   :  { %5717 = vst [vmem:[#allocation30_spill] sm:$0xff] %v4645_v49 }
 0x259   :  { %v1287_v53 = vpop.f32.mrf.mxu1 }
 0x25a   :  { %v4637_v47 = vadd.f32 %v1287_v53, %v1199_v42  ;;  %v1234_v42 = vadd.f32 %v4418_v60, %v4618_v44  ;;  %v4663_v60 = vpop.f32.mrf.mxu0 }
 0x25c   :  { %5714 = vst [vmem:[#allocation27_spill] sm:$0xff] %v4637_v47  ;;  %1410 = vmatmul.bf16.gmra.mxu2 %v4177_v34  ;;  %v1236_v34 = vadd.f32 %v4448_v51, %v4583_v12  ;;  %v4660_v24 = vpop.permute.xlu0 %961  ;;  %v4666_v51 = vpop.permute.xlu2 %951 }
 0x25d   :  { %5719 = vst [vmem:[#allocation32_spill] sm:$0xff] %v4660_v24 }
 0x25e   :  { %1361 = vmatmul.bf16.gmra.mxu3 %v4631_v16  ;;  %v4655_v16 = vpop.permute.xlu1 %1001  ;;  %5720 = vst [vmem:[#allocation33_spill] sm:$0xff] %v4666_v51 }
 0x261   :  { %v1322_v54 = vpop.f32.mrf.mxu3  ;;  %v4643_v45 = vpop.f32.mrf.mxu1 }
 0x262   :  { %5716 = vst [vmem:[#allocation29_spill] sm:$0xff] %v4643_v45  ;;  %v1323_v53 = vadd.f32 %v1322_v54, %v1234_v42  ;;  %v4668_v54 = vpop.f32.mrf.mxu2 }
 0x264   :  { %v1573_v9 = vmax.f32 %v1323_v53, 0.0 }
 0x266   :  { %v4674_v38 = vpop.permute.xlu1 %996 }
 0x267   :  { %5721 = vst [vmem:[#allocation34_spill] sm:$0xff] %v4674_v38 }
 0x269   :  { %v1324_v59 = vpop.f32.mrf.mxu3  ;;  %v1292_v50 = vpop.f32.mrf.mxu1 }
 0x26a   :  { %v1325_v4 = vadd.f32 %v1324_v59, %v1236_v34  ;;  %v4658_v47 = vadd.f32 %v1292_v50, %v1204_v10  ;;  %v1239_v59 = vadd.f32 %v4459_v52, %v4666_v51  ;;  %v4681_v42 = vpop.f32.mrf.mxu2 }
 0x26c   :  { %v1575_v45 = vmax.f32 %v1325_v4, 0.0  ;;  %1415 = vmatmul.bf16.gmra.mxu2 %v4217_v33  ;;  %v4676_v33 = vpop.permute.xlu0 %956 }
 0x26d   :  { %5722 = vst [vmem:[#allocation35_spill] sm:$0xff] %v4676_v33 }
 0x26e   :  { %v1655_v44 = vpack.c.bf16 %v1575_v45, %v1573_v9  ;;  %1464 = vmatmul.bf16.vlgmr.msrb.gmra.mxu3 %v4401_v19  ;;  %v1241_v45 = vadd.f32 %v4474_v43, %v4676_v33  ;;  %v1213_v19 = vpop.f32.mrf.mxu0  ;;  %v1209_v9 = vadd.f32 %v1208_v29, %v4521_v13  ;;  %v4685_v51 = vpop.permute.xlu1 %971  ;;  %v1244_v43 = vadd.f32 %v4494_v55, %v4660_v24 }
 0x26f   :  { %5723 = vst [vmem:[#allocation36_spill] sm:$0xff] %v4685_v51 }
 0x270   :  { %2025 = vmatpush.bf16.msra.mxu0 %v1655_v44 }
 0x271   :  { %v1327_v50 = vpop.f32.mrf.mxu3  ;;  %v4672_v4 = vpop.f32.mrf.mxu1 }
 0x272   :  { %v1328_v10 = vadd.f32 %v1327_v50, %v1239_v59 }
 0x274   :  { %v1577_v59 = vmax.f32 %v1328_v10, 0.0 }
 0x276   :  { %v4693_v33 = vpop.f32.mrf.mxu0  ;;  %v4699_v10 = vpop.permute.xlu1 %966 }
 0x277   :  { %5725 = vst [vmem:[#allocation38_spill] sm:$0xff] %v4699_v10 }
 0x279   :  { %v1329_v34 = vpop.f32.mrf.mxu3  ;;  %v1297_v52 = vpop.f32.mrf.mxu1 }
 0x27a   :  { %v1330_v53 = vadd.f32 %v1329_v34, %v1241_v45  ;;  %v4683_v44 = vadd.f32 %v1297_v52, %v1209_v9  ;;  %v4697_v9 = vpop.f32.mrf.mxu2 }
 0x27c   :  { %v1579_v50 = vmax.f32 %v1330_v53, 0.0  ;;  %1420 = vmatmul.bf16.gmra.mxu2 %v4247_v22  ;;  %v1246_v22 = vadd.f32 %v4503_v2, %v4699_v10  ;;  %v1249_v2 = vadd.f32 %v4528_v62, %v4685_v51 }
 0x27e   :  { %1469 = vmatmul.bf16.gmra.mxu3 %v4440_v14  ;;  %v4689_v12 = vpack.c.bf16 %v1579_v50, %v1577_v59  ;;  %v1214_v14 = vadd.f32 %v1213_v19, %v4526_v7  ;;  %v4706_v55 = vpop.f32.mrf.mxu0 }
 0x280   :  { %5724 = vst [vmem:[#allocation37_spill] sm:$0xff] %v4689_v12 }
 0x281   :  { %v1332_v29 = vpop.f32.mrf.mxu3  ;;  %v4695_v34 = vpop.f32.mrf.mxu1 }
 0x282   :  { %v1333_v45 = vadd.f32 %v1332_v29, %v1244_v43  ;;  %v4708_v29 = vpop.f32.mrf.mxu2 }
 0x284   :  { %v1581_v24 = vmax.f32 %v1333_v45, 0.0  ;;  %v1251_v45 = vadd.f32 %v4546_v20, %v4647_v27 }
 0x289   :  { %v1334_v53 = vpop.f32.mrf.mxu3  ;;  %v1302_v59 = vpop.f32.mrf.mxu1 }
 0x28a   :  { %v1335_v52 = vadd.f32 %v1334_v53, %v1246_v22  ;;  %v4704_v50 = vadd.f32 %v1302_v59, %v1214_v14  ;;  %v1220_v14 = vpop.f32.mrf.mxu0  ;;  %v4718_v59 = vpop.f32.mrf.mxu2 }
 0x28c   :  { %v1583_v43 = vmax.f32 %v1335_v52, 0.0  ;;  %1425 = vmatmul.bf16.gmra.mxu2 %v4269_v32 }
 0x28e   :  { %1474 = vmatmul.bf16.gmra.mxu3 %v4467_v61  ;;  %v4712_v13 = vpack.c.bf16 %v1583_v43, %v1581_v24  ;;  %v1254_v24 = vadd.f32 %v4561_v57, %v4633_v28 }
 0x290   :  { %5726 = vst [vmem:[#allocation39_spill] sm:$0xff] %v4712_v13 }
 0x291   :  { %v1337_v19 = vpop.f32.mrf.mxu3  ;;  %v4716_v53 = vpop.f32.mrf.mxu1 }
 0x292   :  { %v1338_v22 = vadd.f32 %v1337_v19, %v1249_v2  ;;  %v1223_v43 = vpop.f32.mrf.mxu0  ;;  %v4728_v2 = vpop.f32.mrf.mxu2 }
 0x294   :  { %v1585_v7 = vmax.f32 %v1338_v22, 0.0 }
 0x299   :  { %v1339_v52 = vpop.f32.mrf.mxu3  ;;  %v1307_v32 = vpop.f32.mrf.mxu1 }
 0x29a   :  { %v1340_v10 = vadd.f32 %v1339_v52, %v1251_v45  ;;  %v1256_v45 = vadd.f32 %v4585_v58, %v4645_v49  ;;  %v4732_v27 = vpop.f32.mrf.mxu2 }
 0x29c   :  { %v1587_v61 = vmax.f32 %v1340_v10, 0.0  ;;  %1430 = vmatmul.bf16.gmra.mxu2 %v4289_v21  ;;  %v1225_v10 = vpop.f32.mrf.mxu0 }
 0x29e   :  { %1479 = vmatmul.bf16.gmra.mxu3 %v4488_v6  ;;  %v4724_v62 = vpack.c.bf16 %v1587_v61, %v1585_v7  ;;  %v5727_v61 = vld [vmem:[#allocation10_spill] sm:$0xff] }
 0x2a1   :  { %v1342_v19 = vpop.f32.mrf.mxu3  ;;  %v1309_v20 = vpop.f32.mrf.mxu1 }
 0x2a2   :  { %v1343_v51 = vadd.f32 %v1342_v19, %v1254_v24  ;;  %v1259_v24 = vadd.f32 %v4598_v23, %v4626_v40  ;;  %v4740_v12 = vpop.f32.mrf.mxu2 }
 0x2a4   :  { %v1589_v6 = vmax.f32 %v1343_v51, 0.0  ;;  %v1228_v49 = vpop.f32.mrf.mxu0 }
 0x2a9   :  { %v1344_v22 = vpop.f32.mrf.mxu3  ;;  %v1312_v21 = vpop.f32.mrf.mxu1 }
 0x2aa   :  { %v1345_v52 = vadd.f32 %v1344_v22, %v1256_v45  ;;  %v1261_v45 = vadd.f32 %v4616_v26, %v4674_v38  ;;  %v1221_v38 = vadd.f32 %v1220_v14, %v4544_v35 }
 0x2ac   :  { %v1591_v7 = vmax.f32 %v1345_v52, 0.0  ;;  %1435 = vmatmul.bf16.gmra.mxu2 %v5727_v61  ;;  %v1310_v40 = vadd.f32 %v1309_v20, %v1221_v38 }
 0x2ae   :  { %1484 = vmatmul.bf16.gmra.mxu3 %v4517_v31  ;;  %v4736_v57 = vpack.c.bf16 %v1591_v7, %v1589_v6  ;;  %v1230_v31 = vpop.f32.mrf.mxu0  ;;  %v1229_v6 = vadd.f32 %v1228_v49, %v4559_v46  ;;  %v4749_v7 = vpop.f32.mrf.mxu2  ;;  %v1264_v49 = vadd.f32 %v4635_v1, %v4655_v16 }
 0x2af   :  { %v1231_v26 = vadd.f32 %v1230_v31, %v4581_v17 }
 0x2b1   :  { %v1347_v19 = vpop.f32.mrf.mxu3  ;;  %v1314_v58 = vpop.f32.mrf.mxu1 }
 0x2b2   :  { %v1348_v28 = vadd.f32 %v1347_v19, %v1259_v24  ;;  %v1226_v24 = vadd.f32 %v1225_v10, %v4608_v8  ;;  %v1219_v10 = vadd.f32 %v4706_v55, %v4590_v37  ;;  %v1563_v55 = vmax.f32 %v1310_v40, 0.0 }
 0x2b3   :  { %v1206_v40 = vadd.f32 %v4629_v63, %v4501_v11  ;;  %v5729_v63 = vld [vmem:[#allocation29_spill] sm:$0xff] }
 0x2b4   :  { %v1593_v61 = vmax.f32 %v1348_v28, 0.0  ;;  %v1224_v28 = vadd.f32 %v1223_v43, %v4557_v36 }
 0x2b6   :  { %v4763_v14 = vpop.f32.mrf.mxu2 }
 0x2b9   :  { %v1349_v51 = vpop.f32.mrf.mxu3  ;;  %v1317_v52 = vpop.f32.mrf.mxu1 }
 0x2ba   :  { %v1350_v22 = vadd.f32 %v1349_v51, %v1261_v45  ;;  %v1318_v19 = vadd.f32 %v1317_v52, %v1229_v6  ;;  %v1266_v6 = vadd.f32 %v4649_v5, %v4614_v0  ;;  %v1211_v5 = vadd.f32 %v4663_v60, %v4569_v3 }
 0x2bb   :  { %v1295_v60 = vadd.f32 %v4672_v4, %v1206_v40 }
 0x2bc   :  { %v1595_v13 = vmax.f32 %v1350_v22, 0.0  ;;  %1440 = vmatmul.bf16.gmra.mxu2 %v4334_v41  ;;  %v1315_v22 = vadd.f32 %v1314_v58, %v1226_v24  ;;  %v1216_v58 = vadd.f32 %v4693_v33, %v4536_v25 }
 0x2be   :  { %1489 = vmatmul.bf16.gmra.mxu3 %v4548_v15  ;;  %v4746_v23 = vpack.c.bf16 %v1595_v13, %v1593_v61  ;;  %v1313_v15 = vadd.f32 %v1312_v21, %v1224_v28  ;;  %v1569_v13 = vmax.f32 %v1318_v19, 0.0  ;;  %v1567_v31 = vmax.f32 %v1315_v22, 0.0 }
 0x2bf   :  { %v1308_v21 = vadd.f32 %v1307_v32, %v1219_v10  ;;  %v1305_v19 = vadd.f32 %v4716_v53, %v1216_v58  ;;  %v1300_v32 = vadd.f32 %v4695_v34, %v1211_v5  ;;  %v1557_v53 = vmax.f32 %v4704_v50, 0.0 }
 0x2c0   :  { %v1565_v24 = vmax.f32 %v1313_v15, 0.0  ;;  %v1553_v34 = vmax.f32 %v4683_v44, 0.0  ;;  %v1551_v50 = vmax.f32 %v1295_v60, 0.0 }
 0x2c1   :  { %v1352_v45 = vpop.f32.mrf.mxu3  ;;  %v1319_v51 = vpop.f32.mrf.mxu1  ;;  %v1559_v28 = vmax.f32 %v1305_v19, 0.0  ;;  %v1555_v15 = vmax.f32 %v1300_v32, 0.0  ;;  %v5734_v32 = vld [vmem:[#allocation19_spill] sm:$0xff] }
 0x2c2   :  { %v1320_v41 = vadd.f32 %v1319_v51, %v1231_v26  ;;  %v1353_v43 = vadd.f32 %v1352_v45, %v1264_v49  ;;  %v1651_v38 = vpack.c.bf16 %v1567_v31, %v1565_v24  ;;  %v1561_v45 = vmax.f32 %v1308_v21, 0.0 }
 0x2c3   :  { %v1645_v31 = vpack.c.bf16 %v1555_v15, %v1553_v34  ;;  %v3193_v34 = vld [vmem:[%s5594_s5 + $0x14] sm:$0xf0] }
 0x2c4   :  { %v1571_v61 = vmax.f32 %v1320_v41, 0.0  ;;  %v1597_v20 = vmax.f32 %v1353_v43, 0.0  ;;  %v1649_v22 = vpack.c.bf16 %v1563_v55, %v1561_v45  ;;  %v1549_v43 = vmax.f32 %v4658_v47, 0.0  ;;  %v5732_v55 = vld [vmem:[#allocation6_spill] sm:$0xff] }
 0x2c5   :  { %v3191_v47 = vld [vmem:[%s5594_s5 + $0x4] sm:$0xf0] }
 0x2c6   :  { %v1653_v52 = vpack.c.bf16 %v1571_v61, %v1569_v13  ;;  %v4775_v13 = vpop.f32.mrf.mxu2  ;;  %v5728_v61 = vld [vmem:[#allocation20_spill] sm:$0xff]  ;;  %v1643_v24 = vpack.c.bf16 %v1551_v50, %v1549_v43 }
 0x2c7   :  { %v1269_v49 = vadd.f32 %v4668_v54, %v5728_v61 }
 0x2c8   :  { %2026 = vmatpush.bf16.msra.mxu0 %v1653_v52  ;;  %v5730_v52 = vld [vmem:[#allocation22_spill] sm:$0xff] }
 0x2c9   :  { %v1354_v26 = vpop.f32.mrf.mxu3  ;;  %v1271_v4 = vadd.f32 %v4681_v42, %v5730_v52  ;;  %v3032_v42 = vld [vmem:[%s5594_s5] sm:$0xf] }
 0x2ca   :  { %v1355_v1 = vadd.f32 %v1354_v26, %v1266_v6  ;;  %v4797_v5 = vor.u32 %v3191_v47, %v3032_v42 }
 0x2cc   :  { %v1599_v51 = vmax.f32 %v1355_v1, 0.0  ;;  %1445 = vmatmul.bf16.gmra.mxu2 %v4357_v48  ;;  %2027 = vmatpush.bf16.msra.mxu0 %v1651_v38  ;;  %v1647_v48 = vpack.c.bf16 %v1559_v28, %v1557_v53  ;;  %v5731_v1 = vld [vmem:[#allocation27_spill] sm:$0xff]  ;;  %v1274_v28 = vadd.f32 %v4697_v9, %v5734_v32  ;;  %v5737_v9 = vld [vmem:[#allocation12_spill] sm:$0xff] }
 0x2cd   :  { %v1545_v19 = vmax.f32 %v5731_v1, 0.0  ;;  %v5733_v38 = vld [vmem:[#allocation7_spill] sm:$0xff]  ;;  %v1384_v1 = vadd.f32 %v4740_v12, %v4501_v11  ;;  %v3197_v12 = vld [vmem:[%s5594_s5 + $0x34] sm:$0xf0] }
 0x2ce   :  { %1494 = vmatmul.bf16.gmra.mxu3 %v4577_v39  ;;  %v1667_v33 = vpack.c.bf16 %v1599_v51, %v1597_v20  ;;  %v1201_v39 = vadd.f32 %v4594_v56, %v4499_v18  ;;  %v4787_v54 = vpop.f32.mrf.mxu2  ;;  %v3056_v11 = vld [vmem:[%s5594_s5 + $0x30] sm:$0xf] }
 0x2d0   :  { %2028 = vmatpush.bf16.msra.mxu0 %v1649_v22  ;;  %v1290_v10 = vadd.f32 %v5729_v63, %v1201_v39  ;;  %v5735_v22 = vld [vmem:[#allocation28_spill] sm:$0xff] }
 0x2d1   :  { %v1357_v41 = vpop.f32.mrf.mxu3  ;;  %v1276_v40 = vadd.f32 %v4708_v29, %v5735_v22  ;;  %v3040_v39 = vld [vmem:[%s5594_s5 + $0x10] sm:$0xf] }
 0x2d2   :  { %v1358_v6 = vadd.f32 %v1357_v41, %v1269_v49  ;;  %v1547_v56 = vmax.f32 %v1290_v10, 0.0  ;;  %v5736_v63 = vld [vmem:[#allocation8_spill] sm:$0xff]  ;;  %v1377_v10 = vadd.f32 %v4718_v59, %v5737_v9  ;;  %v4813_v29 = vor.u32 %v3193_v34, %v3040_v39  ;;  %v3048_v59 = vld [vmem:[%s5594_s5 + $0x20] sm:$0xf]  ;;  %v3042_v34 = vld [vmem:[%s5594_s5 + $0x18] sm:$0xf0] }
 0x2d3   :  { %v3192_v39 = vld [vmem:[%s5594_s5 + $0x14] sm:$0xf] }
 0x2d4   :  { %2029 = vmatpush.bf16.msra.mxu0 %v1647_v48  ;;  %v1601_v44 = vmax.f32 %v1358_v6, 0.0  ;;  %v1641_v51 = vpack.c.bf16 %v1547_v56, %v1545_v19  ;;  %v3195_v56 = vld [vmem:[%s5594_s5 + $0x24] sm:$0xf0] }
 0x2d5   :  { %v5739_v19 = vld [vmem:[#allocation39_spill] sm:$0xff] }
 0x2d8   :  { %2030 = vmatpush.bf16.msra.mxu0 %v1645_v31 }
 0x2d9   :  { %v1359_v58 = vpop.f32.mrf.mxu3 }
 0x2da   :  { %v1360_v21 = vadd.f32 %v1359_v58, %v1271_v4  ;;  %v1379_v4 = vadd.f32 %v4728_v2, %v4499_v18  ;;  %v4828_v18 = vpop.f32.mrf.mxu2  ;;  %v1382_v2 = vadd.f32 %v4732_v27, %v4552_v30  ;;  %v3034_v30 = vld [vmem:[%s5594_s5 + $0x8] sm:$0xf0] }
 0x2dc   :  { %v1603_v26 = vmax.f32 %v1360_v21, 0.0  ;;  %1450 = vmatmul.bf16.gmra.mxu2 %v5732_v55  ;;  %2031 = vmatpush.bf16.msra.mxu0 %v1643_v24  ;;  %v5738_v24 = vld [vmem:[#allocation9_spill] sm:$0xff]  ;;  %v3190_v55 = vld [vmem:[%s5594_s5 + $0x4] sm:$0xf] }
 0x2de   :  { %1499 = vmatmul.bf16.gmra.mxu3 %v5733_v38  ;;  %v1669_v20 = vpack.c.bf16 %v1603_v26, %v1601_v44 }
 0x2e0   :  { %2032 = vmatpush.bf16.msra.mxu0 %v1641_v51  ;;  %v5742_v51 = vld [vmem:[#allocation11_spill] sm:$0xff] }
 0x2e1   :  { %v1362_v45 = vpop.f32.mrf.mxu3 }
 0x2e2   :  { %v1363_v53 = vadd.f32 %v1362_v45, %v1274_v28  ;;  %v4846_v27 = vpop.f32.mrf.mxu2  ;;  %v5743_v28 = vld [vmem:[#allocation14_spill] sm:$0xff] }
 0x2e3   :  { %2033 = vmatmul.bf16.vlgmr.msra.gmra.mxu0 %v4797_v5 }
 0x2e4   :  { %v1605_v15 = vmax.f32 %v1363_v53, 0.0  ;;  %v4863_v53 = vor.u32 %v3197_v12, %v3056_v11  ;;  %v4923_v12 = vpop.permute.xlu2 %1712 }
 0x2e5   :  { %5750 = vst [vmem:[#allocation27_spill] sm:$0xff] %v4923_v12 }
 0x2e9   :  { %v1364_v41 = vpop.f32.mrf.mxu3 }
 0x2ea   :  { %v1365_v60 = vadd.f32 %v1364_v41, %v1276_v40  ;;  %v1387_v40 = vadd.f32 %v4749_v7, %v5743_v28  ;;  %v4927_v28 = vpop.permute.xlu0 %1717 }
 0x2eb   :  { %5751 = vst [vmem:[#allocation6_spill] sm:$0xff] %v4927_v28 }
 0x2ec   :  { %v1607_v48 = vmax.f32 %v1365_v60, 0.0 }
 0x2ee   :  { %v1671_v49 = vpack.c.bf16 %v1607_v48, %v1605_v15  ;;  %1504 = vmatmul.bf16.gmra.mxu3 %v5736_v63  ;;  %v4865_v15 = vpop.f32.mrf.mxu2  ;;  %v1389_v48 = vadd.f32 %v4763_v14, %v4569_v3  ;;  %v4876_v63 = vor.u32 %v3192_v39, %v3042_v34  ;;  %v3064_v3 = vld [vmem:[%s5594_s5 + $0x40] sm:$0xf]  ;;  %v3199_v14 = vld [vmem:[%s5594_s5 + $0x44] sm:$0xf0]  ;;  %v4942_v39 = vpop.permute.xlu2 %1727 }
 0x2ef   :  { %5754 = vst [vmem:[#allocation28_spill] sm:$0xff] %v4942_v39  ;;  %v3080_v34 = vld [vmem:[%s5594_s5 + $0x60] sm:$0xf] }
 0x2f0   :  { %2114 = vmatpush.bf16.msra.mxu1 %v1671_v49  ;;  %5744 = vst [vmem:[#allocation20_spill] sm:$0xff] %v4876_v63 }
 0x2f1   :  { %v1465_v50 = vpop.f32.mrf.mxu3 }
 0x2f2   :  { %v1466_v31 = vadd.f32 %v1465_v50, %v1377_v10 }
 0x2f3   :  { %2038 = vmatmul.bf16.gmra.mxu0 %v4813_v29 }
 0x2f4   :  { %2115 = vmatpush.bf16.msra.mxu1 %v1669_v20  ;;  %v1546_v58 = vmax.f32 %v1466_v31, 0.0  ;;  %v5741_v20 = vld [vmem:[#allocation37_spill] sm:$0xff] }
 0x2f5   :  { %v5745_v31 = vld [vmem:[#allocation13_spill] sm:$0xff] }
 0x2f6   :  { %v4878_v50 = vpop.f32.mrf.mxu2 }
 0x2f8   :  { %2116 = vmatpush.bf16.msra.mxu1 %v1667_v33 }
 0x2f9   :  { %v1467_v6 = vpop.f32.mrf.mxu3 }
 0x2fa   :  { %v1468_v43 = vadd.f32 %v1467_v6, %v1379_v4  ;;  %v5746_v6 = vld [vmem:[#allocation15_spill] sm:$0xff] }
 0x2fc   :  { %v1548_v21 = vmax.f32 %v1468_v43, 0.0  ;;  %2117 = vmatpush.bf16.msra.mxu1 %v4746_v23  ;;  %v4833_v23 = vor.u32 %v3195_v56, %v3048_v59  ;;  %v1392_v43 = vadd.f32 %v4775_v13, %v5746_v6  ;;  %v4961_v6 = vpop.permute.xlu2 %1742 }
 0x2fd   :  { %5758 = vst [vmem:[#allocation9_spill] sm:$0xff] %v4961_v6 }
 0x2fe   :  { %1509 = vmatmul.bf16.gmra.mxu3 %v5738_v24  ;;  %v4826_v44 = vpack.c.bf16 %v1548_v21, %v1546_v58  ;;  %v4892_v58 = vor.u32 %v3199_v14, %v3064_v3  ;;  %v4895_v56 = vpop.f32.mrf.mxu2  ;;  %v1394_v24 = vadd.f32 %v4787_v54, %v4536_v25  ;;  %v3072_v25 = vld [vmem:[%s5594_s5 + $0x50] sm:$0xf]  ;;  %v3201_v54 = vld [vmem:[%s5594_s5 + $0x54] sm:$0xf0] }
 0x300   :  { %2118 = vmatpush.bf16.msra.mxu1 %v4736_v57 }
 0x301   :  { %v1470_v33 = vpop.f32.mrf.mxu3 }
 0x302   :  { %v1471_v26 = vadd.f32 %v1470_v33, %v1382_v2  ;;  %v3194_v2 = vld [vmem:[%s5594_s5 + $0x24] sm:$0xf]  ;;  %v3050_v33 = vld [vmem:[%s5594_s5 + $0x28] sm:$0xf0] }
 0x303   :  { %2043 = vmatmul.bf16.gmra.mxu0 %v4833_v23 }
 0x304   :  { %2119 = vmatpush.bf16.msra.mxu1 %v4724_v62  ;;  %v4848_v62 = vor.u32 %v3190_v55, %v3034_v30  ;;  %v1550_v47 = vmax.f32 %v1471_v26, 0.0  ;;  %v4905_v26 = vpop.permute.xlu1 %1707 }
 0x305   :  { %5747 = vst [vmem:[#allocation29_spill] sm:$0xff] %v4905_v26 }
 0x306   :  { %5740 = vst [vmem:[#allocation10_spill] sm:$0xff] %v4848_v62 }
 0x308   :  { %2120 = vmatpush.bf16.msra.mxu1 %v5739_v19  ;;  %v4907_v19 = vor.u32 %v3194_v2, %v3050_v33 }
 0x309   :  { %v1472_v57 = vpop.f32.mrf.mxu3 }
 0x30a   :  { %v1473_v42 = vadd.f32 %v1472_v57, %v1384_v1  ;;  %5748 = vst [vmem:[#allocation22_spill] sm:$0xff] %v4907_v19  ;;  %v5749_v57 = vld [vmem:[#allocation16_spill] sm:$0xff] }
 0x30c   :  { %v1552_v38 = vmax.f32 %v1473_v42, 0.0  ;;  %2121 = vmatpush.bf16.msra.mxu1 %v5741_v20  ;;  %v1408_v20 = vpop.f32.mrf.mxu2 }
 0x30e   :  { %1514 = vmatmul.bf16.gmra.mxu3 %v5742_v51  ;;  %v4858_v45 = vpack.c.bf16 %v1552_v38, %v1550_v47  ;;  %v1397_v47 = vadd.f32 %v4828_v18, %v4590_v37  ;;  %v4921_v38 = vor.u32 %v3201_v54, %v3072_v25  ;;  %v3058_v37 = vld [vmem:[%s5594_s5 + $0x38] sm:$0xf0]  ;;  %v4983_v25 = vpop.permute.xlu2 %1757 }
 0x30f   :  { %2122 = vmatmul.bf16.vlgmr.msra.gmra.mxu1 %v4848_v62 }
 0x311   :  { %v1475_v41 = vpop.f32.mrf.mxu3 }
 0x312   :  { %v1476_v60 = vadd.f32 %v1475_v41, %v1387_v40  ;;  %v4929_v40 = vpop.permute.xlu1 %1722  ;;  %v3196_v41 = vld [vmem:[%s5594_s5 + $0x34] sm:$0xf] }
 0x313   :  { %2048 = vmatmul.bf16.gmra.mxu0 %v4863_v53  ;;  %5752 = vst [vmem:[#allocation7_spill] sm:$0xff] %v4929_v40 }
 0x314   :  { %v1554_v9 = vmax.f32 %v1476_v60, 0.0  ;;  %v1411_v60 = vpop.f32.mrf.mxu2 }
 0x319   :  { %v1477_v7 = vpop.f32.mrf.mxu3 }
 0x31a   :  { %v1478_v49 = vadd.f32 %v1477_v7, %v1389_v48  ;;  %v4940_v48 = vor.u32 %v3196_v41, %v3058_v37  ;;  %v3203_v7 = vld [vmem:[%s5594_s5 + $0x64] sm:$0xf0]  ;;  %v3200_v41 = vld [vmem:[%s5594_s5 + $0x54] sm:$0xf]  ;;  %v3074_v37 = vld [vmem:[%s5594_s5 + $0x58] sm:$0xf0] }
 0x31b   :  { %v4956_v3 = vor.u32 %v3203_v7, %v3080_v34 }
 0x31c   :  { %v1556_v10 = vmax.f32 %v1478_v49, 0.0  ;;  %5753 = vst [vmem:[#allocation19_spill] sm:$0xff] %v4940_v48  ;;  %v4950_v49 = vpop.permute.xlu0 %1732 }
 0x31d   :  { %5755 = vst [vmem:[#allocation8_spill] sm:$0xff] %v4950_v49 }
 0x31e   :  { %1519 = vmatmul.bf16.gmra.mxu3 %v5745_v31  ;;  %v4887_v4 = vpack.c.bf16 %v1556_v10, %v1554_v9  ;;  %v4952_v9 = vpop.permute.xlu1 %1737  ;;  %v5757_v10 = vld [vmem:[#allocation17_spill] sm:$0xff]  ;;  %v1413_v31 = vpop.f32.mrf.mxu2 }
 0x31f   :  { %2127 = vmatmul.bf16.gmra.mxu1 %v4876_v63  ;;  %5756 = vst [vmem:[#allocation12_spill] sm:$0xff] %v4952_v9 }
 0x321   :  { %v1480_v21 = vpop.f32.mrf.mxu3 }
 0x322   :  { %v1481_v59 = vadd.f32 %v1480_v21, %v1392_v43 }
 0x323   :  { %2053 = vmatmul.bf16.gmra.mxu0 %v4892_v58 }
 0x324   :  { %v1558_v55 = vmax.f32 %v1481_v59, 0.0  ;;  %v4963_v43 = vpop.permute.xlu0 %1747  ;;  %v3198_v59 = vld [vmem:[%s5594_s5 + $0x44] sm:$0xf] }
 0x325   :  { %5759 = vst [vmem:[#allocation39_spill] sm:$0xff] %v4963_v43 }
 0x326   :  { %v4965_v21 = vpop.permute.xlu1 %1752 }
 0x327   :  { %5760 = vst [vmem:[#allocation37_spill] sm:$0xff] %v4965_v21 }
 0x329   :  { %v1482_v13 = vpop.f32.mrf.mxu3 }
 0x32a   :  { %v1483_v1 = vadd.f32 %v1482_v13, %v1394_v24  ;;  %v3066_v24 = vld [vmem:[%s5594_s5 + $0x48] sm:$0xf0]  ;;  %v3088_v13 = vld [vmem:[%s5594_s5 + $0x70] sm:$0xf] }
 0x32b   :  { %v4973_v33 = vor.u32 %v3198_v59, %v3066_v24  ;;  %v5002_v59 = vor.u32 %v3200_v41, %v3074_v37 }
 0x32c   :  { %v1560_v30 = vmax.f32 %v1483_v1, 0.0  ;;  %v3205_v1 = vld [vmem:[%s5594_s5 + $0x74] sm:$0xf0] }
 0x32d   :  { %5761 = vst [vmem:[#allocation11_spill] sm:$0xff] %v4973_v33  ;;  %v4985_v54 = vor.u32 %v3205_v1, %v3088_v13  ;;  %v3096_v1 = vld [vmem:[%s5594_s5 + $0x80] sm:$0xf] }
 0x32e   :  { %1524 = vmatmul.bf16.gmra.mxu3 %v5749_v57  ;;  %v4916_v42 = vpack.c.bf16 %v1560_v30, %v1558_v55  ;;  %v5762_v55 = vld [vmem:[#allocation21_spill] sm:$0xff]  ;;  %v1416_v30 = vpop.f32.mrf.mxu2  ;;  %5767 = vst [vmem:[#allocation17_spill] sm:$0xff] %v5002_v59 }
 0x32f   :  { %2132 = vmatmul.bf16.gmra.mxu1 %v4907_v19  ;;  %5763 = vst [vmem:[#allocation14_spill] sm:$0xff] %v4985_v54 }
 0x331   :  { %v1485_v11 = vpop.f32.mrf.mxu3 }
 0x332   :  { %v4925_v51 = vadd.f32 %v1485_v11, %v1397_v47  ;;  %v4987_v47 = vpop.permute.xlu0 %1762  ;;  %v4989_v11 = vpop.permute.xlu1 %1767 }
 0x333   :  { %2058 = vmatmul.bf16.gmra.mxu0 %v4921_v38  ;;  %5764 = vst [vmem:[#allocation13_spill] sm:$0xff] %v4987_v47 }
 0x336   :  { %v4998_v34 = vpop.f32.mrf.mxu2 }
 0x337   :  { %5765 = vst [vmem:[#allocation15_spill] sm:$0xff] %v4998_v34  ;;  %v5775_v34 = vld [vmem:[#allocation23_spill] sm:$0xff] }
 0x339   :  { %v4938_v18 = vpop.f32.mrf.mxu3 }
 0x33a   :  { %v5004_v24 = vpop.permute.xlu0 %1777  ;;  %v5006_v13 = vpop.permute.xlu1 %1782 }
 0x33b   :  { %5768 = vst [vmem:[#allocation21_spill] sm:$0xff] %v5004_v24  ;;  %v3202_v24 = vld [vmem:[%s5594_s5 + $0x64] sm:$0xf] }
 0x33c   :  { %5769 = vst [vmem:[#allocation40_spill] sm:$0xff] %v5006_v13 }
 0x33e   :  { %1529 = vmatmul.bf16.gmra.mxu3 %v5757_v10  ;;  %v5000_v10 = vpop.permute.xlu2 %1772  ;;  %v5020_v19 = vpop.f32.mrf.mxu2 }
 0x33f   :  { %2137 = vmatmul.bf16.gmra.mxu1 %v4940_v48  ;;  %5766 = vst [vmem:[#allocation16_spill] sm:$0xff] %v5000_v10 }
 0x341   :  { %v4958_v14 = vpop.f32.mrf.mxu3 }
 0x342   :  { %v5025_v62 = vpop.permute.xlu0 %1792  ;;  %v5027_v13 = vpop.permute.xlu1 %1797 }
 0x343   :  { %2063 = vmatmul.bf16.gmra.mxu0 %v4956_v3  ;;  %5773 = vst [vmem:[#allocation42_spill] sm:$0xff] %v5025_v62  ;;  %v1407_v62 = vadd.f32 %v4895_v56, %v4559_v46  ;;  %v3209_v46 = vld [vmem:[%s5594_s5 + $0x94] sm:$0xf0] }
 0x344   :  { %5774 = vst [vmem:[#allocation43_spill] sm:$0xff] %v5027_v13 }
 0x346   :  { %v5022_v63 = vpop.permute.xlu2 %1787 }
 0x347   :  { %5772 = vst [vmem:[#allocation41_spill] sm:$0xff] %v5022_v63  ;;  %v3082_v63 = vld [vmem:[%s5594_s5 + $0x68] sm:$0xf0] }
 0x349   :  { %v1492_v2 = vpop.f32.mrf.mxu3 }
 0x34e   :  { %1534 = vmatmul.bf16.gmra.mxu3 %v5762_v55  ;;  %v3207_v55 = vld [vmem:[%s5594_s5 + $0x84] sm:$0xf0]  ;;  %v5054_v56 = vpop.permute.xlu2 %1802 }
 0x34f   :  { %2142 = vmatmul.bf16.gmra.mxu1 %v4973_v33  ;;  %v5770_v33 = vld [vmem:[#allocation25_spill] sm:$0xff]  ;;  %v5016_v48 = vor.u32 %v3207_v55, %v3096_v1 }
 0x351   :  { %v1495_v57 = vpop.f32.mrf.mxu3  ;;  %5771 = vst [vmem:[#allocation25_spill] sm:$0xff] %v5016_v48 }
 0x353   :  { %2068 = vmatmul.bf16.gmra.mxu0 %v4985_v54  ;;  %v1412_v54 = vadd.f32 %v1411_v60, %v5775_v34 }
 0x359   :  { %v1497_v7 = vpop.f32.mrf.mxu3 }
 0x35e   :  { %1539 = vmatmul.bf16.gmra.mxu3 %v5770_v33  ;;  %v1409_v33 = vadd.f32 %v1408_v20, %v4581_v17  ;;  %v5042_v17 = vor.u32 %v3202_v24, %v3082_v63  ;;  %v1404_v20 = vadd.f32 %v4878_v50, %v4608_v8  ;;  %v1402_v63 = vadd.f32 %v4865_v15, %v4557_v36 }
 0x35f   :  { %2147 = vmatmul.bf16.gmra.mxu1 %v5002_v59  ;;  %v5776_v59 = vld [vmem:[#allocation18_spill] sm:$0xff]  ;;  %v1399_v50 = vadd.f32 %v4846_v27, %v4544_v35 }
 0x360   :  { %v5018_v37 = vpop.f32.mrf.mxu0  ;;  %v1414_v1 = vadd.f32 %v1413_v31, %v5776_v59  ;;  %v1498_v13 = vadd.f32 %v1497_v7, %v1409_v33  ;;  %v1496_v31 = vadd.f32 %v1495_v57, %v1407_v62  ;;  %v5046_v59 = vpop.f32.mrf.mxu2  ;;  %v1491_v33 = vadd.f32 %v4958_v14, %v1402_v63 }
 0x361   :  { %v1500_v41 = vpop.f32.mrf.mxu3  ;;  %v5061_v57 = vpop.permute.xlu0 %1807  ;;  %v1488_v15 = vadd.f32 %v4938_v18, %v1399_v50  ;;  %v3204_v18 = vld [vmem:[%s5594_s5 + $0x74] sm:$0xf]  ;;  %v3211_v50 = vld [vmem:[%s5594_s5 + $0xa4] sm:$0xf0] }
 0x362   :  { %v1501_v55 = vadd.f32 %v1500_v41, %v1412_v54  ;;  %v3104_v41 = vld [vmem:[%s5594_s5 + $0x90] sm:$0xf]  ;;  %v1572_v8 = vmax.f32 %v1498_v13, 0.0  ;;  %v5063_v7 = vpop.permute.xlu1 %1812  ;;  %v1566_v27 = vmax.f32 %v1491_v33, 0.0 }
 0x363   :  { %2073 = vmatmul.bf16.gmra.mxu0 %v5016_v48  ;;  %5777 = vst [vmem:[#allocation23_spill] sm:$0xff] %v5063_v7 }
 0x364   :  { %v1574_v54 = vmax.f32 %v1501_v55, 0.0  ;;  %v5067_v55 = vor.u32 %v3209_v46, %v3104_v41  ;;  %v3090_v41 = vld [vmem:[%s5594_s5 + $0x78] sm:$0xf0] }
 0x368   :  { %v5040_v60 = vpop.f32.mrf.mxu0  ;;  %v1426_v14 = vpop.f32.mrf.mxu2 }
 0x369   :  { %v1502_v48 = vpop.f32.mrf.mxu3  ;;  %v5086_v63 = vpop.permute.xlu0 %1822 }
 0x36a   :  { %v1503_v10 = vadd.f32 %v1502_v48, %v1414_v1  ;;  %v1493_v48 = vadd.f32 %v1492_v2, %v1404_v20  ;;  %v1570_v1 = vmax.f32 %v1496_v31, 0.0  ;;  %v5075_v31 = vpop.permute.xlu2 %1817 }
 0x36b   :  { %5779 = vst [vmem:[#allocation18_spill] sm:$0xff] %v5075_v31 }
 0x36c   :  { %v1576_v34 = vmax.f32 %v1503_v10, 0.0  ;;  %v5778_v10 = vld [vmem:[#allocation33_spill] sm:$0xff]  ;;  %v1568_v2 = vmax.f32 %v1493_v48, 0.0  ;;  %v1654_v35 = vpack.c.bf16 %v1572_v8, %v1570_v1  ;;  %v5088_v48 = vpop.permute.xlu1 %1827 }
 0x36d   :  { %v1417_v24 = vadd.f32 %v1416_v30, %v5778_v10  ;;  %v1564_v30 = vmax.f32 %v1488_v15, 0.0  ;;  %5780 = vst [vmem:[#allocation33_spill] sm:$0xff] %v5086_v63  ;;  %v3128_v63 = vld [vmem:[%s5594_s5 + $0xc0] sm:$0xf] }
 0x36e   :  { %v1656_v62 = vpack.c.bf16 %v1576_v34, %v1574_v54  ;;  %v1652_v54 = vpack.c.bf16 %v1568_v2, %v1566_v27  ;;  %v1562_v34 = vmax.f32 %v4925_v51, 0.0  ;;  %5781 = vst [vmem:[#allocation44_spill] sm:$0xff] %v5088_v48  ;;  %v3112_v51 = vld [vmem:[%s5594_s5 + $0xa0] sm:$0xf] }
 0x36f   :  { %2152 = vmatmul.bf16.gmra.mxu1 %v5042_v17  ;;  %v5104_v1 = vor.u32 %v3211_v50, %v3112_v51  ;;  %v3120_v50 = vld [vmem:[%s5594_s5 + $0xb0] sm:$0xf] }
 0x370   :  { %2203 = vmatpush.bf16.msra.mxu2 %v1656_v62  ;;  %v5072_v20 = vpop.f32.mrf.mxu0  ;;  %v1650_v8 = vpack.c.bf16 %v1564_v30, %v1562_v34  ;;  %v5090_v62 = vor.u32 %v3204_v18, %v3090_v41 }
 0x371   :  { %v1505_v36 = vpop.f32.mrf.mxu3  ;;  %v5112_v27 = vpop.permute.xlu0 %1837 }
 0x372   :  { %v5070_v13 = vadd.f32 %v1505_v36, %v1417_v24  ;;  %v5782_v24 = vld [vmem:[#allocation32_spill] sm:$0xff]  ;;  %v5106_v36 = vpop.f32.mrf.mxu2  ;;  %v5108_v2 = vpop.permute.xlu2 %1832  ;;  %5784 = vst [vmem:[#allocation45_spill] sm:$0xff] %v5112_v27 }
 0x373   :  { %2078 = vmatmul.bf16.gmra.mxu0 %v5067_v55  ;;  %v1422_v33 = vadd.f32 %v5020_v19, %v5782_v24  ;;  %5783 = vst [vmem:[#allocation32_spill] sm:$0xff] %v5108_v2  ;;  %v3213_v24 = vld [vmem:[%s5594_s5 + $0xb4] sm:$0xf0] }
 0x374   :  { %2204 = vmatpush.bf16.msra.mxu2 %v1654_v35  ;;  %v5114_v30 = vpop.permute.xlu1 %1842 }
 0x375   :  { %5785 = vst [vmem:[#allocation46_spill] sm:$0xff] %v5114_v30 }
 0x378   :  { %2205 = vmatpush.bf16.msra.mxu2 %v1652_v54  ;;  %v5098_v10 = vpop.f32.mrf.mxu0  ;;  %v3098_v54 = vld [vmem:[%s5594_s5 + $0x88] sm:$0xf0] }
 0x379   :  { %v5084_v46 = vpop.f32.mrf.mxu3  ;;  %v2042_v7 = vadd.f32 %v5098_v10, %v4929_v40 }
 0x37a   :  { %v1431_v18 = vpop.f32.mrf.mxu2 }
 0x37c   :  { %2206 = vmatpush.bf16.msra.mxu2 %v1650_v8  ;;  %v5133_v8 = vpop.permute.xlu2 %1847 }
 0x37d   :  { %5787 = vst [vmem:[#allocation48_spill] sm:$0xff] %v5133_v8  ;;  %v2037_v8 = vadd.f32 %v5040_v60, %v4923_v12  ;;  %v3106_v60 = vld [vmem:[%s5594_s5 + $0x98] sm:$0xf0] }
 0x37f   :  { %2157 = vmatmul.bf16.gmra.mxu1 %v5090_v62 }
 0x380   :  { %2207 = vmatpush.bf16.msra.mxu2 %v4916_v42  ;;  %v5118_v19 = vpop.f32.mrf.mxu0  ;;  %v3206_v42 = vld [vmem:[%s5594_s5 + $0x84] sm:$0xf] }
 0x381   :  { %v1510_v15 = vpop.f32.mrf.mxu3  ;;  %v5131_v41 = vor.u32 %v3206_v42, %v3098_v54 }
 0x382   :  { %v5110_v35 = vadd.f32 %v1510_v15, %v1422_v33  ;;  %v5142_v33 = vpop.permute.xlu0 %1852  ;;  %v5144_v15 = vpop.permute.xlu1 %1857 }
 0x383   :  { %2083 = vmatmul.bf16.gmra.mxu0 %v5104_v1  ;;  %5786 = vst [vmem:[#allocation47_spill] sm:$0xff] %v5131_v41 }
 0x384   :  { %2208 = vmatpush.bf16.msra.mxu2 %v4887_v4  ;;  %v2035_v4 = vadd.f32 %v5018_v37, %v4905_v26  ;;  %5788 = vst [vmem:[#allocation49_spill] sm:$0xff] %v5142_v33  ;;  %v5790_v37 = vld [vmem:[#allocation36_spill] sm:$0xff] }
 0x385   :  { %5789 = vst [vmem:[#allocation50_spill] sm:$0xff] %v5144_v15  ;;  %v1427_v42 = vadd.f32 %v1426_v14, %v5790_v37  ;;  %v5158_v15 = vpop.f32.mrf.mxu2  ;;  %v3208_v37 = vld [vmem:[%s5594_s5 + $0x94] sm:$0xf] }
 0x388   :  { %2209 = vmatpush.bf16.msra.mxu2 %v4858_v45 }
 0x389   :  { %v5127_v34 = vpop.f32.mrf.mxu3 }
 0x38c   :  { %v2123_v51 = vpop.f32.mrf.mxu1  ;;  %2210 = vmatpush.bf16.msra.mxu2 %v4826_v44  ;;  %v5149_v44 = vor.u32 %v3213_v24, %v3120_v50  ;;  %v5162_v50 = vpop.permute.xlu0 %2479 }
 0x38d   :  { %v2124_v45 = vadd.f32 %v2123_v51, %v2035_v4  ;;  %v5151_v4 = vpop.f32.mrf.mxu0  ;;  %5792 = vst [vmem:[#allocation51_spill] sm:$0xff] %v5162_v50  ;;  %v5164_v24 = vpop.permute.xlu1 %2484 }
 0x38e   :  { %5793 = vst [vmem:[#allocation52_spill] sm:$0xff] %v5164_v24 }
 0x38f   :  { %2162 = vmatmul.bf16.gmra.mxu1 %v5131_v41  ;;  %2211 = vmatmul.bf16.vlgmr.msra.gmra.mxu2 %v4797_v5  ;;  %v2381_v33 = vmax.f32 %v2124_v45, 0.0  ;;  %v5160_v5 = vpop.permute.xlu2 %1862 }
 0x390   :  { %5791 = vst [vmem:[#allocation36_spill] sm:$0xff] %v5160_v5 }
 0x391   :  { %v1515_v54 = vpop.f32.mrf.mxu3 }
 0x392   :  { %v5153_v51 = vadd.f32 %v1515_v54, %v1427_v42  ;;  %v2637_v42 = vmul.f32 %v5162_v50, %v2381_v33  ;;  %v5178_v54 = vor.u32 %v3208_v37, %v3106_v60  ;;  %v3215_v33 = vld [vmem:[%s5594_s5 + $0xc4] sm:$0xf0] }
 0x393   :  { %2088 = vmatmul.bf16.gmra.mxu0 %v5149_v44  ;;  %v5796_v37 = vld [vmem:[#allocation26_spill] sm:$0xff] }
 0x394   :  { %v2125_v30 = vpop.f32.mrf.mxu1  ;;  %5794 = vst [vmem:[#allocation53_spill] sm:$0xff] %v5178_v54  ;;  %v1432_v60 = vadd.f32 %v1431_v18, %v5796_v37  ;;  %v5199_v50 = vpop.permute.xlu0 %2494 }
 0x395   :  { %v2126_v27 = vadd.f32 %v2125_v30, %v2037_v8  ;;  %v2049_v5 = vpop.f32.mrf.mxu0  ;;  %5797 = vst [vmem:[#allocation26_spill] sm:$0xff] %v5199_v50 }
 0x397   :  { %v2383_v14 = vmax.f32 %v2126_v27, 0.0  ;;  %v2040_v27 = vadd.f32 %v5072_v20, %v4927_v28  ;;  %v5188_v20 = vpop.permute.xlu2 %2489 }
 0x398   :  { %5795 = vst [vmem:[#allocation54_spill] sm:$0xff] %v5188_v20 }
 0x399   :  { %v2639_v45 = vmul.f32 %v5164_v24, %v2383_v14  ;;  %v5174_v30 = vpop.f32.mrf.mxu3  ;;  %v1436_v14 = vpop.f32.mrf.mxu2 }
 0x39b   :  { %v2701_v8 = vadd.f32 %v2639_v45, %v2637_v42  ;;  %v5191_v42 = vor.u32 %v3215_v33, %v3128_v63  ;;  %v3210_v63 = vld [vmem:[%s5594_s5 + $0xa4] sm:$0xf] }
 0x39c   :  { %v2128_v2 = vpop.f32.mrf.mxu1 }
 0x39d   :  { %v2129_v48 = vadd.f32 %v2128_v2, %v2040_v27 }
 0x39f   :  { %v2385_v31 = vmax.f32 %v2129_v48, 0.0  ;;  %2167 = vmatmul.bf16.gmra.mxu1 %v5178_v54  ;;  %2216 = vmatmul.bf16.gmra.mxu2 %v4813_v29  ;;  %v2051_v29 = vpop.f32.mrf.mxu0 }
 0x3a1   :  { %v2641_v2 = vmul.f32 %v5188_v20, %v2385_v31  ;;  %v1520_v45 = vpop.f32.mrf.mxu3  ;;  %v3114_v31 = vld [vmem:[%s5594_s5 + $0xa8] sm:$0xf0]  ;;  %v5207_v18 = vpop.f32.mrf.mxu2 }
 0x3a2   :  { %v5194_v27 = vadd.f32 %v1520_v45, %v1432_v60  ;;  %v5214_v33 = vor.u32 %v3210_v63, %v3114_v31  ;;  %v3217_v45 = vld [vmem:[%s5594_s5 + $0xd4] sm:$0xf0] }
 0x3a3   :  { %v2702_v28 = vadd.f32 %v2701_v8, %v2641_v2  ;;  %2093 = vmatmul.bf16.gmra.mxu0 %v5191_v42  ;;  %v3136_v2 = vld [vmem:[%s5594_s5 + $0xd0] sm:$0xf] }
 0x3a4   :  { %v2130_v48 = vpop.f32.mrf.mxu1  ;;  %5798 = vst [vmem:[#allocation55_spill] sm:$0xff] %v5214_v33  ;;  %v5227_v31 = vor.u32 %v3217_v45, %v3136_v2  ;;  %v3212_v2 = vld [vmem:[%s5594_s5 + $0xb4] sm:$0xf]  ;;  %v3122_v45 = vld [vmem:[%s5594_s5 + $0xb8] sm:$0xf0] }
 0x3a5   :  { %v2131_v54 = vadd.f32 %v2130_v48, %v2042_v7  ;;  %v2045_v7 = vadd.f32 %v5118_v19, %v4942_v39 }
 0x3a7   :  { %v2387_v24 = vmax.f32 %v2131_v54, 0.0  ;;  %v2054_v63 = vpop.f32.mrf.mxu0 }
 0x3a9   :  { %v2643_v10 = vmul.f32 %v5199_v50, %v2387_v24  ;;  %v5210_v8 = vpop.f32.mrf.mxu3  ;;  %v5224_v24 = vpop.permute.xlu1 %2499 }
 0x3aa   :  { %5799 = vst [vmem:[#allocation56_spill] sm:$0xff] %v5224_v24  ;;  %v5232_v39 = vpop.f32.mrf.mxu2 }
 0x3ab   :  { %v2703_v54 = vadd.f32 %v2702_v28, %v2643_v10  ;;  %v5800_v28 = vld [vmem:[#allocation24_spill] sm:$0xff] }
 0x3ac   :  { %v2133_v37 = vpop.f32.mrf.mxu1  ;;  %v1437_v19 = vadd.f32 %v1436_v14, %v5800_v28  ;;  %v5237_v14 = vpop.permute.xlu2 %2504 }
 0x3ad   :  { %v2134_v60 = vadd.f32 %v2133_v37, %v2045_v7  ;;  %5801 = vst [vmem:[#allocation24_spill] sm:$0xff] %v5237_v14 }
 0x3af   :  { %v2389_v48 = vmax.f32 %v2134_v60, 0.0  ;;  %2172 = vmatmul.bf16.gmra.mxu1 %v5214_v33  ;;  %2221 = vmatmul.bf16.gmra.mxu2 %v4833_v23  ;;  %v2047_v60 = vadd.f32 %v5151_v4, %v4950_v49  ;;  %v2056_v4 = vpop.f32.mrf.mxu0 }
 0x3b1   :  { %v2645_v10 = vmul.f32 %v5224_v24, %v2389_v48  ;;  %v1525_v7 = vpop.f32.mrf.mxu3 }
 0x3b2   :  { %v5230_v37 = vadd.f32 %v1525_v7, %v1437_v19  ;;  %v5251_v7 = vpop.f32.mrf.mxu2 }
 0x3b3   :  { %v2704_v33 = vadd.f32 %v2703_v54, %v2645_v10  ;;  %2098 = vmatmul.bf16.gmra.mxu0 %v5227_v31  ;;  %v2050_v54 = vadd.f32 %v2049_v5, %v4952_v9  ;;  %v5261_v5 = vpop.permute.xlu0 %2509 }
 0x3b4   :  { %v2135_v50 = vpop.f32.mrf.mxu1  ;;  %5803 = vst [vmem:[#allocation58_spill] sm:$0xff] %v5261_v5 }
 0x3b5   :  { %v2136_v23 = vadd.f32 %v2135_v50, %v2047_v60  ;;  %v5249_v50 = vor.u32 %v3212_v2, %v3122_v45 }
 0x3b7   :  { %v2391_v40 = vmax.f32 %v2136_v23, 0.0  ;;  %5802 = vst [vmem:[#allocation57_spill] sm:$0xff] %v5249_v50  ;;  %v3144_v23 = vld [vmem:[%s5594_s5 + $0xe0] sm:$0xf] }
 0x3b9   :  { %v2647_v48 = vmul.f32 %v5237_v14, %v2391_v40  ;;  %v5246_v28 = vpop.f32.mrf.mxu3  ;;  %v3219_v40 = vld [vmem:[%s5594_s5 + $0xe4] sm:$0xf0] }
 0x3ba   :  { %v5270_v49 = vpop.f32.mrf.mxu2 }
 0x3bb   :  { %v2705_v19 = vadd.f32 %v2704_v33, %v2647_v48  ;;  %v5263_v33 = vor.u32 %v3219_v40, %v3144_v23  ;;  %v2052_v48 = vadd.f32 %v2051_v29, %v4961_v6  ;;  %v3214_v23 = vld [vmem:[%s5594_s5 + $0xc4] sm:$0xf]  ;;  %v2055_v40 = vadd.f32 %v2054_v63, %v4963_v43  ;;  %v3152_v6 = vld [vmem:[%s5594_s5 + $0xf0] sm:$0xf]  ;;  %v5294_v63 = vpop.permute.xlu2 %2519 }
 0x3bc   :  { %v2138_v10 = vpop.f32.mrf.mxu1  ;;  %5806 = vst [vmem:[#allocation61_spill] sm:$0xff] %v5294_v63 }
 0x3bd   :  { %v2139_v60 = vadd.f32 %v2138_v10, %v2050_v54  ;;  %v2059_v10 = vpop.f32.mrf.mxu0 }
 0x3bf   :  { %v2393_v14 = vmax.f32 %v2139_v60, 0.0  ;;  %2177 = vmatmul.bf16.gmra.mxu1 %v5249_v50  ;;  %2226 = vmatmul.bf16.gmra.mxu2 %v4863_v53  ;;  %v5272_v53 = vpop.permute.xlu1 %2514 }
 0x3c0   :  { %5804 = vst [vmem:[#allocation59_spill] sm:$0xff] %v5272_v53 }
 0x3c1   :  { %v2649_v2 = vmul.f32 %v5261_v5, %v2393_v14  ;;  %v5266_v45 = vpop.f32.mrf.mxu3  ;;  %v3130_v14 = vld [vmem:[%s5594_s5 + $0xc8] sm:$0xf0]  ;;  %v3221_v5 = vld [vmem:[%s5594_s5 + $0xf4] sm:$0xf0] }
 0x3c3   :  { %v2706_v54 = vadd.f32 %v2705_v19, %v2649_v2  ;;  %2103 = vmatmul.bf16.gmra.mxu0 %v5263_v33  ;;  %v5284_v2 = vor.u32 %v3214_v23, %v3130_v14 }
 0x3c4   :  { %v2140_v9 = vpop.f32.mrf.mxu1 }
 0x3c5   :  { %v2141_v60 = vadd.f32 %v2140_v9, %v2052_v48  ;;  %5805 = vst [vmem:[#allocation60_spill] sm:$0xff] %v5284_v2  ;;  %v2061_v24 = vpop.f32.mrf.mxu0 }
 0x3c7   :  { %v2395_v50 = vmax.f32 %v2141_v60, 0.0 }
 0x3c9   :  { %v2651_v29 = vmul.f32 %v5272_v53, %v2395_v50  ;;  %v5281_v19 = vpop.f32.mrf.mxu3  ;;  %v5296_v50 = vor.u32 %v3221_v5, %v3152_v6  ;;  %v5301_v53 = vpop.permute.xlu0 %2524  ;;  %v3138_v6 = vld [vmem:[%s5594_s5 + $0xd8] sm:$0xf0] }
 0x3ca   :  { %5807 = vst [vmem:[#allocation62_spill] sm:$0xff] %v5301_v53 }
 0x3cb   :  { %v2707_v9 = vadd.f32 %v2706_v54, %v2651_v29  ;;  %v1448_v54 = vpop.f32.mrf.mxu2  ;;  %v2057_v29 = vadd.f32 %v2056_v4, %v4965_v21 }
 0x3cc   :  { %v2143_v48 = vpop.f32.mrf.mxu1 }
 0x3cd   :  { %v2144_v60 = vadd.f32 %v2143_v48, %v2055_v40 }
 0x3cf   :  { %v2397_v20 = vmax.f32 %v2144_v60, 0.0  ;;  %2182 = vmatmul.bf16.gmra.mxu1 %v5284_v2  ;;  %2231 = vmatmul.bf16.gmra.mxu2 %v4892_v58  ;;  %v2064_v2 = vpop.f32.mrf.mxu0  ;;  %v3216_v58 = vld [vmem:[%s5594_s5 + $0xd4] sm:$0xf] }
 0x3d1   :  { %v2653_v23 = vmul.f32 %v5294_v63, %v2397_v20  ;;  %v1535_v14 = vpop.f32.mrf.mxu3  ;;  %v5315_v63 = vpop.permute.xlu1 %2529 }
 0x3d3   :  { %v2708_v40 = vadd.f32 %v2707_v9, %v2653_v23  ;;  %2108 = vmatmul.bf16.gmra.mxu0 %v5296_v50  ;;  %v1451_v5 = vpop.f32.mrf.mxu2  ;;  %v2060_v9 = vadd.f32 %v2059_v10, %v4983_v25 }
 0x3d4   :  { %v2145_v48 = vpop.f32.mrf.mxu1 }
 0x3d5   :  { %v2146_v43 = vadd.f32 %v2145_v48, %v2057_v29  ;;  %v5311_v29 = vor.u32 %v3216_v58, %v3138_v6  ;;  %v1452_v6 = vadd.f32 %v1451_v5, %v5734_v32  ;;  %v1447_v32 = vadd.f32 %v5270_v49, %v5728_v61 }
 0x3d7   :  { %v2399_v60 = vmax.f32 %v2146_v43, 0.0 }
 0x3d9   :  { %v2655_v20 = vmul.f32 %v5301_v53, %v2399_v60  ;;  %v1537_v4 = vpop.f32.mrf.mxu3  ;;  %v2066_v60 = vpop.f32.mrf.mxu0  ;;  %v2062_v53 = vadd.f32 %v2061_v24, %v4987_v47 }
 0x3db   :  { %v2709_v23 = vadd.f32 %v2708_v40, %v2655_v20  ;;  %v1453_v40 = vpop.f32.mrf.mxu2 }
 0x3dc   :  { %v2148_v43 = vpop.f32.mrf.mxu1 }
 0x3dd   :  { %v2149_v48 = vadd.f32 %v2148_v43, %v2060_v9  ;;  %v5320_v9 = vpop.permute.xlu2 %2534  ;;  %v1449_v43 = vadd.f32 %v1448_v54, %v5730_v52  ;;  %v2065_v52 = vadd.f32 %v2064_v2, %v4989_v11  ;;  %v1444_v54 = vadd.f32 %v5251_v7, %v4614_v0  ;;  %v5809_v0 = vld [vmem:[#allocation34_spill] sm:$0xff] }
 0x3de   :  { %5808 = vst [vmem:[#allocation63_spill] sm:$0xff] %v5320_v9  ;;  %v1439_v7 = vadd.f32 %v5207_v18, %v5809_v0 }
 0x3df   :  { %v2401_v21 = vmax.f32 %v2149_v48, 0.0  ;;  %2187 = vmatmul.bf16.gmra.mxu1 %v5311_v29  ;;  %2236 = vmatmul.bf16.gmra.mxu2 %v4921_v38  ;;  %v1454_v38 = vadd.f32 %v1453_v40, %v5735_v22  ;;  %v1538_v5 = vadd.f32 %v1537_v4, %v1449_v43  ;;  %v1533_v61 = vadd.f32 %v5281_v19, %v1444_v54 }
 0x3e1   :  { %v2657_v12 = vmul.f32 %v5315_v63, %v2401_v21  ;;  %v1540_v26 = vpop.f32.mrf.mxu3  ;;  %v3218_v21 = vld [vmem:[%s5594_s5 + $0xe4] sm:$0xf]  ;;  %v2069_v40 = vpop.f32.mrf.mxu0  ;;  %v1604_v49 = vmax.f32 %v1538_v5, 0.0  ;;  %v1600_v19 = vmax.f32 %v1533_v61, 0.0 }
 0x3e2   :  { %v1541_v48 = vadd.f32 %v1540_v26, %v1452_v6 }
 0x3e3   :  { %v2710_v41 = vadd.f32 %v2709_v23, %v2657_v12  ;;  %v3146_v12 = vld [vmem:[%s5594_s5 + $0xe8] sm:$0xf0] }
 0x3e4   :  { %v2150_v10 = vpop.f32.mrf.mxu1  ;;  %v5334_v26 = vor.u32 %v3218_v21, %v3146_v12  ;;  %v5811_v12 = vld [vmem:[#allocation30_spill] sm:$0xff] }
 0x3e5   :  { %v2151_v58 = vadd.f32 %v2150_v10, %v2062_v53  ;;  %v1536_v10 = vadd.f32 %v1535_v14, %v1447_v32 }
 0x3e7   :  { %v2403_v20 = vmax.f32 %v2151_v58, 0.0  ;;  %v1606_v58 = vmax.f32 %v1541_v48, 0.0 }
 0x3e9   :  { %v2659_v24 = vmul.f32 %v5320_v9, %v2403_v20  ;;  %v1542_v53 = vpop.f32.mrf.mxu3  ;;  %v1442_v9 = vadd.f32 %v5232_v39, %v4655_v16  ;;  %v1528_v39 = vadd.f32 %v5246_v28, %v1439_v7  ;;  %v2071_v32 = vpop.f32.mrf.mxu0  ;;  %v5812_v28 = vld [vmem:[#allocation31_spill] sm:$0xff] }
 0x3ea   :  { %v1543_v23 = vadd.f32 %v1542_v53, %v1454_v38  ;;  %v5810_v38 = vld [vmem:[#allocation16_spill] sm:$0xff]  ;;  %v1429_v54 = vadd.f32 %v5106_v36, %v5812_v28 }
 0x3eb   :  { %v2711_v22 = vadd.f32 %v2710_v41, %v2659_v24  ;;  %v5343_v41 = vpop.permute.xlu0 %2539  ;;  %v1531_v14 = vadd.f32 %v5266_v45, %v1442_v9  ;;  %v2067_v48 = vadd.f32 %v2066_v60, %v5810_v38  ;;  %v1596_v9 = vmax.f32 %v1528_v39, 0.0  ;;  %v5815_v39 = vld [vmem:[#allocation14_spill] sm:$0xff] }
 0x3ec   :  { %v1608_v6 = vmax.f32 %v1543_v23, 0.0  ;;  %v2153_v47 = vpop.f32.mrf.mxu1  ;;  %v1594_v60 = vmax.f32 %v5230_v37, 0.0  ;;  %v5814_v37 = vld [vmem:[#allocation38_spill] sm:$0xff] }
 0x3ed   :  { %v2154_v20 = vadd.f32 %v2153_v47, %v2065_v52  ;;  %v1602_v47 = vmax.f32 %v1536_v10, 0.0  ;;  %v1598_v24 = vmax.f32 %v1531_v14, 0.0  ;;  %v5354_v52 = vpop.permute.xlu1 %2544  ;;  %v1518_v10 = vadd.f32 %v5174_v30, %v1429_v54 }
 0x3ee   :  { %v1672_v4 = vpack.c.bf16 %v1608_v6, %v1606_v58  ;;  %v1666_v6 = vpack.c.bf16 %v1596_v9, %v1594_v60  ;;  %v1578_v60 = vmax.f32 %v5070_v13, 0.0 }
 0x3ef   :  { %v2405_v2 = vmax.f32 %v2154_v20, 0.0  ;;  %2192 = vmatmul.bf16.gmra.mxu1 %v5334_v26  ;;  %2241 = vmatmul.bf16.gmra.mxu2 %v4956_v3  ;;  %v1670_v43 = vpack.c.bf16 %v1604_v49, %v1602_v47  ;;  %v1434_v3 = vadd.f32 %v5158_v15, %v5811_v12  ;;  %v1668_v5 = vpack.c.bf16 %v1600_v19, %v1598_v24  ;;  %v3220_v15 = vld [vmem:[%s5594_s5 + $0xf4] sm:$0xf]  ;;  %v5813_v20 = vld [vmem:[#allocation21_spill] sm:$0xff]  ;;  %v5816_v19 = vld [vmem:[#allocation35_spill] sm:$0xff] }
 0x3f0   :  { %2292 = vmatpush.bf16.msra.mxu3 %v1672_v4  ;;  %v2070_v61 = vadd.f32 %v2069_v40, %v5813_v20  ;;  %v1424_v4 = vadd.f32 %v5046_v59, %v5814_v37  ;;  %v1588_v47 = vmax.f32 %v1518_v10, 0.0  ;;  %v5376_v40 = vpop.permute.xlu2 %2549  ;;  %v1586_v59 = vmax.f32 %v5153_v51, 0.0  ;;  %v5818_v24 = vld [vmem:[#allocation40_spill] sm:$0xff] }
 0x3f1   :  { %v2661_v16 = vmul.f32 %v5343_v41, %v2405_v2  ;;  %v1523_v45 = vadd.f32 %v5210_v8, %v1434_v3  ;;  %v3154_v8 = vld [vmem:[%s5594_s5 + $0xf8] sm:$0xf0]  ;;  %v1590_v2 = vmax.f32 %v5194_v27, 0.0  ;;  %v2074_v27 = vpop.f32.mrf.mxu0 }
 0x3f2   :  { %v5368_v49 = vor.u32 %v3220_v15, %v3154_v8  ;;  %v1513_v14 = vadd.f32 %v5127_v34, %v1424_v4  ;;  %v1662_v3 = vpack.c.bf16 %v1588_v47, %v1586_v59  ;;  %v5822_v4 = vld [vmem:[#allocation42_spill] sm:$0xff] }
 0x3f3   :  { %v2712_v21 = vadd.f32 %v2711_v22, %v2661_v16  ;;  %v1592_v58 = vmax.f32 %v1523_v45, 0.0  ;;  %v1582_v45 = vmax.f32 %v5110_v35, 0.0  ;;  %v5385_v51 = vpop.permute.xlu0 %2554 }
 0x3f4   :  { %v2155_v53 = vpop.f32.mrf.mxu1  ;;  %2293 = vmatpush.bf16.msra.mxu3 %v1670_v43  ;;  %v5817_v43 = vld [vmem:[#allocation15_spill] sm:$0xff]  ;;  %v1584_v12 = vmax.f32 %v1513_v14, 0.0 }
 0x3f5   :  { %v2156_v18 = vadd.f32 %v2155_v53, %v2067_v48  ;;  %v1664_v16 = vpack.c.bf16 %v1592_v58, %v1590_v2  ;;  %v1419_v48 = vadd.f32 %v5817_v43, %v5816_v19  ;;  %v2072_v53 = vadd.f32 %v2071_v32, %v5818_v24  ;;  %v5392_v37 = vpop.permute.xlu1 %2559  ;;  %v5823_v19 = vld [vmem:[#allocation43_spill] sm:$0xff] }
 0x3f6   :  { %v1660_v28 = vpack.c.bf16 %v1584_v12, %v1582_v45  ;;  %v5824_v12 = vld [vmem:[#allocation20_spill] sm:$0xff] }
 0x3f7   :  { %v2407_v23 = vmax.f32 %v2156_v18, 0.0  ;;  %v1508_v34 = vadd.f32 %v5084_v46, %v1419_v48 }
 0x3f8   :  { %2294 = vmatpush.bf16.msra.mxu3 %v1668_v5 }
 0x3f9   :  { %v2663_v22 = vmul.f32 %v5354_v52, %v2407_v23  ;;  %v1580_v23 = vmax.f32 %v1508_v34, 0.0  ;;  %v2076_v15 = vpop.f32.mrf.mxu0 }
 0x3fa   :  { %v2077_v2 = vadd.f32 %v2076_v15, %v5822_v4 }
 0x3fb   :  { %v2713_v36 = vadd.f32 %v2712_v21, %v2663_v22  ;;  %v1658_v8 = vpack.c.bf16 %v1580_v23, %v1578_v60  ;;  %v5819_v22 = vld [vmem:[#allocation41_spill] sm:$0xff] }
 0x3fc   :  { %v2158_v0 = vpop.f32.mrf.mxu1  ;;  %2295 = vmatpush.bf16.msra.mxu3 %v1666_v6  ;;  %v2075_v32 = vadd.f32 %v2074_v27, %v5819_v22 }
 0x3fd   :  { %v2159_v7 = vadd.f32 %v2158_v0, %v2070_v61  ;;  %v5820_v61 = vld [vmem:[#allocation25_spill] sm:$0xff] }
 0x3ff   :  { %v2409_v30 = vmax.f32 %v2159_v7, 0.0  ;;  %2197 = vmatmul.bf16.gmra.mxu1 %v5368_v49  ;;  %2246 = vmatmul.bf16.gmra.mxu2 %v5815_v39 }
 0x400   :  { %2296 = vmatpush.bf16.msra.mxu3 %v1664_v16 }
 0x401   :  { %v2665_v21 = vmul.f32 %v5376_v40, %v2409_v30  ;;  %v2079_v7 = vpop.f32.mrf.mxu0  ;;  %v5396_v30 = vpop.permute.xlu2 %2564 }
 0x402   :  { %v2080_v43 = vadd.f32 %v2079_v7, %v5823_v19  ;;  %v5828_v7 = vld [vmem:[#allocation17_spill] sm:$0xff] }
 0x403   :  { %v2714_v18 = vadd.f32 %v2713_v36, %v2665_v21  ;;  %v5821_v36 = vld [vmem:[#allocation10_spill] sm:$0xff] }
 0x404   :  { %v2160_v9 = vpop.f32.mrf.mxu1  ;;  %2297 = vmatpush.bf16.msra.mxu3 %v1662_v3  ;;  %v5402_v3 = vpop.permute.xlu0 %2569 }
 0x405   :  { %v2161_v5 = vadd.f32 %v2160_v9, %v2072_v53 }
 0x407   :  { %v2411_v54 = vmax.f32 %v2161_v5, 0.0 }
 0x408   :  { %2298 = vmatpush.bf16.msra.mxu3 %v1660_v28  ;;  %v5406_v28 = vpop.permute.xlu1 %2574 }
 0x409   :  { %v2667_v46 = vmul.f32 %v5385_v51, %v2411_v54  ;;  %v2081_v21 = vpop.f32.mrf.mxu0 }
 0x40b   :  { %v2715_v10 = vadd.f32 %v2714_v18, %v2667_v46  ;;  %v2082_v18 = vadd.f32 %v2081_v21, %v5054_v56 }
 0x40c   :  { %v2163_v58 = vpop.f32.mrf.mxu1  ;;  %2299 = vmatpush.bf16.msra.mxu3 %v1658_v8 }
 0x40d   :  { %v2164_v35 = vadd.f32 %v2163_v58, %v2075_v32  ;;  %v5412_v58 = vpop.permute.xlu2 %2579 }
 0x40f   :  { %v2413_v6 = vmax.f32 %v2164_v35, 0.0  ;;  %2251 = vmatmul.bf16.gmra.mxu2 %v5820_v61  ;;  %2300 = vmatmul.bf16.vlgmr.msra.gmra.mxu3 %v5821_v36  ;;  %v5826_v36 = vld [vmem:[#allocation19_spill] sm:$0xff] }
 0x411   :  { %v2669_v13 = vmul.f32 %v5392_v37, %v2413_v6  ;;  %v2084_v54 = vpop.f32.mrf.mxu0 }
 0x412   :  { %v2085_v46 = vadd.f32 %v2084_v54, %v5061_v57  ;;  %v2212_v61 = vpop.f32.mrf.mxu2 }
 0x413   :  { %v2716_v0 = vadd.f32 %v2715_v10, %v2669_v13  ;;  %v5825_v10 = vld [vmem:[#allocation22_spill] sm:$0xff] }
 0x414   :  { %v2165_v14 = vpop.f32.mrf.mxu1 }
 0x415   :  { %v2166_v47 = vadd.f32 %v2165_v14, %v2077_v2 }
 0x417   :  { %v2415_v16 = vmax.f32 %v2166_v47, 0.0 }
 0x419   :  { %v2671_v39 = vmul.f32 %v5396_v30, %v2415_v16 }
 0x41a   :  { %v2214_v13 = vpop.f32.mrf.mxu2 }
 0x41b   :  { %v2717_v48 = vadd.f32 %v2716_v0, %v2671_v39  ;;  %v5827_v0 = vld [vmem:[#allocation11_spill] sm:$0xff]  ;;  %v5830_v39 = vld [vmem:[#allocation29_spill] sm:$0xff] }
 0x41c   :  { %v2168_v59 = vpop.f32.mrf.mxu1 }
 0x41d   :  { %v2169_v27 = vadd.f32 %v2168_v59, %v2080_v43  ;;  %v2213_v43 = vadd.f32 %v2212_v61, %v5830_v39  ;;  %v5831_v59 = vld [vmem:[#allocation27_spill] sm:$0xff]  ;;  %v5840_v39 = vld [vmem:[#allocation28_spill] sm:$0xff] }
 0x41f   :  { %v2417_v34 = vmax.f32 %v2169_v27, 0.0  ;;  %2256 = vmatmul.bf16.gmra.mxu2 %v5067_v55  ;;  %2305 = vmatmul.bf16.gmra.mxu3 %v5824_v12  ;;  %v2215_v27 = vadd.f32 %v2214_v13, %v5831_v59 }
 0x421   :  { %v2673_v53 = vmul.f32 %v5402_v3, %v2417_v34 }
 0x422   :  { %v2217_v2 = vpop.f32.mrf.mxu2 }
 0x423   :  { %v2718_v45 = vadd.f32 %v2717_v48, %v2673_v53  ;;  %v5832_v53 = vld [vmem:[#allocation51_spill] sm:$0xff] }
 0x424   :  { %v2170_v9 = vpop.f32.mrf.mxu1 }
 0x425   :  { %v2171_v5 = vadd.f32 %v2170_v9, %v2082_v18  ;;  %v5833_v18 = vld [vmem:[#allocation52_spill] sm:$0xff]  ;;  %v5834_v9 = vld [vmem:[#allocation53_spill] sm:$0xff] }
 0x427   :  { %v2419_v23 = vmax.f32 %v2171_v5, 0.0 }
 0x429   :  { %v2675_v60 = vmul.f32 %v5406_v28, %v2419_v23 }
 0x42b   :  { %v2719_v55 = vadd.f32 %v2718_v45, %v2675_v60 }
 0x42c   :  { %v2173_v15 = vpop.f32.mrf.mxu1 }
 0x42d   :  { %v2174_v8 = vadd.f32 %v2173_v15, %v2085_v46 }
 0x42f   :  { %v2421_v32 = vmax.f32 %v2174_v8, 0.0  ;;  %2261 = vmatmul.bf16.gmra.mxu2 %v5104_v1  ;;  %2310 = vmatmul.bf16.gmra.mxu3 %v5825_v10  ;;  %v2219_v1 = vpop.f32.mrf.mxu2  ;;  %v5837_v8 = vld [vmem:[#allocation7_spill] sm:$0xff] }
 0x431   :  { %v2677_v35 = vmul.f32 %v5412_v58, %v2421_v32  ;;  %v2220_v32 = vadd.f32 %v2219_v1, %v5837_v8 }
 0x433   :  { %v5415_v6 = vadd.f32 %v2719_v55, %v2677_v35  ;;  %v5836_v55 = vld [vmem:[#allocation54_spill] sm:$0xff] }
 0x437   :  { %v2222_v14 = vpop.f32.mrf.mxu2 }
 0x43f   :  { %2266 = vmatmul.bf16.gmra.mxu2 %v5149_v44  ;;  %2315 = vmatmul.bf16.gmra.mxu3 %v5826_v36  ;;  %v2224_v47 = vpop.f32.mrf.mxu2 }
 0x447   :  { %v2227_v44 = vpop.f32.mrf.mxu2 }
 0x44f   :  { %2271 = vmatmul.bf16.gmra.mxu2 %v5191_v42  ;;  %2320 = vmatmul.bf16.gmra.mxu3 %v5827_v0  ;;  %v2229_v16 = vpop.f32.mrf.mxu2  ;;  %v5829_v42 = vld [vmem:[#allocation47_spill] sm:$0xff]  ;;  %v5838_v0 = vld [vmem:[#allocation26_spill] sm:$0xff] }
 0x45f   :  { %2276 = vmatmul.bf16.gmra.mxu2 %v5227_v31  ;;  %2325 = vmatmul.bf16.gmra.mxu3 %v5828_v7 }
 0x46f   :  { %2281 = vmatmul.bf16.gmra.mxu2 %v5263_v33  ;;  %2330 = vmatmul.bf16.gmra.mxu3 %v5042_v17 }
 0x47f   :  { %2286 = vmatmul.bf16.gmra.mxu2 %v5296_v50  ;;  %2335 = vmatmul.bf16.gmra.mxu3 %v5090_v62  ;;  %v2232_v50 = vpop.f32.mrf.mxu2  ;;  %v5835_v62 = vld [vmem:[#allocation6_spill] sm:$0xff] }
 0x480   :  { %v2218_v5 = vadd.f32 %v2217_v2, %v5835_v62 }
 0x487   :  { %v2234_v35 = vpop.f32.mrf.mxu2 }
 0x48f   :  { %2340 = vmatmul.bf16.gmra.mxu3 %v5829_v42  ;;  %v5839_v42 = vld [vmem:[#allocation55_spill] sm:$0xff]  ;;  %v2237_v59 = vpop.f32.mrf.mxu2 }
 0x492   :  { %v2301_v48 = vpop.f32.mrf.mxu3 }
 0x493   :  { %v2302_v31 = vadd.f32 %v2301_v48, %v2213_v43  ;;  %v2223_v43 = vadd.f32 %v2222_v14, %v5840_v39  ;;  %v5849_v39 = vld [vmem:[#allocation60_spill] sm:$0xff] }
 0x495   :  { %v2382_v34 = vmax.f32 %v2302_v31, 0.0 }
 0x497   :  { %v2638_v17 = vmul.f32 %v5832_v53, %v2382_v34 }
 0x49a   :  { %v2303_v21 = vpop.f32.mrf.mxu3 }
 0x49b   :  { %v2304_v12 = vadd.f32 %v2303_v21, %v2215_v27  ;;  %v5841_v21 = vld [vmem:[#allocation56_spill] sm:$0xff] }
 0x49d   :  { %v2384_v33 = vmax.f32 %v2304_v12, 0.0  ;;  %v5842_v12 = vld [vmem:[#allocation8_spill] sm:$0xff] }
 0x49e   :  { %v2225_v1 = vadd.f32 %v2224_v47, %v5842_v12 }
 0x49f   :  { %v2640_v45 = vmul.f32 %v5833_v18, %v2384_v33  ;;  %2345 = vmatmul.bf16.gmra.mxu3 %v5834_v9  ;;  %v5843_v9 = vld [vmem:[#allocation24_spill] sm:$0xff] }
 0x4a1   :  { %v2738_v23 = vadd.f32 %v2640_v45, %v2638_v17  ;;  %v2239_v45 = vpop.f32.mrf.mxu2 }
 0x4a2   :  { %v2306_v54 = vpop.f32.mrf.mxu3 }
 0x4a3   :  { %v2307_v60 = vadd.f32 %v2306_v54, %v2218_v5  ;;  %v5844_v5 = vld [vmem:[#allocation57_spill] sm:$0xff] }
 0x4a5   :  { %v2386_v46 = vmax.f32 %v2307_v60, 0.0 }
 0x4a7   :  { %v2642_v15 = vmul.f32 %v5836_v55, %v2386_v46 }
 0x4a9   :  { %v2739_v10 = vadd.f32 %v2738_v23, %v2642_v15  ;;  %v5845_v23 = vld [vmem:[#allocation12_spill] sm:$0xff]  ;;  %v5846_v15 = vld [vmem:[#allocation58_spill] sm:$0xff] }
 0x4aa   :  { %v2308_v61 = vpop.f32.mrf.mxu3  ;;  %v2228_v14 = vadd.f32 %v2227_v44, %v5845_v23 }
 0x4ab   :  { %v2309_v36 = vadd.f32 %v2308_v61, %v2220_v32  ;;  %v2242_v32 = vpop.f32.mrf.mxu2 }
 0x4ad   :  { %v2388_v13 = vmax.f32 %v2309_v36, 0.0 }
 0x4af   :  { %v2644_v7 = vmul.f32 %v5838_v0, %v2388_v13  ;;  %2350 = vmatmul.bf16.gmra.mxu3 %v5839_v42 }
 0x4b1   :  { %v2740_v2 = vadd.f32 %v2739_v10, %v2644_v7  ;;  %v5847_v10 = vld [vmem:[#allocation9_spill] sm:$0xff]  ;;  %v5848_v7 = vld [vmem:[#allocation59_spill] sm:$0xff] }
 0x4b2   :  { %v2311_v48 = vpop.f32.mrf.mxu3  ;;  %v2230_v47 = vadd.f32 %v2229_v16, %v5847_v10 }
 0x4b3   :  { %v2312_v31 = vadd.f32 %v2311_v48, %v2223_v43  ;;  %v5850_v43 = vld [vmem:[#allocation39_spill] sm:$0xff]  ;;  %v2244_v48 = vpop.f32.mrf.mxu2 }
 0x4b5   :  { %v2390_v27 = vmax.f32 %v2312_v31, 0.0 }
 0x4b7   :  { %v2646_v34 = vmul.f32 %v5841_v21, %v2390_v27 }
 0x4b9   :  { %v2741_v33 = vadd.f32 %v2740_v2, %v2646_v34  ;;  %v2233_v2 = vadd.f32 %v2232_v50, %v5850_v43  ;;  %v5851_v34 = vld [vmem:[#allocation61_spill] sm:$0xff]  ;;  %v2238_v50 = vadd.f32 %v2237_v59, %v4983_v25  ;;  %v2243_v25 = vadd.f32 %v2242_v32, %v4989_v11 }
 0x4ba   :  { %v2313_v53 = vpop.f32.mrf.mxu3 }
 0x4bb   :  { %v2314_v17 = vadd.f32 %v2313_v53, %v2225_v1  ;;  %v5852_v1 = vld [vmem:[#allocation37_spill] sm:$0xff] }
 0x4bd   :  { %v2392_v18 = vmax.f32 %v2314_v17, 0.0 }
 0x4bf   :  { %v2648_v62 = vmul.f32 %v5843_v9, %v2392_v18  ;;  %2355 = vmatmul.bf16.gmra.mxu3 %v5844_v5  ;;  %v2247_v18 = vpop.f32.mrf.mxu2 }
 0x4c1   :  { %v2742_v54 = vadd.f32 %v2741_v33, %v2648_v62  ;;  %v2235_v33 = vadd.f32 %v2234_v35, %v5852_v1  ;;  %v5853_v62 = vld [vmem:[#allocation62_spill] sm:$0xff] }
 0x4c2   :  { %v2316_v60 = vpop.f32.mrf.mxu3 }
 0x4c3   :  { %v2317_v46 = vadd.f32 %v2316_v60, %v2228_v14 }
 0x4c5   :  { %v2394_v55 = vmax.f32 %v2317_v46, 0.0 }
 0x4c7   :  { %v2650_v8 = vmul.f32 %v5846_v15, %v2394_v55  ;;  %v2249_v46 = vpop.f32.mrf.mxu2  ;;  %v5854_v15 = vld [vmem:[#allocation13_spill] sm:$0xff] }
 0x4c8   :  { %v2240_v35 = vadd.f32 %v2239_v45, %v5854_v15 }
 0x4c9   :  { %v2743_v61 = vadd.f32 %v2742_v54, %v2650_v8 }
 0x4ca   :  { %v2318_v36 = vpop.f32.mrf.mxu3 }
 0x4cb   :  { %v2319_v13 = vadd.f32 %v2318_v36, %v2230_v47  ;;  %v5855_v36 = vld [vmem:[#allocation63_spill] sm:$0xff] }
 0x4cd   :  { %v2396_v0 = vmax.f32 %v2319_v13, 0.0 }
 0x4cf   :  { %v2652_v42 = vmul.f32 %v5848_v7, %v2396_v0  ;;  %2360 = vmatmul.bf16.gmra.mxu3 %v5849_v39 }
 0x4d1   :  { %v2744_v44 = vadd.f32 %v2743_v61, %v2652_v42 }
 0x4d2   :  { %v2321_v31 = vpop.f32.mrf.mxu3 }
 0x4d3   :  { %v2322_v27 = vadd.f32 %v2321_v31, %v2233_v2 }
 0x4d5   :  { %v2398_v21 = vmax.f32 %v2322_v27, 0.0 }
 0x4d7   :  { %v2654_v12 = vmul.f32 %v5851_v34, %v2398_v21 }
 0x4d9   :  { %v2745_v16 = vadd.f32 %v2744_v44, %v2654_v12 }
 0x4da   :  { %v2323_v53 = vpop.f32.mrf.mxu3 }
 0x4db   :  { %v2324_v17 = vadd.f32 %v2323_v53, %v2235_v33 }
 0x4dd   :  { %v2400_v9 = vmax.f32 %v2324_v17, 0.0  ;;  %v5466_v17 = vpop.f32.mrf.mxu0 }
 0x4df   :  { %v2656_v5 = vmul.f32 %v5853_v62, %v2400_v9  ;;  %2365 = vmatmul.bf16.gmra.mxu3 %v5311_v29  ;;  %v2252_v29 = vpop.f32.mrf.mxu2 }
 0x4e1   :  { %v2746_v23 = vadd.f32 %v2745_v16, %v2656_v5 }
 0x4e2   :  { %v2326_v14 = vpop.f32.mrf.mxu3 }
 0x4e3   :  { %v2327_v54 = vadd.f32 %v2326_v14, %v2238_v50 }
 0x4e5   :  { %v2402_v60 = vmax.f32 %v2327_v54, 0.0  ;;  %v2089_v50 = vpop.f32.mrf.mxu0 }
 0x4e7   :  { %v2658_v55 = vmul.f32 %v5315_v63, %v2402_v60  ;;  %v2245_v63 = vadd.f32 %v2244_v48, %v5810_v38  ;;  %v2254_v43 = vpop.f32.mrf.mxu2  ;;  %v2250_v38 = vadd.f32 %v2249_v46, %v5818_v24 }
 0x4e9   :  { %v2747_v8 = vadd.f32 %v2746_v23, %v2658_v55  ;;  %v2255_v23 = vadd.f32 %v2254_v43, %v5822_v4 }
 0x4ea   :  { %v2328_v10 = vpop.f32.mrf.mxu3 }
 0x4eb   :  { %v2329_v47 = vadd.f32 %v2328_v10, %v2240_v35 }
 0x4ed   :  { %v2404_v61 = vmax.f32 %v2329_v47, 0.0  ;;  %v2091_v10 = vpop.f32.mrf.mxu0 }
 0x4ef   :  { %v2660_v13 = vmul.f32 %v5855_v36, %v2404_v61  ;;  %2370 = vmatmul.bf16.gmra.mxu3 %v5334_v26  ;;  %v2248_v26 = vadd.f32 %v2247_v18, %v5813_v20  ;;  %v2257_v34 = vpop.f32.mrf.mxu2  ;;  %v2253_v20 = vadd.f32 %v2252_v29, %v5819_v22 }
 0x4f0   :  { %v2258_v15 = vadd.f32 %v2257_v34, %v5823_v19 }
 0x4f1   :  { %v2748_v59 = vadd.f32 %v2747_v8, %v2660_v13 }
 0x4f2   :  { %v2331_v0 = vpop.f32.mrf.mxu3 }
 0x4f3   :  { %v2332_v7 = vadd.f32 %v2331_v0, %v2243_v25 }
 0x4f5   :  { %v2406_v42 = vmax.f32 %v2332_v7, 0.0 }
 0x4f7   :  { %v2662_v39 = vmul.f32 %v5343_v41, %v2406_v42  ;;  %v2259_v53 = vpop.f32.mrf.mxu2 }
 0x4f8   :  { %v2260_v4 = vadd.f32 %v2259_v53, %v5054_v56 }
 0x4f9   :  { %v2749_v45 = vadd.f32 %v2748_v59, %v2662_v39 }
 0x4fa   :  { %v2333_v2 = vpop.f32.mrf.mxu3 }
 0x4fb   :  { %v2334_v44 = vadd.f32 %v2333_v2, %v2245_v63 }
 0x4fd   :  { %v2408_v31 = vmax.f32 %v2334_v44, 0.0 }
 0x4ff   :  { %v2664_v27 = vmul.f32 %v5354_v52, %v2408_v31  ;;  %2375 = vmatmul.bf16.gmra.mxu3 %v5368_v49  ;;  %v5469_v49 = vpop.f32.mrf.mxu1  ;;  %v2262_v24 = vpop.f32.mrf.mxu2 }
 0x500   :  { %v2263_v42 = vadd.f32 %v2262_v24, %v5061_v57 }
 0x501   :  { %v2750_v11 = vadd.f32 %v2749_v45, %v2664_v27 }
 0x502   :  { %v2336_v32 = vpop.f32.mrf.mxu3 }
 0x503   :  { %v2337_v21 = vadd.f32 %v2336_v32, %v2248_v26 }
 0x505   :  { %v2410_v12 = vmax.f32 %v2337_v21, 0.0 }
 0x507   :  { %v2666_v41 = vmul.f32 %v5376_v40, %v2410_v12  ;;  %v2178_v60 = vpop.f32.mrf.mxu1  ;;  %v5476_v35 = vpop.f32.mrf.mxu2 }
 0x509   :  { %v2751_v48 = vadd.f32 %v2750_v11, %v2666_v41 }
 0x50a   :  { %v2338_v1 = vpop.f32.mrf.mxu3 }
 0x50b   :  { %v2339_v33 = vadd.f32 %v2338_v1, %v2250_v38 }
 0x50d   :  { %v2412_v16 = vmax.f32 %v2339_v33, 0.0 }
 0x50f   :  { %v2668_v52 = vmul.f32 %v5385_v51, %v2412_v16  ;;  %v5480_v59 = vpop.f32.mrf.mxu2  ;;  %v5505_v16 = vpop.permute.xlu0 %2584 }
 0x511   :  { %v2752_v18 = vadd.f32 %v2751_v48, %v2668_v52  ;;  %v5507_v52 = vpop.permute.xlu1 %2589 }
 0x512   :  { %v2341_v9 = vpop.f32.mrf.mxu3 }
 0x513   :  { %v2342_v62 = vadd.f32 %v2341_v9, %v2253_v20  ;;  %v5856_v20 = vld [vmem:[#allocation23_spill] sm:$0xff] }
 0x515   :  { %v2414_v5 = vmax.f32 %v2342_v62, 0.0 }
 0x517   :  { %v2670_v40 = vmul.f32 %v5392_v37, %v2414_v5  ;;  %v2180_v37 = vpop.f32.mrf.mxu1  ;;  %v5484_v2 = vpop.f32.mrf.mxu2  ;;  %v5857_v5 = vld [vmem:[#allocation18_spill] sm:$0xff] }
 0x519   :  { %v2753_v14 = vadd.f32 %v2752_v18, %v2670_v40  ;;  %v2087_v18 = vadd.f32 %v5466_v17, %v5856_v20  ;;  %v2090_v40 = vadd.f32 %v2089_v50, %v5857_v5 }
 0x51a   :  { %v2343_v54 = vpop.f32.mrf.mxu3 }
 0x51b   :  { %v2344_v46 = vadd.f32 %v2343_v54, %v2255_v23  ;;  %v2176_v24 = vadd.f32 %v5469_v49, %v2087_v18  ;;  %v5858_v23 = vld [vmem:[#allocation33_spill] sm:$0xff]  ;;  %v2179_v54 = vadd.f32 %v2178_v60, %v2090_v40  ;;  %v5526_v49 = vpop.permute.xlu1 %2604 }
 0x51d   :  { %v2416_v55 = vmax.f32 %v2344_v46, 0.0  ;;  %v5516_v46 = vpop.permute.xlu2 %2594  ;;  %v2425_v17 = vmax.f32 %v2179_v54, 0.0 }
 0x51f   :  { %v2672_v51 = vmul.f32 %v5396_v30, %v2416_v55  ;;  %v2094_v30 = vpop.f32.mrf.mxu0  ;;  %v2183_v19 = vpop.f32.mrf.mxu1  ;;  %v5859_v55 = vld [vmem:[#allocation44_spill] sm:$0xff] }
 0x520   :  { %v5489_v26 = vpop.f32.mrf.mxu2 }
 0x521   :  { %v2754_v22 = vadd.f32 %v2753_v14, %v2672_v51  ;;  %v2092_v14 = vadd.f32 %v2091_v10, %v5858_v23  ;;  %v2095_v51 = vadd.f32 %v2094_v30, %v5859_v55 }
 0x522   :  { %v2346_v8 = vpop.f32.mrf.mxu3 }
 0x523   :  { %v2347_v47 = vadd.f32 %v2346_v8, %v2258_v15  ;;  %v2423_v15 = vmax.f32 %v2176_v24, 0.0 }
 0x525   :  { %v2418_v61 = vmax.f32 %v2347_v47, 0.0  ;;  %v5521_v47 = vpop.permute.xlu0 %2599  ;;  %v2679_v60 = vmul.f32 %v5505_v16, %v2423_v15  ;;  %v5537_v24 = vpop.permute.xlu2 %2609 }
 0x527   :  { %v2674_v36 = vmul.f32 %v5402_v3, %v2418_v61  ;;  %v2096_v3 = vpop.f32.mrf.mxu0  ;;  %v2185_v44 = vpop.f32.mrf.mxu1  ;;  %v2184_v61 = vadd.f32 %v2183_v19, %v2095_v51 }
 0x528   :  { %v5493_v57 = vpop.f32.mrf.mxu2 }
 0x529   :  { %v2755_v13 = vadd.f32 %v2754_v22, %v2674_v36  ;;  %v2181_v22 = vadd.f32 %v2180_v37, %v2092_v14  ;;  %v5864_v14 = vld [vmem:[#allocation49_spill] sm:$0xff] }
 0x52a   :  { %v2348_v29 = vpop.f32.mrf.mxu3 }
 0x52b   :  { %v2349_v25 = vadd.f32 %v2348_v29, %v2260_v4  ;;  %v5860_v4 = vld [vmem:[#allocation32_spill] sm:$0xff]  ;;  %v2427_v10 = vmax.f32 %v2181_v22, 0.0 }
 0x52c   :  { %v2097_v50 = vadd.f32 %v2096_v3, %v5860_v4  ;;  %v5863_v3 = vld [vmem:[#allocation48_spill] sm:$0xff] }
 0x52d   :  { %v2420_v0 = vmax.f32 %v2349_v25, 0.0  ;;  %v5861_v25 = vld [vmem:[#allocation45_spill] sm:$0xff] }
 0x52e   :  { %v2186_v37 = vadd.f32 %v2185_v44, %v2097_v50 }
 0x52f   :  { %v2676_v7 = vmul.f32 %v5406_v28, %v2420_v0  ;;  %v2099_v11 = vpop.f32.mrf.mxu0  ;;  %v2188_v28 = vpop.f32.mrf.mxu1  ;;  %v2681_v0 = vmul.f32 %v5507_v52, %v2425_v17 }
 0x530   :  { %v5499_v38 = vpop.f32.mrf.mxu2  ;;  %v2100_v30 = vadd.f32 %v2099_v11, %v5861_v25  ;;  %v2431_v18 = vmax.f32 %v2186_v37, 0.0 }
 0x531   :  { %v2756_v39 = vadd.f32 %v2755_v13, %v2676_v7  ;;  %v2429_v7 = vmax.f32 %v2184_v61, 0.0  ;;  %v5865_v61 = vld [vmem:[#allocation50_spill] sm:$0xff] }
 0x532   :  { %v2351_v63 = vpop.f32.mrf.mxu3  ;;  %v2189_v19 = vadd.f32 %v2188_v28, %v2100_v30 }
 0x533   :  { %v2352_v45 = vadd.f32 %v2351_v63, %v2263_v42  ;;  %v5862_v42 = vld [vmem:[#allocation46_spill] sm:$0xff]  ;;  %v2721_v63 = vadd.f32 %v5415_v6, %v2679_v60  ;;  %v2685_v11 = vmul.f32 %v5521_v47, %v2429_v7  ;;  %v2275_v7 = vadd.f32 %v5493_v57, %v5860_v4 }
 0x534   :  { %v2433_v54 = vmax.f32 %v2189_v19, 0.0 }
 0x535   :  { %v2422_v43 = vmax.f32 %v2352_v45, 0.0  ;;  %v2683_v45 = vmul.f32 %v5516_v46, %v2427_v10  ;;  %v2722_v44 = vadd.f32 %v2721_v63, %v2681_v0  ;;  %v2273_v10 = vadd.f32 %v5489_v26, %v5859_v55  ;;  %v5866_v0 = vld [vmem:[#allocation36_spill] sm:$0xff] }
 0x537   :  { %v2678_v56 = vmul.f32 %v5412_v58, %v2422_v43  ;;  %v2101_v34 = vpop.f32.mrf.mxu0  ;;  %v2190_v12 = vpop.f32.mrf.mxu1  ;;  %v2265_v43 = vadd.f32 %v5476_v35, %v5856_v20 }
 0x538   :  { %v5503_v33 = vpop.f32.mrf.mxu2  ;;  %v5543_v35 = vpop.permute.xlu0 %2614 }
 0x539   :  { %v5487_v31 = vadd.f32 %v2756_v39, %v2678_v56  ;;  %v2102_v39 = vadd.f32 %v2101_v34, %v5862_v42  ;;  %v2268_v34 = vadd.f32 %v5480_v59, %v5857_v5  ;;  %v2687_v59 = vmul.f32 %v5526_v49, %v2431_v18 }
 0x53a   :  { %v2353_v27 = vpop.f32.mrf.mxu3 }
 0x53b   :  { %v2191_v40 = vadd.f32 %v2190_v12, %v2102_v39  ;;  %v2354_v28 = vadd.f32 %v2353_v27, %v2265_v43  ;;  %v2270_v12 = vadd.f32 %v5484_v2, %v5858_v23 }
 0x53d   :  { %v2435_v27 = vmax.f32 %v2191_v40, 0.0  ;;  %v2424_v30 = vmax.f32 %v2354_v28, 0.0  ;;  %v2625_v40 = vpop.permute.xlu2 %2624 }
 0x53f   :  { %v2104_v58 = vpop.f32.mrf.mxu0  ;;  %v2193_v48 = vpop.f32.mrf.mxu1  ;;  %v2691_v63 = vmul.f32 %v5543_v35, %v2435_v27  ;;  %v2680_v55 = vmul.f32 %v5505_v16, %v2424_v30 }
 0x540   :  { %v5519_v8 = vpop.f32.mrf.mxu2  ;;  %v2105_v56 = vadd.f32 %v2104_v58, %v5863_v3  ;;  %v2723_v58 = vadd.f32 %v2722_v44, %v2683_v45 }
 0x542   :  { %v5491_v32 = vpop.f32.mrf.mxu3  ;;  %v2194_v51 = vadd.f32 %v2193_v48, %v2105_v56  ;;  %v2724_v48 = vadd.f32 %v2723_v58, %v2685_v11 }
 0x543   :  { %v2357_v17 = vadd.f32 %v5491_v32, %v2268_v34  ;;  %v2689_v32 = vmul.f32 %v5537_v24, %v2433_v54  ;;  %v2758_v54 = vadd.f32 %v5487_v31, %v2680_v55 }
 0x544   :  { %v2437_v23 = vmax.f32 %v2194_v51, 0.0  ;;  %v2725_v19 = vadd.f32 %v2724_v48, %v2687_v59 }
 0x547   :  { %v2106_v53 = vpop.f32.mrf.mxu0  ;;  %v2195_v9 = vpop.f32.mrf.mxu1 }
 0x548   :  { %v2107_v6 = vadd.f32 %v2106_v53, %v5864_v14  ;;  %v2284_v15 = vpop.f32.mrf.mxu2  ;;  %v5550_v53 = vpop.permute.xlu1 %2619 }
 0x549   :  { %v2693_v18 = vmul.f32 %v5550_v53, %v2437_v23 }
 0x54a   :  { %v5495_v21 = vpop.f32.mrf.mxu3  ;;  %v2196_v5 = vadd.f32 %v2195_v9, %v2107_v6  ;;  %v2426_v9 = vmax.f32 %v2357_v17, 0.0  ;;  %v2630_v6 = vpop.permute.xlu0 %2629 }
 0x54b   :  { %v2359_v37 = vadd.f32 %v5495_v21, %v2270_v12  ;;  %v2278_v21 = vadd.f32 %v5499_v38, %v5861_v25 }
 0x54c   :  { %v2439_v45 = vmax.f32 %v2196_v5, 0.0  ;;  %v2682_v44 = vmul.f32 %v5507_v52, %v2426_v9 }
 0x54d   :  { %v2428_v43 = vmax.f32 %v2359_v37, 0.0 }
 0x54e   :  { %v2695_v25 = vmul.f32 %v2625_v40, %v2439_v45  ;;  %v2759_v12 = vadd.f32 %v2758_v54, %v2682_v44 }
 0x54f   :  { %v2109_v36 = vpop.f32.mrf.mxu0  ;;  %v2198_v29 = vpop.f32.mrf.mxu1  ;;  %v2684_v51 = vmul.f32 %v5516_v46, %v2428_v43 }
 0x550   :  { %v2110_v50 = vadd.f32 %v2109_v36, %v5865_v61  ;;  %v2287_v28 = vpop.f32.mrf.mxu2 }
 0x551   :  { %v2288_v27 = vadd.f32 %v2287_v28, %v5865_v61  ;;  %v2760_v31 = vadd.f32 %v2759_v12, %v2684_v51 }
 0x552   :  { %v5497_v41 = vpop.f32.mrf.mxu3  ;;  %v2199_v36 = vadd.f32 %v2198_v29, %v2110_v50  ;;  %v2726_v29 = vadd.f32 %v2725_v19, %v2689_v32 }
 0x553   :  { %v2362_v39 = vadd.f32 %v5497_v41, %v2273_v10  ;;  %v2280_v41 = vadd.f32 %v5503_v33, %v5862_v42 }
 0x554   :  { %v2441_v57 = vmax.f32 %v2199_v36, 0.0  ;;  %v2727_v38 = vadd.f32 %v2726_v29, %v2691_v63 }
 0x555   :  { %v2430_v11 = vmax.f32 %v2362_v39, 0.0 }
 0x556   :  { %v2728_v42 = vadd.f32 %v2727_v38, %v2693_v18  ;;  %v2697_v52 = vmul.f32 %v2630_v6, %v2441_v57  ;;  %v2776_v38 = vstv %s5597_s8 }
 0x557   :  { %v2111_v20 = vpop.f32.mrf.mxu0  ;;  %v2200_v60 = vpop.f32.mrf.mxu1  ;;  %v2686_v17 = vmul.f32 %v5521_v47, %v2430_v11 }
 0x558   :  { %v2112_v2 = vadd.f32 %v2111_v20, %v5866_v0  ;;  %v2285_v20 = vadd.f32 %v2284_v15, %v5864_v14  ;;  %v2289_v32 = vpop.f32.mrf.mxu2 }
 0x559   :  { %v2761_v10 = vadd.f32 %v2760_v31, %v2686_v17 }
 0x55a   :  { %v5501_v1 = vpop.f32.mrf.mxu3  ;;  %v2201_v26 = vadd.f32 %v2200_v60, %v2112_v2 }
 0x55b   :  { %v2364_v56 = vadd.f32 %v5501_v1, %v2275_v7  ;;  %v2283_v1 = vadd.f32 %v5519_v8, %v5863_v3  ;;  %v2729_v8 = vadd.f32 %v2728_v42, %v2695_v25  ;;  %v2290_v7 = vadd.f32 %v2289_v32, %v5866_v0 }
 0x55c   :  { %v2443_v16 = vmax.f32 %v2201_v26, 0.0 }
 0x55d   :  { %v2432_v58 = vmax.f32 %v2364_v56, 0.0 }
 0x55f   :  { %v2688_v46 = vmul.f32 %v5526_v49, %v2432_v58 }
 0x561   :  { %v2762_v47 = vadd.f32 %v2761_v10, %v2688_v46 }
 0x562   :  { %v5511_v62 = vpop.f32.mrf.mxu3 }
 0x563   :  { %v2367_v34 = vadd.f32 %v5511_v62, %v2278_v21  ;;  %v2635_v62 = vpop.permute.xlu1 %2634 }
 0x564   :  { %v2699_v3 = vmul.f32 %v2635_v62, %v2443_v16 }
 0x565   :  { %v2434_v50 = vmax.f32 %v2367_v34, 0.0  ;;  %v2785_v34 = vlaneseq }
 0x567   :  { %v2690_v14 = vmul.f32 %v5537_v24, %v2434_v50  ;;  %vm2787_vm2 = vcmp.lt.s32.totalorder %v2785_v34, 256 }
 0x569   :  { %v2763_v23 = vadd.f32 %v2762_v47, %v2690_v14 }
 0x56a   :  { %v5524_v13 = vpop.f32.mrf.mxu3 }
 0x56b   :  { %v2369_v33 = vadd.f32 %v5524_v13, %v2280_v41  ;;  %v2730_v13 = vadd.f32 %v2729_v8, %v2697_v52 }
 0x56d   :  { %v2436_v5 = vmax.f32 %v2369_v33, 0.0  ;;  %v2731_v37 = vadd.f32 %v2730_v13, %v2699_v3 }
 0x56f   :  { %v2732_v49 = vrot.slane %v2731_v37, 4 }
 0x571   :  { %v2733_v26 = vadd.f32 %v2732_v49, %v2731_v37 }
 0x572   :  { %v2371_v22 = vpop.f32.mrf.mxu3 }
 0x573   :  { %v2372_v59 = vadd.f32 %v2371_v22, %v2283_v1  ;;  %v2692_v22 = vmul.f32 %v5543_v35, %v2436_v5  ;;  %v2734_v56 = vrot.slane %v2733_v26, 2 }
 0x575   :  { %v2438_v15 = vmax.f32 %v2372_v59, 0.0  ;;  %v2764_v9 = vadd.f32 %v2763_v23, %v2692_v22  ;;  %v2735_v57 = vadd.f32 %v2734_v56, %v2733_v26 }
 0x577   :  { %v2694_v61 = vmul.f32 %v5550_v53, %v2438_v15  ;;  %v2736_v41 = vrot.slane %v2735_v57, 1 }
 0x579   :  { %v2765_v63 = vadd.f32 %v2764_v9, %v2694_v61 }
 0x57a   :  { %v2373_v4 = vpop.f32.mrf.mxu3 }
 0x57b   :  { %v2374_v48 = vadd.f32 %v2373_v4, %v2285_v20 }
 0x57d   :  { %v2440_v2 = vmax.f32 %v2374_v48, 0.0 }
 0x57f   :  { %v2696_v39 = vmul.f32 %v2625_v40, %v2440_v2  ;;  %v2737_v40 = vadd.f32 %v2736_v41, %v2735_v57 }
 0x581   :  { %v2766_v21 = vadd.f32 %v2765_v63, %v2696_v39  ;;  %v2777_v16 = vadd.f32 %v2776_v38, %v2737_v40 }
 0x582   :  { %v2376_v60 = vpop.f32.mrf.mxu3 }
 0x583   :  { %v2377_v30 = vadd.f32 %v2376_v60, %v2288_v27 }
 0x585   :  { %v2442_v36 = vmax.f32 %v2377_v30, 0.0 }
 0x587   :  { %v2698_v24 = vmul.f32 %v2630_v6, %v2442_v36 }
 0x589   :  { %v2767_v43 = vadd.f32 %v2766_v21, %v2698_v24 }
 0x58a   :  { %v2378_v19 = vpop.f32.mrf.mxu3 }
 0x58b   :  { %v2379_v45 = vadd.f32 %v2378_v19, %v2290_v7 }
 0x58d   :  { %v2444_v55 = vmax.f32 %v2379_v45, 0.0 }
 0x58f   :  { %v2700_v35 = vmul.f32 %v2635_v62, %v2444_v55 }
 0x591   :  { %v2768_v29 = vadd.f32 %v2767_v43, %v2700_v35 }
 0x593   :  { %v2769_v18 = vrot.slane %v2768_v29, 4 }
 0x595   :  { %v2770_v53 = vadd.f32 %v2769_v18, %v2768_v29 }
 0x597   :  { %v2771_v4 = vrot.slane %v2770_v53, 2 }
 0x599   :  { %v2772_v44 = vadd.f32 %v2771_v4, %v2770_v53 }
 0x59b   :  { %v2773_v0 = vrot.slane %v2772_v44, 1 }
 0x59d   :  { %v2774_v11 = vadd.f32 %v2773_v0, %v2772_v44 }
 0x59f   :  { %v2778_v25 = vadd.f32 %v2776_v38, %v2774_v11 }
 0x5a1   :  { %v2781_v1 = vrot.slane %v2778_v25, 7 }
 0x5a3   :  { %v2783_v28 = vsel %vm2782_vm1, %v2777_v16, %v2781_v1 }
 0x5a4   :  { %2789 = vst.msk [vmem:[#allocation3] sm:$0x3] %vm2787_vm2, %v2783_v28 }
 0x5a5   :  { %2800 = dma.vmem_to_hbm [thread:$0]  %s2796_s30, 32, %s2798_s12, [#allocation4]  }
 0x5a6   :  { %3267 = dma.done.wait [#allocation4], 32  }
 0x5a7   :  { %3268 = vsyncadd [#allocation4], 4294967264 }
 0x5a8   :  { %2805 = vsyncpa [#allocation4], 1 }

</bundles_post_ra>
